<compile_context>
chip_gen: v7x
topology: tpu7x:2x2x1
jax: 0.10.0
libtpu: 0.0.40
codegen_flags: <defaults>
</compile_context>

<pallas_src>
import jax
import jax.numpy as jnp
from jax.experimental import pallas as pl
from jax.experimental.pallas import tpu as pltpu

HIDDEN = 100      # LSTM hidden size implied by linear_4 (512 + 100)
HIDDEN_PAD = 128  # lane-dense internal hidden size
OUT_PAD = 128     # lane-dense padded width of linear_5 output


# ------------------------------ fused kernel -------------------------------

def _wdr_kernel(
    x_ref,      # (T*B, R)   time-major, flattened preprocessed-LSTM input
    deep_ref,   # (B, Dd)
    wide_ref,   # (B, Dw)
    wpre_ref, bpre_ref,          # (R, 256), (1, 256)
    wx_ref, wh_ref, bl_ref,      # (256, 4Hp), (Hp, 4Hp), (1, 4Hp)
    w1_ref, b1_ref,              # deep branch
    w2_ref, b2_ref,
    w21_ref, b21_ref,
    w3_ref, b3_ref,              # wide branch
    w4h_ref, w4d_ref, w4w_ref, b4_ref,   # split linear_4
    w5_ref, b5_ref,              # (256, OUT_PAD), (1, OUT_PAD)
    out_ref,    # (B, OUT_PAD)
):
    f32 = jnp.float32
    B = deep_ref.shape[0]
    T = x_ref.shape[0] // B
    Hp4 = wx_ref.shape[1]
    Hp = Hp4 // 4

    # ---- preprocess linear + fused LSTM input projection (one big matmul) ----
    pre = jnp.maximum(
        jnp.dot(x_ref[...], wpre_ref[...], preferred_element_type=f32)
        + bpre_ref[...], 0.0)                                  # (T*B, 256)
    xproj = (jnp.dot(pre, wx_ref[...], preferred_element_type=f32)
             + bl_ref[...])                                    # (T*B, 4Hp)

    # ---- recurrence: only the small (B,Hp)x(Hp,4Hp) matmul is serial ----
    wh = wh_ref[...]                                           # hoisted ref load
    h = jnp.zeros((B, Hp), f32)
    c = jnp.zeros((B, Hp), f32)
    for t in range(T):                                         # static unroll (T small)
        gates = xproj[t * B:(t + 1) * B, :] + jnp.dot(
            h, wh, preferred_element_type=f32)                 # (B, 4Hp)
        i_g = jax.nn.sigmoid(gates[:, 0 * Hp:1 * Hp])
        f_g = jax.nn.sigmoid(gates[:, 1 * Hp:2 * Hp])
        g_g = jnp.tanh(gates[:, 2 * Hp:3 * Hp])
        o_g = jax.nn.sigmoid(gates[:, 3 * Hp:4 * Hp])
        c = f_g * c + i_g * g_g
        h = o_g * jnp.tanh(c)
    # padded lanes of h are exactly zero (zero-padded wx/wh/bias columns).

    # ---- deep branch ----
    d = jnp.maximum(jnp.dot(deep_ref[...], w1_ref[...],
                            preferred_element_type=f32) + b1_ref[...], 0.0)
    d = jnp.maximum(jnp.dot(d, w2_ref[...],
                            preferred_element_type=f32) + b2_ref[...], 0.0)
    d = jnp.maximum(jnp.dot(d, w21_ref[...],
                            preferred_element_type=f32) + b21_ref[...], 0.0)

    # ---- wide branch ----
    wd = jnp.maximum(jnp.dot(wide_ref[...], w3_ref[...],
                             preferred_element_type=f32) + b3_ref[...], 0.0)

    # ---- merge via split linear_4 (no concat) + linear_5 ----
    m = (jnp.dot(h, w4h_ref[...], preferred_element_type=f32)
         + jnp.dot(d, w4d_ref[...], preferred_element_type=f32)
         + jnp.dot(wd, w4w_ref[...], preferred_element_type=f32)
         + b4_ref[...])
    m = jnp.maximum(m, 0.0)
    out = jnp.maximum(
        jnp.dot(m, w5_ref[...], preferred_element_type=f32) + b5_ref[...], 0.0)
    out_ref[...] = out                                          # lane-dense store


# ------------------------------- parameters --------------------------------

def init_params(key, rec_in, wide_in, deep_in, hidden=HIDDEN, hidden_pad=HIDDEN_PAD):
    def lin(k, din, dout):
        k1, k2 = jax.random.split(k)
        s = 1.0 / jnp.sqrt(jnp.float32(din))
        w = jax.random.uniform(k1, (din, dout), jnp.float32, -s, s)
        b = jax.random.uniform(k2, (dout,), jnp.float32, -s, s)
        return w, b.reshape(1, dout)

    keys = jax.random.split(key, 12)
    p = {}
    p["pre"] = lin(keys[0], rec_in, 256)
    p["l1"] = lin(keys[1], deep_in, 256)
    p["l2"] = lin(keys[2], 256, 256)
    p["l2_1"] = lin(keys[3], 256, 256)
    p["l3"] = lin(keys[4], wide_in, 256)

    # linear_4 split into row blocks matching concat order [h(100), deep(256), wide(256)]
    w4, b4 = lin(keys[5], 512 + hidden, 256)
    w4_h = jnp.pad(w4[:hidden], ((0, hidden_pad - hidden), (0, 0)))  # zero rows 100..127
    w4_d = w4[hidden:hidden + 256]
    w4_w = w4[hidden + 256:]
    p["l4"] = (w4_h, w4_d, w4_w, b4)

    # linear_5 padded to OUT_PAD output lanes (column 0 is the real output).
    w5, b5 = lin(keys[6], 256, 1)
    p["l5"] = (jnp.pad(w5, ((0, 0), (0, OUT_PAD - 1))),
               jnp.pad(b5, ((0, 0), (0, OUT_PAD - 1))))

    # LSTM params (gate order i, f, g, o), PyTorch-style init, fused + padded.
    s = 1.0 / jnp.sqrt(jnp.float32(hidden))
    wih = jax.random.uniform(keys[7], (4, 256, hidden), jnp.float32, -s, s)
    whh = jax.random.uniform(keys[8], (4, hidden, hidden), jnp.float32, -s, s)
    bih = jax.random.uniform(keys[9], (4, hidden), jnp.float32, -s, s)
    bhh = jax.random.uniform(keys[10], (4, hidden), jnp.float32, -s, s)
    pad_c = hidden_pad - hidden
    wx = jnp.concatenate(
        [jnp.pad(wih[k], ((0, 0), (0, pad_c))) for k in range(4)], axis=1)      # (256, 4Hp)
    wh = jnp.concatenate(
        [jnp.pad(whh[k], ((0, pad_c), (0, pad_c))) for k in range(4)], axis=1)  # (Hp, 4Hp)
    bl = jnp.concatenate(
        [jnp.pad(bih[k] + bhh[k], (0, pad_c)) for k in range(4)]
    ).reshape(1, 4 * hidden_pad)
    p["lstm"] = (wx, wh, bl)
    return p


# --------------------------------- forward ---------------------------------

@jax.jit
def wdr_forward(params, graph_features, deep_input, wide_input, indices):
    # glue: data-dependent gather + tiny raw-input layout fix (time-major, flat)
    gf = jnp.take(graph_features, indices, axis=0)            # (B, T, R)
    deep = jnp.take(deep_input, indices, axis=0)              # (B, Dd)
    wide = jnp.take(wide_input, indices, axis=0)              # (B, Dw)
    B, T, R = gf.shape
    x_tm = jnp.transpose(gf, (1, 0, 2)).reshape(T * B, R)     # (T*B, R)

    wpre, bpre = params["pre"]
    wx, wh, bl = params["lstm"]
    w1, b1 = params["l1"]
    w2, b2 = params["l2"]
    w21, b21 = params["l2_1"]
    w3, b3 = params["l3"]
    w4h, w4d, w4w, b4 = params["l4"]
    w5, b5 = params["l5"]

    args = (x_tm, deep, wide,
            wpre, bpre, wx, wh, bl,
            w1, b1, w2, b2, w21, b21,
            w3, b3,
            w4h, w4d, w4w, b4,
            w5, b5)

    out_pad = pl.pallas_call(
        _wdr_kernel,
        out_shape=jax.ShapeDtypeStruct((B, OUT_PAD), jnp.float32),
        in_specs=[pl.BlockSpec(memory_space=pltpu.MemorySpace.VMEM)] * len(args),
        out_specs=pl.BlockSpec(memory_space=pltpu.MemorySpace.VMEM),
    )(*args)
    return out_pad[:, :1]                                      # (B, 1)


if __name__ == "__main__":
    REC_IN, WIDE_IN, DEEP_IN = 8, 6, 10
    N, B, T = 6, 4, 8

    key = jax.random.PRNGKey(0)
    kp, k1, k2, k3 = jax.random.split(key, 4)
    params = init_params(kp, REC_IN, WIDE_IN, DEEP_IN)

    graph_features = jax.random.normal(k1, (N, T, REC_IN), jnp.float32)
    deep_input = jax.random.normal(k2, (N, DEEP_IN), jnp.float32)
    wide_input = jax.random.normal(k3, (N, WIDE_IN), jnp.float32)
    indices = jnp.array([0, 2, 3, 5], dtype=jnp.int32)

    out = wdr_forward(params, graph_features, deep_input, wide_input, indices)
    out = jax.block_until_ready(out)
    assert out.shape == (B, 1) and out.dtype == jnp.float32
    print("KERNEL_OK")
</pallas_src>

<mosaic_0001>
module attributes {stable_mosaic.version = 11 : i64} {
  func.func @_wdr_kernel(%arg0: memref<32x8xf32, #tpu.memory_space<vmem>>, %arg1: memref<4x10xf32, #tpu.memory_space<vmem>>, %arg2: memref<4x6xf32, #tpu.memory_space<vmem>>, %arg3: memref<8x256xf32, #tpu.memory_space<vmem>>, %arg4: memref<1x256xf32, #tpu.memory_space<vmem>>, %arg5: memref<256x512xf32, #tpu.memory_space<vmem>>, %arg6: memref<128x512xf32, #tpu.memory_space<vmem>>, %arg7: memref<1x512xf32, #tpu.memory_space<vmem>>, %arg8: memref<10x256xf32, #tpu.memory_space<vmem>>, %arg9: memref<1x256xf32, #tpu.memory_space<vmem>>, %arg10: memref<256x256xf32, #tpu.memory_space<vmem>>, %arg11: memref<1x256xf32, #tpu.memory_space<vmem>>, %arg12: memref<256x256xf32, #tpu.memory_space<vmem>>, %arg13: memref<1x256xf32, #tpu.memory_space<vmem>>, %arg14: memref<6x256xf32, #tpu.memory_space<vmem>>, %arg15: memref<1x256xf32, #tpu.memory_space<vmem>>, %arg16: memref<128x256xf32, #tpu.memory_space<vmem>>, %arg17: memref<256x256xf32, #tpu.memory_space<vmem>>, %arg18: memref<256x256xf32, #tpu.memory_space<vmem>>, %arg19: memref<1x256xf32, #tpu.memory_space<vmem>>, %arg20: memref<256x128xf32, #tpu.memory_space<vmem>>, %arg21: memref<1x128xf32, #tpu.memory_space<vmem>>, %arg22: memref<4x128xf32, #tpu.memory_space<vmem>>) attributes {dimension_semantics = [], scalar_prefetch = 0 : i64, scratch_operands = 0 : i64, tpu.core_type = #tpu.core_type<tc>} {
    %c0 = arith.constant 0 : index
    %c0_0 = arith.constant 0 : index
    %0 = vector.load %arg0[%c0, %c0_0] : memref<32x8xf32, #tpu.memory_space<vmem>>, vector<32x8xf32>
    %c0_1 = arith.constant 0 : index
    %c0_2 = arith.constant 0 : index
    %1 = vector.load %arg3[%c0_1, %c0_2] : memref<8x256xf32, #tpu.memory_space<vmem>>, vector<8x256xf32>
    %cst = arith.constant dense<0.000000e+00> : vector<32x256xf32>
    %2 = tpu.matmul %0, %1, %cst {dimension_numbers = #tpu.dot_dimension_numbers<[1], [0], [0], [1], [0, 0, 1, 1], [], []>} : vector<32x8xf32>, vector<8x256xf32>, vector<32x256xf32> -> vector<32x256xf32>
    %c0_3 = arith.constant 0 : index
    %c0_4 = arith.constant 0 : index
    %3 = vector.load %arg4[%c0_3, %c0_4] : memref<1x256xf32, #tpu.memory_space<vmem>>, vector<1x256xf32>
    %4 = vector.broadcast %3 : vector<1x256xf32> to vector<32x256xf32>
    %5 = arith.addf %2, %4 : vector<32x256xf32>
    %cst_5 = arith.constant 0.000000e+00 : f32
    %6 = vector.broadcast %cst_5 : f32 to vector<32x256xf32>
    %7 = arith.maximumf %5, %6 : vector<32x256xf32>
    %c0_6 = arith.constant 0 : index
    %c0_7 = arith.constant 0 : index
    %8 = vector.load %arg5[%c0_6, %c0_7] : memref<256x512xf32, #tpu.memory_space<vmem>>, vector<256x512xf32>
    %cst_8 = arith.constant dense<0.000000e+00> : vector<32x512xf32>
    %9 = tpu.matmul %7, %8, %cst_8 {dimension_numbers = #tpu.dot_dimension_numbers<[1], [0], [0], [1], [0, 0, 1, 1], [], []>} : vector<32x256xf32>, vector<256x512xf32>, vector<32x512xf32> -> vector<32x512xf32>
    %c0_9 = arith.constant 0 : index
    %c0_10 = arith.constant 0 : index
    %10 = vector.load %arg7[%c0_9, %c0_10] : memref<1x512xf32, #tpu.memory_space<vmem>>, vector<1x512xf32>
    %11 = vector.broadcast %10 : vector<1x512xf32> to vector<32x512xf32>
    %12 = arith.addf %9, %11 : vector<32x512xf32>
    %c0_11 = arith.constant 0 : index
    %c0_12 = arith.constant 0 : index
    %13 = vector.load %arg6[%c0_11, %c0_12] : memref<128x512xf32, #tpu.memory_space<vmem>>, vector<128x512xf32>
    %cst_13 = arith.constant 0.000000e+00 : f32
    %14 = vector.broadcast %cst_13 : f32 to vector<4x128xf32>
    %cst_14 = arith.constant 0.000000e+00 : f32
    %15 = vector.broadcast %cst_14 : f32 to vector<4x128xf32>
    %16 = vector.extract_strided_slice %12 {offsets = [0, 0], sizes = [4, 512], strides = [1, 1]} : vector<32x512xf32> to vector<4x512xf32>
    %cst_15 = arith.constant dense<0.000000e+00> : vector<4x512xf32>
    %17 = tpu.matmul %14, %13, %cst_15 {dimension_numbers = #tpu.dot_dimension_numbers<[1], [0], [0], [1], [0, 0, 1, 1], [], []>} : vector<4x128xf32>, vector<128x512xf32>, vector<4x512xf32> -> vector<4x512xf32>
    %18 = arith.addf %16, %17 : vector<4x512xf32>
    %19 = vector.extract_strided_slice %18 {offsets = [0, 0], sizes = [4, 128], strides = [1, 1]} : vector<4x512xf32> to vector<4x128xf32>
    %20 = arith.negf %19 : vector<4x128xf32>
    %21 = math.exp %20 : vector<4x128xf32>
    %cst_16 = arith.constant 1.000000e+00 : f32
    %22 = vector.broadcast %cst_16 : f32 to vector<4x128xf32>
    %23 = arith.addf %22, %21 : vector<4x128xf32>
    %24 = arith.divf %22, %23 : vector<4x128xf32>
    %25 = vector.extract_strided_slice %18 {offsets = [0, 128], sizes = [4, 128], strides = [1, 1]} : vector<4x512xf32> to vector<4x128xf32>
    %26 = arith.negf %25 : vector<4x128xf32>
    %27 = math.exp %26 : vector<4x128xf32>
    %cst_17 = arith.constant 1.000000e+00 : f32
    %28 = vector.broadcast %cst_17 : f32 to vector<4x128xf32>
    %29 = arith.addf %28, %27 : vector<4x128xf32>
    %30 = arith.divf %28, %29 : vector<4x128xf32>
    %31 = vector.extract_strided_slice %18 {offsets = [0, 256], sizes = [4, 128], strides = [1, 1]} : vector<4x512xf32> to vector<4x128xf32>
    %32 = math.tanh %31 : vector<4x128xf32>
    %33 = vector.extract_strided_slice %18 {offsets = [0, 384], sizes = [4, 128], strides = [1, 1]} : vector<4x512xf32> to vector<4x128xf32>
    %34 = arith.negf %33 : vector<4x128xf32>
    %35 = math.exp %34 : vector<4x128xf32>
    %cst_18 = arith.constant 1.000000e+00 : f32
    %36 = vector.broadcast %cst_18 : f32 to vector<4x128xf32>
    %37 = arith.addf %36, %35 : vector<4x128xf32>
    %38 = arith.divf %36, %37 : vector<4x128xf32>
    %39 = arith.mulf %30, %15 : vector<4x128xf32>
    %40 = arith.mulf %24, %32 : vector<4x128xf32>
    %41 = arith.addf %39, %40 : vector<4x128xf32>
    %42 = math.tanh %41 : vector<4x128xf32>
    %43 = arith.mulf %38, %42 : vector<4x128xf32>
    %44 = vector.extract_strided_slice %12 {offsets = [4, 0], sizes = [4, 512], strides = [1, 1]} : vector<32x512xf32> to vector<4x512xf32>
    %cst_19 = arith.constant dense<0.000000e+00> : vector<4x512xf32>
    %45 = tpu.matmul %43, %13, %cst_19 {dimension_numbers = #tpu.dot_dimension_numbers<[1], [0], [0], [1], [0, 0, 1, 1], [], []>} : vector<4x128xf32>, vector<128x512xf32>, vector<4x512xf32> -> vector<4x512xf32>
    %46 = arith.addf %44, %45 : vector<4x512xf32>
    %47 = vector.extract_strided_slice %46 {offsets = [0, 0], sizes = [4, 128], strides = [1, 1]} : vector<4x512xf32> to vector<4x128xf32>
    %48 = arith.negf %47 : vector<4x128xf32>
    %49 = math.exp %48 : vector<4x128xf32>
    %cst_20 = arith.constant 1.000000e+00 : f32
    %50 = vector.broadcast %cst_20 : f32 to vector<4x128xf32>
    %51 = arith.addf %50, %49 : vector<4x128xf32>
    %52 = arith.divf %50, %51 : vector<4x128xf32>
    %53 = vector.extract_strided_slice %46 {offsets = [0, 128], sizes = [4, 128], strides = [1, 1]} : vector<4x512xf32> to vector<4x128xf32>
    %54 = arith.negf %53 : vector<4x128xf32>
    %55 = math.exp %54 : vector<4x128xf32>
    %cst_21 = arith.constant 1.000000e+00 : f32
    %56 = vector.broadcast %cst_21 : f32 to vector<4x128xf32>
    %57 = arith.addf %56, %55 : vector<4x128xf32>
    %58 = arith.divf %56, %57 : vector<4x128xf32>
    %59 = vector.extract_strided_slice %46 {offsets = [0, 256], sizes = [4, 128], strides = [1, 1]} : vector<4x512xf32> to vector<4x128xf32>
    %60 = math.tanh %59 : vector<4x128xf32>
    %61 = vector.extract_strided_slice %46 {offsets = [0, 384], sizes = [4, 128], strides = [1, 1]} : vector<4x512xf32> to vector<4x128xf32>
    %62 = arith.negf %61 : vector<4x128xf32>
    %63 = math.exp %62 : vector<4x128xf32>
    %cst_22 = arith.constant 1.000000e+00 : f32
    %64 = vector.broadcast %cst_22 : f32 to vector<4x128xf32>
    %65 = arith.addf %64, %63 : vector<4x128xf32>
    %66 = arith.divf %64, %65 : vector<4x128xf32>
    %67 = arith.mulf %58, %41 : vector<4x128xf32>
    %68 = arith.mulf %52, %60 : vector<4x128xf32>
    %69 = arith.addf %67, %68 : vector<4x128xf32>
    %70 = math.tanh %69 : vector<4x128xf32>
    %71 = arith.mulf %66, %70 : vector<4x128xf32>
    %72 = vector.extract_strided_slice %12 {offsets = [8, 0], sizes = [4, 512], strides = [1, 1]} : vector<32x512xf32> to vector<4x512xf32>
    %cst_23 = arith.constant dense<0.000000e+00> : vector<4x512xf32>
    %73 = tpu.matmul %71, %13, %cst_23 {dimension_numbers = #tpu.dot_dimension_numbers<[1], [0], [0], [1], [0, 0, 1, 1], [], []>} : vector<4x128xf32>, vector<128x512xf32>, vector<4x512xf32> -> vector<4x512xf32>
    %74 = arith.addf %72, %73 : vector<4x512xf32>
    %75 = vector.extract_strided_slice %74 {offsets = [0, 0], sizes = [4, 128], strides = [1, 1]} : vector<4x512xf32> to vector<4x128xf32>
    %76 = arith.negf %75 : vector<4x128xf32>
    %77 = math.exp %76 : vector<4x128xf32>
    %cst_24 = arith.constant 1.000000e+00 : f32
    %78 = vector.broadcast %cst_24 : f32 to vector<4x128xf32>
    %79 = arith.addf %78, %77 : vector<4x128xf32>
    %80 = arith.divf %78, %79 : vector<4x128xf32>
    %81 = vector.extract_strided_slice %74 {offsets = [0, 128], sizes = [4, 128], strides = [1, 1]} : vector<4x512xf32> to vector<4x128xf32>
    %82 = arith.negf %81 : vector<4x128xf32>
    %83 = math.exp %82 : vector<4x128xf32>
    %cst_25 = arith.constant 1.000000e+00 : f32
    %84 = vector.broadcast %cst_25 : f32 to vector<4x128xf32>
    %85 = arith.addf %84, %83 : vector<4x128xf32>
    %86 = arith.divf %84, %85 : vector<4x128xf32>
    %87 = vector.extract_strided_slice %74 {offsets = [0, 256], sizes = [4, 128], strides = [1, 1]} : vector<4x512xf32> to vector<4x128xf32>
    %88 = math.tanh %87 : vector<4x128xf32>
    %89 = vector.extract_strided_slice %74 {offsets = [0, 384], sizes = [4, 128], strides = [1, 1]} : vector<4x512xf32> to vector<4x128xf32>
    %90 = arith.negf %89 : vector<4x128xf32>
    %91 = math.exp %90 : vector<4x128xf32>
    %cst_26 = arith.constant 1.000000e+00 : f32
    %92 = vector.broadcast %cst_26 : f32 to vector<4x128xf32>
    %93 = arith.addf %92, %91 : vector<4x128xf32>
    %94 = arith.divf %92, %93 : vector<4x128xf32>
    %95 = arith.mulf %86, %69 : vector<4x128xf32>
    %96 = arith.mulf %80, %88 : vector<4x128xf32>
    %97 = arith.addf %95, %96 : vector<4x128xf32>
    %98 = math.tanh %97 : vector<4x128xf32>
    %99 = arith.mulf %94, %98 : vector<4x128xf32>
    %100 = vector.extract_strided_slice %12 {offsets = [12, 0], sizes = [4, 512], strides = [1, 1]} : vector<32x512xf32> to vector<4x512xf32>
    %cst_27 = arith.constant dense<0.000000e+00> : vector<4x512xf32>
    %101 = tpu.matmul %99, %13, %cst_27 {dimension_numbers = #tpu.dot_dimension_numbers<[1], [0], [0], [1], [0, 0, 1, 1], [], []>} : vector<4x128xf32>, vector<128x512xf32>, vector<4x512xf32> -> vector<4x512xf32>
    %102 = arith.addf %100, %101 : vector<4x512xf32>
    %103 = vector.extract_strided_slice %102 {offsets = [0, 0], sizes = [4, 128], strides = [1, 1]} : vector<4x512xf32> to vector<4x128xf32>
    %104 = arith.negf %103 : vector<4x128xf32>
    %105 = math.exp %104 : vector<4x128xf32>
    %cst_28 = arith.constant 1.000000e+00 : f32
    %106 = vector.broadcast %cst_28 : f32 to vector<4x128xf32>
    %107 = arith.addf %106, %105 : vector<4x128xf32>
    %108 = arith.divf %106, %107 : vector<4x128xf32>
    %109 = vector.extract_strided_slice %102 {offsets = [0, 128], sizes = [4, 128], strides = [1, 1]} : vector<4x512xf32> to vector<4x128xf32>
    %110 = arith.negf %109 : vector<4x128xf32>
    %111 = math.exp %110 : vector<4x128xf32>
    %cst_29 = arith.constant 1.000000e+00 : f32
    %112 = vector.broadcast %cst_29 : f32 to vector<4x128xf32>
    %113 = arith.addf %112, %111 : vector<4x128xf32>
    %114 = arith.divf %112, %113 : vector<4x128xf32>
    %115 = vector.extract_strided_slice %102 {offsets = [0, 256], sizes = [4, 128], strides = [1, 1]} : vector<4x512xf32> to vector<4x128xf32>
    %116 = math.tanh %115 : vector<4x128xf32>
    %117 = vector.extract_strided_slice %102 {offsets = [0, 384], sizes = [4, 128], strides = [1, 1]} : vector<4x512xf32> to vector<4x128xf32>
    %118 = arith.negf %117 : vector<4x128xf32>
    %119 = math.exp %118 : vector<4x128xf32>
    %cst_30 = arith.constant 1.000000e+00 : f32
    %120 = vector.broadcast %cst_30 : f32 to vector<4x128xf32>
    %121 = arith.addf %120, %119 : vector<4x128xf32>
    %122 = arith.divf %120, %121 : vector<4x128xf32>
    %123 = arith.mulf %114, %97 : vector<4x128xf32>
    %124 = arith.mulf %108, %116 : vector<4x128xf32>
    %125 = arith.addf %123, %124 : vector<4x128xf32>
    %126 = math.tanh %125 : vector<4x128xf32>
    %127 = arith.mulf %122, %126 : vector<4x128xf32>
    %128 = vector.extract_strided_slice %12 {offsets = [16, 0], sizes = [4, 512], strides = [1, 1]} : vector<32x512xf32> to vector<4x512xf32>
    %cst_31 = arith.constant dense<0.000000e+00> : vector<4x512xf32>
    %129 = tpu.matmul %127, %13, %cst_31 {dimension_numbers = #tpu.dot_dimension_numbers<[1], [0], [0], [1], [0, 0, 1, 1], [], []>} : vector<4x128xf32>, vector<128x512xf32>, vector<4x512xf32> -> vector<4x512xf32>
    %130 = arith.addf %128, %129 : vector<4x512xf32>
    %131 = vector.extract_strided_slice %130 {offsets = [0, 0], sizes = [4, 128], strides = [1, 1]} : vector<4x512xf32> to vector<4x128xf32>
    %132 = arith.negf %131 : vector<4x128xf32>
    %133 = math.exp %132 : vector<4x128xf32>
    %cst_32 = arith.constant 1.000000e+00 : f32
    %134 = vector.broadcast %cst_32 : f32 to vector<4x128xf32>
    %135 = arith.addf %134, %133 : vector<4x128xf32>
    %136 = arith.divf %134, %135 : vector<4x128xf32>
    %137 = vector.extract_strided_slice %130 {offsets = [0, 128], sizes = [4, 128], strides = [1, 1]} : vector<4x512xf32> to vector<4x128xf32>
    %138 = arith.negf %137 : vector<4x128xf32>
    %139 = math.exp %138 : vector<4x128xf32>
    %cst_33 = arith.constant 1.000000e+00 : f32
    %140 = vector.broadcast %cst_33 : f32 to vector<4x128xf32>
    %141 = arith.addf %140, %139 : vector<4x128xf32>
    %142 = arith.divf %140, %141 : vector<4x128xf32>
    %143 = vector.extract_strided_slice %130 {offsets = [0, 256], sizes = [4, 128], strides = [1, 1]} : vector<4x512xf32> to vector<4x128xf32>
    %144 = math.tanh %143 : vector<4x128xf32>
    %145 = vector.extract_strided_slice %130 {offsets = [0, 384], sizes = [4, 128], strides = [1, 1]} : vector<4x512xf32> to vector<4x128xf32>
    %146 = arith.negf %145 : vector<4x128xf32>
    %147 = math.exp %146 : vector<4x128xf32>
    %cst_34 = arith.constant 1.000000e+00 : f32
    %148 = vector.broadcast %cst_34 : f32 to vector<4x128xf32>
    %149 = arith.addf %148, %147 : vector<4x128xf32>
    %150 = arith.divf %148, %149 : vector<4x128xf32>
    %151 = arith.mulf %142, %125 : vector<4x128xf32>
    %152 = arith.mulf %136, %144 : vector<4x128xf32>
    %153 = arith.addf %151, %152 : vector<4x128xf32>
    %154 = math.tanh %153 : vector<4x128xf32>
    %155 = arith.mulf %150, %154 : vector<4x128xf32>
    %156 = vector.extract_strided_slice %12 {offsets = [20, 0], sizes = [4, 512], strides = [1, 1]} : vector<32x512xf32> to vector<4x512xf32>
    %cst_35 = arith.constant dense<0.000000e+00> : vector<4x512xf32>
    %157 = tpu.matmul %155, %13, %cst_35 {dimension_numbers = #tpu.dot_dimension_numbers<[1], [0], [0], [1], [0, 0, 1, 1], [], []>} : vector<4x128xf32>, vector<128x512xf32>, vector<4x512xf32> -> vector<4x512xf32>
    %158 = arith.addf %156, %157 : vector<4x512xf32>
    %159 = vector.extract_strided_slice %158 {offsets = [0, 0], sizes = [4, 128], strides = [1, 1]} : vector<4x512xf32> to vector<4x128xf32>
    %160 = arith.negf %159 : vector<4x128xf32>
    %161 = math.exp %160 : vector<4x128xf32>
    %cst_36 = arith.constant 1.000000e+00 : f32
    %162 = vector.broadcast %cst_36 : f32 to vector<4x128xf32>
    %163 = arith.addf %162, %161 : vector<4x128xf32>
    %164 = arith.divf %162, %163 : vector<4x128xf32>
    %165 = vector.extract_strided_slice %158 {offsets = [0, 128], sizes = [4, 128], strides = [1, 1]} : vector<4x512xf32> to vector<4x128xf32>
    %166 = arith.negf %165 : vector<4x128xf32>
    %167 = math.exp %166 : vector<4x128xf32>
    %cst_37 = arith.constant 1.000000e+00 : f32
    %168 = vector.broadcast %cst_37 : f32 to vector<4x128xf32>
    %169 = arith.addf %168, %167 : vector<4x128xf32>
    %170 = arith.divf %168, %169 : vector<4x128xf32>
    %171 = vector.extract_strided_slice %158 {offsets = [0, 256], sizes = [4, 128], strides = [1, 1]} : vector<4x512xf32> to vector<4x128xf32>
    %172 = math.tanh %171 : vector<4x128xf32>
    %173 = vector.extract_strided_slice %158 {offsets = [0, 384], sizes = [4, 128], strides = [1, 1]} : vector<4x512xf32> to vector<4x128xf32>
    %174 = arith.negf %173 : vector<4x128xf32>
    %175 = math.exp %174 : vector<4x128xf32>
    %cst_38 = arith.constant 1.000000e+00 : f32
    %176 = vector.broadcast %cst_38 : f32 to vector<4x128xf32>
    %177 = arith.addf %176, %175 : vector<4x128xf32>
    %178 = arith.divf %176, %177 : vector<4x128xf32>
    %179 = arith.mulf %170, %153 : vector<4x128xf32>
    %180 = arith.mulf %164, %172 : vector<4x128xf32>
    %181 = arith.addf %179, %180 : vector<4x128xf32>
    %182 = math.tanh %181 : vector<4x128xf32>
    %183 = arith.mulf %178, %182 : vector<4x128xf32>
    %184 = vector.extract_strided_slice %12 {offsets = [24, 0], sizes = [4, 512], strides = [1, 1]} : vector<32x512xf32> to vector<4x512xf32>
    %cst_39 = arith.constant dense<0.000000e+00> : vector<4x512xf32>
    %185 = tpu.matmul %183, %13, %cst_39 {dimension_numbers = #tpu.dot_dimension_numbers<[1], [0], [0], [1], [0, 0, 1, 1], [], []>} : vector<4x128xf32>, vector<128x512xf32>, vector<4x512xf32> -> vector<4x512xf32>
    %186 = arith.addf %184, %185 : vector<4x512xf32>
    %187 = vector.extract_strided_slice %186 {offsets = [0, 0], sizes = [4, 128], strides = [1, 1]} : vector<4x512xf32> to vector<4x128xf32>
    %188 = arith.negf %187 : vector<4x128xf32>
    %189 = math.exp %188 : vector<4x128xf32>
    %cst_40 = arith.constant 1.000000e+00 : f32
    %190 = vector.broadcast %cst_40 : f32 to vector<4x128xf32>
    %191 = arith.addf %190, %189 : vector<4x128xf32>
    %192 = arith.divf %190, %191 : vector<4x128xf32>
    %193 = vector.extract_strided_slice %186 {offsets = [0, 128], sizes = [4, 128], strides = [1, 1]} : vector<4x512xf32> to vector<4x128xf32>
    %194 = arith.negf %193 : vector<4x128xf32>
    %195 = math.exp %194 : vector<4x128xf32>
    %cst_41 = arith.constant 1.000000e+00 : f32
    %196 = vector.broadcast %cst_41 : f32 to vector<4x128xf32>
    %197 = arith.addf %196, %195 : vector<4x128xf32>
    %198 = arith.divf %196, %197 : vector<4x128xf32>
    %199 = vector.extract_strided_slice %186 {offsets = [0, 256], sizes = [4, 128], strides = [1, 1]} : vector<4x512xf32> to vector<4x128xf32>
    %200 = math.tanh %199 : vector<4x128xf32>
    %201 = vector.extract_strided_slice %186 {offsets = [0, 384], sizes = [4, 128], strides = [1, 1]} : vector<4x512xf32> to vector<4x128xf32>
    %202 = arith.negf %201 : vector<4x128xf32>
    %203 = math.exp %202 : vector<4x128xf32>
    %cst_42 = arith.constant 1.000000e+00 : f32
    %204 = vector.broadcast %cst_42 : f32 to vector<4x128xf32>
    %205 = arith.addf %204, %203 : vector<4x128xf32>
    %206 = arith.divf %204, %205 : vector<4x128xf32>
    %207 = arith.mulf %198, %181 : vector<4x128xf32>
    %208 = arith.mulf %192, %200 : vector<4x128xf32>
    %209 = arith.addf %207, %208 : vector<4x128xf32>
    %210 = math.tanh %209 : vector<4x128xf32>
    %211 = arith.mulf %206, %210 : vector<4x128xf32>
    %212 = vector.extract_strided_slice %12 {offsets = [28, 0], sizes = [4, 512], strides = [1, 1]} : vector<32x512xf32> to vector<4x512xf32>
    %cst_43 = arith.constant dense<0.000000e+00> : vector<4x512xf32>
    %213 = tpu.matmul %211, %13, %cst_43 {dimension_numbers = #tpu.dot_dimension_numbers<[1], [0], [0], [1], [0, 0, 1, 1], [], []>} : vector<4x128xf32>, vector<128x512xf32>, vector<4x512xf32> -> vector<4x512xf32>
    %214 = arith.addf %212, %213 : vector<4x512xf32>
    %215 = vector.extract_strided_slice %214 {offsets = [0, 0], sizes = [4, 128], strides = [1, 1]} : vector<4x512xf32> to vector<4x128xf32>
    %216 = arith.negf %215 : vector<4x128xf32>
    %217 = math.exp %216 : vector<4x128xf32>
    %cst_44 = arith.constant 1.000000e+00 : f32
    %218 = vector.broadcast %cst_44 : f32 to vector<4x128xf32>
    %219 = arith.addf %218, %217 : vector<4x128xf32>
    %220 = arith.divf %218, %219 : vector<4x128xf32>
    %221 = vector.extract_strided_slice %214 {offsets = [0, 128], sizes = [4, 128], strides = [1, 1]} : vector<4x512xf32> to vector<4x128xf32>
    %222 = arith.negf %221 : vector<4x128xf32>
    %223 = math.exp %222 : vector<4x128xf32>
    %cst_45 = arith.constant 1.000000e+00 : f32
    %224 = vector.broadcast %cst_45 : f32 to vector<4x128xf32>
    %225 = arith.addf %224, %223 : vector<4x128xf32>
    %226 = arith.divf %224, %225 : vector<4x128xf32>
    %227 = vector.extract_strided_slice %214 {offsets = [0, 256], sizes = [4, 128], strides = [1, 1]} : vector<4x512xf32> to vector<4x128xf32>
    %228 = math.tanh %227 : vector<4x128xf32>
    %229 = vector.extract_strided_slice %214 {offsets = [0, 384], sizes = [4, 128], strides = [1, 1]} : vector<4x512xf32> to vector<4x128xf32>
    %230 = arith.negf %229 : vector<4x128xf32>
    %231 = math.exp %230 : vector<4x128xf32>
    %cst_46 = arith.constant 1.000000e+00 : f32
    %232 = vector.broadcast %cst_46 : f32 to vector<4x128xf32>
    %233 = arith.addf %232, %231 : vector<4x128xf32>
    %234 = arith.divf %232, %233 : vector<4x128xf32>
    %235 = arith.mulf %226, %209 : vector<4x128xf32>
    %236 = arith.mulf %220, %228 : vector<4x128xf32>
    %237 = arith.addf %235, %236 : vector<4x128xf32>
    %238 = math.tanh %237 : vector<4x128xf32>
    %239 = arith.mulf %234, %238 : vector<4x128xf32>
    %c0_47 = arith.constant 0 : index
    %c0_48 = arith.constant 0 : index
    %240 = vector.load %arg1[%c0_47, %c0_48] : memref<4x10xf32, #tpu.memory_space<vmem>>, vector<4x10xf32>
    %c0_49 = arith.constant 0 : index
    %c0_50 = arith.constant 0 : index
    %241 = vector.load %arg8[%c0_49, %c0_50] : memref<10x256xf32, #tpu.memory_space<vmem>>, vector<10x256xf32>
    %cst_51 = arith.constant dense<0.000000e+00> : vector<4x256xf32>
    %242 = tpu.matmul %240, %241, %cst_51 {dimension_numbers = #tpu.dot_dimension_numbers<[1], [0], [0], [1], [0, 0, 1, 1], [], []>} : vector<4x10xf32>, vector<10x256xf32>, vector<4x256xf32> -> vector<4x256xf32>
    %c0_52 = arith.constant 0 : index
    %c0_53 = arith.constant 0 : index
    %243 = vector.load %arg9[%c0_52, %c0_53] : memref<1x256xf32, #tpu.memory_space<vmem>>, vector<1x256xf32>
    %244 = vector.broadcast %243 : vector<1x256xf32> to vector<4x256xf32>
    %245 = arith.addf %242, %244 : vector<4x256xf32>
    %cst_54 = arith.constant 0.000000e+00 : f32
    %246 = vector.broadcast %cst_54 : f32 to vector<4x256xf32>
    %247 = arith.maximumf %245, %246 : vector<4x256xf32>
    %c0_55 = arith.constant 0 : index
    %c0_56 = arith.constant 0 : index
    %248 = vector.load %arg10[%c0_55, %c0_56] : memref<256x256xf32, #tpu.memory_space<vmem>>, vector<256x256xf32>
    %cst_57 = arith.constant dense<0.000000e+00> : vector<4x256xf32>
    %249 = tpu.matmul %247, %248, %cst_57 {dimension_numbers = #tpu.dot_dimension_numbers<[1], [0], [0], [1], [0, 0, 1, 1], [], []>} : vector<4x256xf32>, vector<256x256xf32>, vector<4x256xf32> -> vector<4x256xf32>
    %c0_58 = arith.constant 0 : index
    %c0_59 = arith.constant 0 : index
    %250 = vector.load %arg11[%c0_58, %c0_59] : memref<1x256xf32, #tpu.memory_space<vmem>>, vector<1x256xf32>
    %251 = vector.broadcast %250 : vector<1x256xf32> to vector<4x256xf32>
    %252 = arith.addf %249, %251 : vector<4x256xf32>
    %cst_60 = arith.constant 0.000000e+00 : f32
    %253 = vector.broadcast %cst_60 : f32 to vector<4x256xf32>
    %254 = arith.maximumf %252, %253 : vector<4x256xf32>
    %c0_61 = arith.constant 0 : index
    %c0_62 = arith.constant 0 : index
    %255 = vector.load %arg12[%c0_61, %c0_62] : memref<256x256xf32, #tpu.memory_space<vmem>>, vector<256x256xf32>
    %cst_63 = arith.constant dense<0.000000e+00> : vector<4x256xf32>
    %256 = tpu.matmul %254, %255, %cst_63 {dimension_numbers = #tpu.dot_dimension_numbers<[1], [0], [0], [1], [0, 0, 1, 1], [], []>} : vector<4x256xf32>, vector<256x256xf32>, vector<4x256xf32> -> vector<4x256xf32>
    %c0_64 = arith.constant 0 : index
    %c0_65 = arith.constant 0 : index
    %257 = vector.load %arg13[%c0_64, %c0_65] : memref<1x256xf32, #tpu.memory_space<vmem>>, vector<1x256xf32>
    %258 = vector.broadcast %257 : vector<1x256xf32> to vector<4x256xf32>
    %259 = arith.addf %256, %258 : vector<4x256xf32>
    %cst_66 = arith.constant 0.000000e+00 : f32
    %260 = vector.broadcast %cst_66 : f32 to vector<4x256xf32>
    %261 = arith.maximumf %259, %260 : vector<4x256xf32>
    %c0_67 = arith.constant 0 : index
    %c0_68 = arith.constant 0 : index
    %262 = vector.load %arg2[%c0_67, %c0_68] : memref<4x6xf32, #tpu.memory_space<vmem>>, vector<4x6xf32>
    %c0_69 = arith.constant 0 : index
    %c0_70 = arith.constant 0 : index
    %263 = vector.load %arg14[%c0_69, %c0_70] : memref<6x256xf32, #tpu.memory_space<vmem>>, vector<6x256xf32>
    %cst_71 = arith.constant dense<0.000000e+00> : vector<4x256xf32>
    %264 = tpu.matmul %262, %263, %cst_71 {dimension_numbers = #tpu.dot_dimension_numbers<[1], [0], [0], [1], [0, 0, 1, 1], [], []>} : vector<4x6xf32>, vector<6x256xf32>, vector<4x256xf32> -> vector<4x256xf32>
    %c0_72 = arith.constant 0 : index
    %c0_73 = arith.constant 0 : index
    %265 = vector.load %arg15[%c0_72, %c0_73] : memref<1x256xf32, #tpu.memory_space<vmem>>, vector<1x256xf32>
    %266 = vector.broadcast %265 : vector<1x256xf32> to vector<4x256xf32>
    %267 = arith.addf %264, %266 : vector<4x256xf32>
    %cst_74 = arith.constant 0.000000e+00 : f32
    %268 = vector.broadcast %cst_74 : f32 to vector<4x256xf32>
    %269 = arith.maximumf %267, %268 : vector<4x256xf32>
    %c0_75 = arith.constant 0 : index
    %c0_76 = arith.constant 0 : index
    %270 = vector.load %arg16[%c0_75, %c0_76] : memref<128x256xf32, #tpu.memory_space<vmem>>, vector<128x256xf32>
    %cst_77 = arith.constant dense<0.000000e+00> : vector<4x256xf32>
    %271 = tpu.matmul %239, %270, %cst_77 {dimension_numbers = #tpu.dot_dimension_numbers<[1], [0], [0], [1], [0, 0, 1, 1], [], []>} : vector<4x128xf32>, vector<128x256xf32>, vector<4x256xf32> -> vector<4x256xf32>
    %c0_78 = arith.constant 0 : index
    %c0_79 = arith.constant 0 : index
    %272 = vector.load %arg17[%c0_78, %c0_79] : memref<256x256xf32, #tpu.memory_space<vmem>>, vector<256x256xf32>
    %cst_80 = arith.constant dense<0.000000e+00> : vector<4x256xf32>
    %273 = tpu.matmul %261, %272, %cst_80 {dimension_numbers = #tpu.dot_dimension_numbers<[1], [0], [0], [1], [0, 0, 1, 1], [], []>} : vector<4x256xf32>, vector<256x256xf32>, vector<4x256xf32> -> vector<4x256xf32>
    %274 = arith.addf %271, %273 : vector<4x256xf32>
    %c0_81 = arith.constant 0 : index
    %c0_82 = arith.constant 0 : index
    %275 = vector.load %arg18[%c0_81, %c0_82] : memref<256x256xf32, #tpu.memory_space<vmem>>, vector<256x256xf32>
    %cst_83 = arith.constant dense<0.000000e+00> : vector<4x256xf32>
    %276 = tpu.matmul %269, %275, %cst_83 {dimension_numbers = #tpu.dot_dimension_numbers<[1], [0], [0], [1], [0, 0, 1, 1], [], []>} : vector<4x256xf32>, vector<256x256xf32>, vector<4x256xf32> -> vector<4x256xf32>
    %277 = arith.addf %274, %276 : vector<4x256xf32>
    %c0_84 = arith.constant 0 : index
    %c0_85 = arith.constant 0 : index
    %278 = vector.load %arg19[%c0_84, %c0_85] : memref<1x256xf32, #tpu.memory_space<vmem>>, vector<1x256xf32>
    %279 = vector.broadcast %278 : vector<1x256xf32> to vector<4x256xf32>
    %280 = arith.addf %277, %279 : vector<4x256xf32>
    %cst_86 = arith.constant 0.000000e+00 : f32
    %281 = vector.broadcast %cst_86 : f32 to vector<4x256xf32>
    %282 = arith.maximumf %280, %281 : vector<4x256xf32>
    %c0_87 = arith.constant 0 : index
    %c0_88 = arith.constant 0 : index
    %283 = vector.load %arg20[%c0_87, %c0_88] : memref<256x128xf32, #tpu.memory_space<vmem>>, vector<256x128xf32>
    %cst_89 = arith.constant dense<0.000000e+00> : vector<4x128xf32>
    %284 = tpu.matmul %282, %283, %cst_89 {dimension_numbers = #tpu.dot_dimension_numbers<[1], [0], [0], [1], [0, 0, 1, 1], [], []>} : vector<4x256xf32>, vector<256x128xf32>, vector<4x128xf32> -> vector<4x128xf32>
    %c0_90 = arith.constant 0 : index
    %c0_91 = arith.constant 0 : index
    %285 = vector.load %arg21[%c0_90, %c0_91] : memref<1x128xf32, #tpu.memory_space<vmem>>, vector<1x128xf32>
    %286 = vector.broadcast %285 : vector<1x128xf32> to vector<4x128xf32>
    %287 = arith.addf %284, %286 : vector<4x128xf32>
    %cst_92 = arith.constant 0.000000e+00 : f32
    %288 = vector.broadcast %cst_92 : f32 to vector<4x128xf32>
    %289 = arith.maximumf %287, %288 : vector<4x128xf32>
    %c0_93 = arith.constant 0 : index
    %c0_94 = arith.constant 0 : index
    %290 = vector.load %arg22[%c0_93, %c0_94] : memref<4x128xf32, #tpu.memory_space<vmem>>, vector<4x128xf32>
    tpu.vector_store %arg22[%c0_93, %c0_94], %289 {strides = array<i32>} : memref<4x128xf32, #tpu.memory_space<vmem>>, vector<4x128xf32>,
    return
  }
}

</mosaic_0001>

<bundles_post_ra>
// kernel: wdr_forward.1
= control target key start
LH: loop header
LB: loop body
LE: loop exit
PB: predicated region body
PF: predicated region fallthrough
CT: control target
= control target key end

     0   :  { %s5617_s0 = inlined_call_operand.vmem [shape: f32[32,8], index: 0, kind: input, shape index: {}]   ;;  %s5618_s1 = inlined_call_operand.vmem [shape: f32[4,10], index: 1, kind: input, shape index: {}]   ;;  %s5619_s2 = inlined_call_operand.vmem [shape: f32[4,6], index: 2, kind: input, shape index: {}]   ;;  %s5620_s3 = inlined_call_operand.vmem [shape: f32[8,256], index: 3, kind: input, shape index: {}]   ;;  %s5621_s4 = inlined_call_operand.vmem [shape: f32[1,256], index: 4, kind: input, shape index: {}]   ;;  %s5622_s5 = inlined_call_operand.hbm [shape: f32[256,512], index: 5, kind: input, shape index: {}]   ;;  %s5623_s6 = inlined_call_operand.hbm [shape: f32[128,512], index: 6, kind: input, shape index: {}]   ;;  %s5624_s7 = inlined_call_operand.vmem [shape: f32[1,512], index: 7, kind: input, shape index: {}]   ;;  %s5625_s8 = inlined_call_operand.vmem [shape: f32[10,256], index: 8, kind: input, shape index: {}]   ;;  %s5626_s9 = inlined_call_operand.hbm [shape: f32[1,256], index: 9, kind: input, shape index: {}]   ;;  %s5627_s10 = inlined_call_operand.hbm [shape: f32[256,256], index: 10, kind: input, shape index: {}]   ;;  %s5628_s11 = inlined_call_operand.hbm [shape: f32[1,256], index: 11, kind: input, shape index: {}]   ;;  %s5629_s12 = inlined_call_operand.hbm [shape: f32[256,256], index: 12, kind: input, shape index: {}]   ;;  %s5630_s13 = inlined_call_operand.hbm [shape: f32[1,256], index: 13, kind: input, shape index: {}]   ;;  %s5631_s14 = inlined_call_operand.vmem [shape: f32[6,256], index: 14, kind: input, shape index: {}]   ;;  %s5632_s15 = inlined_call_operand.hbm [shape: f32[1,256], index: 15, kind: input, shape index: {}]   ;;  %s5633_s16 = inlined_call_operand.vmem [shape: f32[128,256], index: 16, kind: input, shape index: {}]   ;;  %s5634_s17 = inlined_call_operand.hbm [shape: f32[256,256], index: 17, kind: input, shape index: {}]   ;;  %s5635_s18 = inlined_call_operand.hbm [shape: f32[256,256], index: 18, kind: input, shape index: {}]   ;;  %s5636_s19 = inlined_call_operand.vmem [shape: f32[1,256], index: 19, kind: input, shape index: {}]   ;;  %s5637_s20 = inlined_call_operand.hbm [shape: f32[256,128], index: 20, kind: input, shape index: {}]   ;;  %s5638_s21 = inlined_call_operand.vmem [shape: f32[1,128], index: 21, kind: input, shape index: {}]   ;;  %s5639_s22 = inlined_call_operand.vmem [shape: f32[4,128], index: 22, kind: output, shape index: {}]  }
   0x1   :  { %5655 = sst [smem:[#allocation30_spill]] %s5617_s0 }
   0x2   :  { %5656 = sst [smem:[#allocation31_spill]] %s5618_s1 }
   0x3   :  { %5657 = sst [smem:[#allocation32_spill]] %s5619_s2 }
   0x4   :  { %5658 = sst [smem:[#allocation33_spill]] %s5620_s3 }
   0x5   :  { %5659 = sst [smem:[#allocation34_spill]] %s5621_s4 }
   0x6   :  { %5660 = sst [smem:[#allocation35_spill]] %s5622_s5 }
   0x7   :  { %5661 = sst [smem:[#allocation36_spill]] %s5623_s6 }
   0x8   :  { %5662 = sst [smem:[#allocation37_spill]] %s5639_s22 }
   0x9   :  { %27 = vsyncpa [#allocation3], 0 }
   0xa   :  { %28 = vsyncpa [#allocation5], 0 }
   0xb   :  { %29 = vsyncpa [#allocation8], 0 }
   0xc   :  { %30 = vsyncpa [#allocation11], 0 }
   0xd   :  { %31 = vsyncpa [#allocation14], 0 }
   0xe   :  { %32 = vsyncpa [#allocation17], 0  ;;  %s4624_s3 = smov [#allocation4]   ;;  %s4625_s29 = smov [#allocation7]  }
   0xf   :  { %s60_s28 = sshll.u32 %s4624_s3, 4  ;;  %s86_s30 = sshll.u32 %s4625_s29, 4  ;;  %s61_s28 = int_to_ptr.vmem [resolvable:$true] %s60_s28  ;;  %s4758_s30 = int_to_ptr.vmem [resolvable:$true] %s86_s30 }
  0x10   :  { %s5663_s23 = sld [smem:[#allocation36_spill]] }
  0x16   :  { %s4370_s1 = scalar_lea.hbm %s5663_s23, 8192 }
  0x17   :  { %p4371_p0 = scmp.ne.s32.totalorder %s5663_s23, %s4370_s1  ;;  %p4374_p1 = scmp.lt.u32.totalorder %s4370_s1, %s5663_s23 }
  0x19   :  { %p4376_p2 = pnand %p4374_p1, %p4371_p0 }
  0x1b   :  { %4379 = shalt.err (!%p4376_p2)
}
  0x1c   :  { %s4380_s26 = scalar_lea.vmem %s61_s28, 8192  ;;  %p4385_p4 = scmp.lt.s32.totalorder %s61_s28, %s61_s28 }
  0x1d   :  { %p4381_p3 = scmp.ne.s32.totalorder %s61_s28, %s4380_s26  ;;  %p4386_p5 = scmp.lt.s32.totalorder %s4380_s26, %s4380_s26 }
  0x1f   :  { %p4387_p6 = por %p4386_p5, %p4385_p4 }
  0x21   :  { %p4388_p7 = pnand %p4387_p6, %p4381_p3 }
  0x23   :  { %4391 = shalt.err (!%p4388_p7)
}
  0x24   :  { %s5644_s2 = smov 512   ;;  %s5645_s27 = smov 32  }
  0x25   :  { %66 = dma.hbm_to_vmem [thread:$0]  %s5663_s23, 8192, %s61_s28, [#allocation5], %s5644_s2, %s5644_s2, %s5645_s27  }
  0x26   :  { %s4392_s1 = scalar_lea.hbm %s5627_s10, 8192 }
  0x27   :  { %p4393_p8 = scmp.ne.s32.totalorder %s5627_s10, %s4392_s1  ;;  %p4396_p9 = scmp.lt.u32.totalorder %s4392_s1, %s5627_s10 }
  0x29   :  { %p4398_p10 = pnand %p4396_p9, %p4393_p8 }
  0x2b   :  { %4401 = shalt.err (!%p4398_p10)
}
  0x2c   :  { %s4402_s26 = scalar_lea.vmem %s4758_s30, 8192  ;;  %p4407_p12 = scmp.lt.s32.totalorder %s4758_s30, %s4758_s30 }
  0x2d   :  { %p4403_p11 = scmp.ne.s32.totalorder %s4758_s30, %s4402_s26  ;;  %p4408_p13 = scmp.lt.s32.totalorder %s4402_s26, %s4402_s26 }
  0x2f   :  { %p4409_p0 = por %p4408_p13, %p4407_p12 }
  0x31   :  { %p4410_p1 = pnand %p4409_p0, %p4403_p11 }
  0x33   :  { %4413 = shalt.err (!%p4410_p1)
}
  0x34   :  { %s4628_s28 = smov 256   ;;  %s4629_s23 = smov 16  }
  0x35   :  { %92 = dma.hbm_to_vmem [thread:$0]  %s5627_s10, 8192, %s4758_s30, [#allocation8], %s4628_s28, %s4628_s28, %s4629_s23  }
  0x36   :  { %s4630_s4 = smov [#allocation10]   ;;  %s4631_s1 = smov [#allocation13]  }
  0x37   :  { %s108_s0 = sshll.u32 %s4630_s4, 4  ;;  %s133_s5 = sshll.u32 %s4631_s1, 4  ;;  %s109_s0 = int_to_ptr.vmem [resolvable:$true] %s108_s0  ;;  %s134_s5 = int_to_ptr.vmem [resolvable:$true] %s133_s5 }
  0x38   :  { %s4414_s25 = scalar_lea.hbm %s5629_s12, 8192 }
  0x39   :  { %p4415_p2 = scmp.ne.s32.totalorder %s5629_s12, %s4414_s25  ;;  %p4418_p3 = scmp.lt.u32.totalorder %s4414_s25, %s5629_s12 }
  0x3b   :  { %p4420_p4 = pnand %p4418_p3, %p4415_p2 }
  0x3d   :  { %4423 = shalt.err (!%p4420_p4)
}
  0x3e   :  { %s4424_s10 = scalar_lea.vmem %s109_s0, 8192  ;;  %p4429_p6 = scmp.lt.s32.totalorder %s109_s0, %s109_s0 }
  0x3f   :  { %p4425_p5 = scmp.ne.s32.totalorder %s109_s0, %s4424_s10  ;;  %p4430_p7 = scmp.lt.s32.totalorder %s4424_s10, %s4424_s10 }
  0x41   :  { %p4431_p8 = por %p4430_p7, %p4429_p6 }
  0x43   :  { %p4432_p9 = pnand %p4431_p8, %p4425_p5 }
  0x45   :  { %4435 = shalt.err (!%p4432_p9)
}
  0x46   :  { %114 = dma.hbm_to_vmem [thread:$0]  %s5629_s12, 8192, %s109_s0, [#allocation11], %s4628_s28, %s4628_s28, %s4629_s23  }
  0x47   :  { %s4436_s22 = scalar_lea.hbm %s5632_s15, 32 }
  0x48   :  { %p4437_p10 = scmp.ne.s32.totalorder %s5632_s15, %s4436_s22  ;;  %p4440_p11 = scmp.lt.u32.totalorder %s4436_s22, %s5632_s15 }
  0x4a   :  { %p4442_p12 = pnand %p4440_p11, %p4437_p10 }
  0x4c   :  { %4445 = shalt.err (!%p4442_p12)
}
  0x4d   :  { %s4446_s6 = scalar_lea.vmem %s134_s5, 32  ;;  %p4451_p0 = scmp.lt.s32.totalorder %s134_s5, %s134_s5 }
  0x4e   :  { %p4447_p13 = scmp.ne.s32.totalorder %s134_s5, %s4446_s6  ;;  %p4452_p1 = scmp.lt.s32.totalorder %s4446_s6, %s4446_s6 }
  0x50   :  { %p4453_p2 = por %p4452_p1, %p4451_p0 }
  0x52   :  { %p4454_p3 = pnand %p4453_p2, %p4447_p13 }
  0x54   :  { %4457 = shalt.err (!%p4454_p3)
}
  0x55   :  { %136 = dma.hbm_to_vmem [thread:$0]  %s5632_s15, 32, %s134_s5, [#allocation14]  }
  0x56   :  { %s4632_s25 = smov [#allocation16]   ;;  %s4633_s10 = smov [#allocation2]  }
  0x57   :  { %s156_s26 = sshll.u32 %s4632_s25, 4  ;;  %s48_s30 = sshll.u32 %s4633_s10, 4  ;;  %s157_s26 = int_to_ptr.vmem [resolvable:$true] %s156_s26  ;;  %s4822_s30 = int_to_ptr.vmem [resolvable:$true] %s48_s30 }
  0x58   :  { %s4458_s29 = scalar_lea.hbm %s5635_s18, 8192 }
  0x59   :  { %p4459_p4 = scmp.ne.s32.totalorder %s5635_s18, %s4458_s29  ;;  %p4462_p5 = scmp.lt.u32.totalorder %s4458_s29, %s5635_s18 }
  0x5b   :  { %p4464_p6 = pnand %p4462_p5, %p4459_p4 }
  0x5d   :  { %4467 = shalt.err (!%p4464_p6)
}
  0x5e   :  { %s4468_s15 = scalar_lea.vmem %s157_s26, 8192  ;;  %p4473_p8 = scmp.lt.s32.totalorder %s157_s26, %s157_s26 }
  0x5f   :  { %p4469_p7 = scmp.ne.s32.totalorder %s157_s26, %s4468_s15  ;;  %p4474_p9 = scmp.lt.s32.totalorder %s4468_s15, %s4468_s15 }
  0x61   :  { %p4475_p10 = por %p4474_p9, %p4473_p8 }
  0x63   :  { %p4476_p11 = pnand %p4475_p10, %p4469_p7 }
  0x65   :  { %4479 = shalt.err (!%p4476_p11)
}
  0x66   :  { %162 = dma.hbm_to_vmem [thread:$0]  %s5635_s18, 8192, %s157_s26, [#allocation17], %s4628_s28, %s4628_s28, %s4629_s23  }
  0x67   :  { %s5664_s0 = sld [smem:[#allocation35_spill]] }
  0x6d   :  { %s4480_s25 = scalar_lea.hbm %s5664_s0, 16384 }
  0x6e   :  { %p4481_p12 = scmp.ne.s32.totalorder %s5664_s0, %s4480_s25  ;;  %p4484_p13 = scmp.lt.u32.totalorder %s4480_s25, %s5664_s0 }
  0x70   :  { %p4486_p0 = pnand %p4484_p13, %p4481_p12 }
  0x72   :  { %4489 = shalt.err (!%p4486_p0)
}
  0x73   :  { %s4490_s22 = scalar_lea.vmem %s4822_s30, 16384  ;;  %p4495_p2 = scmp.lt.s32.totalorder %s4822_s30, %s4822_s30 }
  0x74   :  { %p4491_p1 = scmp.ne.s32.totalorder %s4822_s30, %s4490_s22  ;;  %p4496_p3 = scmp.lt.s32.totalorder %s4490_s22, %s4490_s22 }
  0x76   :  { %p4497_p4 = por %p4496_p3, %p4495_p2 }
  0x78   :  { %p4498_p5 = pnand %p4497_p4, %p4491_p1 }
  0x7a   :  { %4501 = shalt.err (!%p4498_p5)
}
  0x7b   :  { %s5665_s18 = smov 32   ;;  %s5666_s26 = smov 512  }
  0x7c   :  { %54 = dma.hbm_to_vmem [thread:$0]  %s5664_s0, 16384, %s4822_s30, [#allocation3], %s5666_s26, %s5666_s26, %s5665_s18  }
  0x7d   :  { %s4634_s1 = smov [#allocation6]   ;;  %s4635_s5 = smov [#allocation9]  }
  0x7e   :  { %s77_s15 = sshll.u32 %s4634_s1, 4  ;;  %s99_s24 = sshll.u32 %s4635_s5, 4  ;;  %s78_s15 = int_to_ptr.vmem [resolvable:$true] %s77_s15  ;;  %s100_s24 = int_to_ptr.vmem [resolvable:$true] %s99_s24 }
  0x7f   :  { %s4502_s25 = scalar_lea.hbm %s5626_s9, 32 }
  0x80   :  { %p4503_p6 = scmp.ne.s32.totalorder %s5626_s9, %s4502_s25  ;;  %p4506_p7 = scmp.lt.u32.totalorder %s4502_s25, %s5626_s9 }
  0x82   :  { %p4508_p8 = pnand %p4506_p7, %p4503_p6 }
  0x84   :  { %4511 = shalt.err (!%p4508_p8)
}
  0x85   :  { %s4512_s30 = scalar_lea.vmem %s78_s15, 32  ;;  %p4517_p10 = scmp.lt.s32.totalorder %s78_s15, %s78_s15 }
  0x86   :  { %p4513_p9 = scmp.ne.s32.totalorder %s78_s15, %s4512_s30  ;;  %p4518_p11 = scmp.lt.s32.totalorder %s4512_s30, %s4512_s30 }
  0x88   :  { %p4519_p12 = por %p4518_p11, %p4517_p10 }
  0x8a   :  { %p4520_p13 = pnand %p4519_p12, %p4513_p9 }
  0x8c   :  { %4523 = shalt.err (!%p4520_p13)
}
  0x8d   :  { %80 = dma.hbm_to_vmem [thread:$0]  %s5626_s9, 32, %s78_s15, [#allocation5]  }
  0x8e   :  { %s4524_s27 = scalar_lea.hbm %s5628_s11, 32 }
  0x8f   :  { %p4525_p0 = scmp.ne.s32.totalorder %s5628_s11, %s4524_s27  ;;  %p4528_p1 = scmp.lt.u32.totalorder %s4524_s27, %s5628_s11 }
  0x91   :  { %p4530_p2 = pnand %p4528_p1, %p4525_p0 }
  0x93   :  { %4533 = shalt.err (!%p4530_p2)
}
  0x94   :  { %s4534_s12 = scalar_lea.vmem %s100_s24, 32  ;;  %p4539_p4 = scmp.lt.s32.totalorder %s100_s24, %s100_s24 }
  0x95   :  { %p4535_p3 = scmp.ne.s32.totalorder %s100_s24, %s4534_s12  ;;  %p4540_p5 = scmp.lt.s32.totalorder %s4534_s12, %s4534_s12 }
  0x97   :  { %p4541_p6 = por %p4540_p5, %p4539_p4 }
  0x99   :  { %p4542_p7 = pnand %p4541_p6, %p4535_p3 }
  0x9b   :  { %4545 = shalt.err (!%p4542_p7)
}
  0x9c   :  { %102 = dma.hbm_to_vmem [thread:$0]  %s5628_s11, 32, %s100_s24, [#allocation8]  }
  0x9d   :  { %s4636_s25 = smov [#allocation12]   ;;  %s4637_s3 = smov [#allocation15]  }
  0x9e   :  { %s121_s10 = sshll.u32 %s4636_s25, 4  ;;  %s144_s2 = sshll.u32 %s4637_s3, 4  ;;  %s122_s10 = int_to_ptr.vmem [resolvable:$true] %s121_s10  ;;  %s4883_s2 = int_to_ptr.vmem [resolvable:$true] %s144_s2 }
  0x9f   :  { %s4546_s0 = scalar_lea.hbm %s5630_s13, 32 }
  0xa0   :  { %p4547_p8 = scmp.ne.s32.totalorder %s5630_s13, %s4546_s0  ;;  %p4550_p9 = scmp.lt.u32.totalorder %s4546_s0, %s5630_s13 }
  0xa2   :  { %p4552_p10 = pnand %p4550_p9, %p4547_p8 }
  0xa4   :  { %4555 = shalt.err (!%p4552_p10)
}
  0xa5   :  { %s4556_s11 = scalar_lea.vmem %s122_s10, 32  ;;  %p4561_p12 = scmp.lt.s32.totalorder %s122_s10, %s122_s10 }
  0xa6   :  { %p4557_p11 = scmp.ne.s32.totalorder %s122_s10, %s4556_s11  ;;  %p4562_p13 = scmp.lt.s32.totalorder %s4556_s11, %s4556_s11 }
  0xa8   :  { %p4563_p0 = por %p4562_p13, %p4561_p12 }
  0xaa   :  { %p4564_p1 = pnand %p4563_p0, %p4557_p11 }
  0xac   :  { %4567 = shalt.err (!%p4564_p1)
}
  0xad   :  { %124 = dma.hbm_to_vmem [thread:$0]  %s5630_s13, 32, %s122_s10, [#allocation11]  }
  0xae   :  { %s4568_s6 = scalar_lea.hbm %s5634_s17, 8192 }
  0xaf   :  { %p4569_p2 = scmp.ne.s32.totalorder %s5634_s17, %s4568_s6  ;;  %p4572_p3 = scmp.lt.u32.totalorder %s4568_s6, %s5634_s17 }
  0xb1   :  { %p4574_p4 = pnand %p4572_p3, %p4569_p2 }
  0xb3   :  { %4577 = shalt.err (!%p4574_p4)
}
  0xb4   :  { %s4578_s3 = scalar_lea.vmem %s4883_s2, 8192  ;;  %p4583_p6 = scmp.lt.s32.totalorder %s4883_s2, %s4883_s2 }
  0xb5   :  { %p4579_p5 = scmp.ne.s32.totalorder %s4883_s2, %s4578_s3  ;;  %p4584_p7 = scmp.lt.s32.totalorder %s4578_s3, %s4578_s3 }
  0xb7   :  { %p4585_p8 = por %p4584_p7, %p4583_p6 }
  0xb9   :  { %p4586_p9 = pnand %p4585_p8, %p4579_p5 }
  0xbb   :  { %4589 = shalt.err (!%p4586_p9)
}
  0xbc   :  { %150 = dma.hbm_to_vmem [thread:$0]  %s5634_s17, 8192, %s4883_s2, [#allocation14], %s4628_s28, %s4628_s28, %s4629_s23  }
  0xbd   :  { %s4638_s29 = smov [#allocation18]   ;;  %s4590_s18 = scalar_lea.hbm %s5637_s20, 4096 }
  0xbe   :  { %s170_s30 = sshll.u32 %s4638_s29, 4  ;;  %p4591_p10 = scmp.ne.s32.totalorder %s5637_s20, %s4590_s18  ;;  %s171_s30 = int_to_ptr.vmem [resolvable:$true] %s170_s30 }
  0xbf   :  { %p4594_p11 = scmp.lt.u32.totalorder %s4590_s18, %s5637_s20 }
  0xc1   :  { %p4596_p12 = pnand %p4594_p11, %p4591_p10 }
  0xc3   :  { %4599 = shalt.err (!%p4596_p12)
}
  0xc4   :  { %s4600_s4 = scalar_lea.vmem %s171_s30, 4096  ;;  %p4605_p0 = scmp.lt.s32.totalorder %s171_s30, %s171_s30 }
  0xc5   :  { %p4601_p13 = scmp.ne.s32.totalorder %s171_s30, %s4600_s4  ;;  %p4606_p1 = scmp.lt.s32.totalorder %s4600_s4, %s4600_s4 }
  0xc7   :  { %p4607_p2 = por %p4606_p1, %p4605_p0 }
  0xc9   :  { %p4608_p3 = pnand %p4607_p2, %p4601_p13 }
  0xcb   :  { %4611 = shalt.err (!%p4608_p3)
}
  0xcc   :  { %s4639_s17 = smov 128   ;;  %s4640_s28 = smov 8  }
  0xcd   :  { %176 = dma.hbm_to_vmem [thread:$0]  %s5637_s20, 4096, %s171_s30, [#allocation17], %s4639_s17, %s4639_s17, %s4640_s28  }
  0xce   :  { %4612 = dma.done.wait [#allocation3], 16384  }
  0xcf   :  { %4613 = vsyncadd [#allocation3], 4294950912 }
  0xd0   :  { %4614 = dma.done.wait [#allocation5], 8224  }
  0xd1   :  { %4615 = vsyncadd [#allocation5], 4294959072 }
  0xd2   :  { %4616 = dma.done.wait [#allocation8], 8224  }
  0xd3   :  { %4617 = vsyncadd [#allocation8], 4294959072 }
  0xd4   :  { %4618 = dma.done.wait [#allocation11], 8224  }
  0xd5   :  { %4619 = vsyncadd [#allocation11], 4294959072 }
  0xd6   :  { %4620 = dma.done.wait [#allocation14], 8224  }
  0xd7   :  { %4621 = vsyncadd [#allocation14], 4294959072 }
  0xd8   :  { %4622 = dma.done.wait [#allocation17], 12288  }
  0xd9   :  { %4623 = vsyncadd [#allocation17], 4294955008  ;;  %v5646_v0 = vmov 0.0   ;;  %s5667_s20 = sld [smem:[#allocation33_spill]]  ;;  %s5668_s25 = sld [smem:[#allocation30_spill]]  ;;  %vm230_vm0 = vcmask 64512  }
  0xda   :  { %307 = vmatprep.mubr.f32.mxu0 %v5646_v0  ;;  %796 = vmatprep.mubr.f32.mxu1 %v5646_v0  ;;  %v341_v5 = vld [vmem:[#allocation2 + $0x8] sm:$0xff]  ;;  %v340_v7 = vld [vmem:[#allocation2] sm:$0xff]  ;;  %s5670_s26 = sld [smem:[#allocation34_spill]]  ;;  %vm2191_vm1 = vcmask 1041408   ;;  %vm4642_vm2 = vmmov 1   ;;  %vm2187_vm4 = vcmask 80896  }
  0xdb   :  { %v345_v6 = vld [vmem:[#allocation2 + $0x28] sm:$0xff]  ;;  %v344_v9 = vld [vmem:[#allocation2 + $0x20] sm:$0xff]  ;;  %vm5447_vm3 = vmpackc.low %vm2191_vm1, %vm4642_vm2  ;;  %vm2588_vm5 = vcmask 1045504   ;;  %vm2584_vm6 = vcmask 48128   ;;  %s5684_s13 = sld [smem:[#allocation32_spill]]  ;;  %s5685_s4 = sld [smem:[#allocation37_spill]] }
  0xdc   :  { %v3253_v8 = vpack.c.bf16 %v345_v6, %v341_v5  ;;  %v349_v10 = vld [vmem:[#allocation2 + $0x48] sm:$0xff]  ;;  %v3255_v12 = vpack.c.bf16 %v344_v9, %v340_v7  ;;  %v348_v14 = vld [vmem:[#allocation2 + $0x40] sm:$0xff] }
  0xdd   :  { %v353_v11 = vld [vmem:[#allocation2 + $0x68] sm:$0xff]  ;;  %v352_v15 = vld [vmem:[#allocation2 + $0x60] sm:$0xff] }
  0xde   :  { %v3257_v13 = vpack.c.bf16 %v353_v11, %v349_v10  ;;  %v357_v16 = vld [vmem:[#allocation2 + $0x88] sm:$0xff]  ;;  %v3259_v18 = vpack.c.bf16 %v352_v15, %v348_v14  ;;  %v356_v20 = vld [vmem:[#allocation2 + $0x80] sm:$0xff] }
  0xdf   :  { %v217_v1 = vld [vmem:[%s5667_s20 + $0x8] sm:$0xff]  ;;  %v216_v2 = vld [vmem:[%s5667_s20] sm:$0xff]  ;;  %v214_v22 = vld [vmem:[%s5668_s25 + $0x10] sm:$0xff]  ;;  %s5681_s20 = sld [smem:[#allocation31_spill]] }
  0xe0   :  { %v212_v3 = vld [vmem:[%s5668_s25] sm:$0xff]  ;;  %243 = vmatprep.subr.mxu0 %v217_v1  ;;  %v213_v4 = vld [vmem:[%s5668_s25 + $0x8] sm:$0xff]  ;;  %v215_v29 = vld [vmem:[%s5668_s25 + $0x18] sm:$0xff] }
  0xe1   :  { %244 = vmatpush1.msra.mxu0 %v216_v2  ;;  %v361_v17 = vld [vmem:[#allocation2 + $0xa8] sm:$0xff]  ;;  %v360_v21 = vld [vmem:[#allocation2 + $0xa0] sm:$0xff] }
  0xe2   :  { %3183 = vmatmul.mubr.msk.f32.vlgmr.msra.gmra.mrb[0].mxu0 %vm230_vm0, %v212_v3  ;;  %3254 = vmatprep.subr.bf16.mxu0 %v3253_v8  ;;  %v3261_v19 = vpack.c.bf16 %v361_v17, %v357_v16  ;;  %v365_v23 = vld [vmem:[#allocation2 + $0xc8] sm:$0xff]  ;;  %v3263_v25 = vpack.c.bf16 %v360_v21, %v356_v20  ;;  %v364_v27 = vld [vmem:[#allocation2 + $0xc0] sm:$0xff] }
  0xe3   :  { %313 = vmatprep.mubr.f32.mxu0 %v5646_v0  ;;  %3256 = vmatpush1.bf16.msra.mxu0 %v3255_v12  ;;  %v369_v24 = vld [vmem:[#allocation2 + $0xe8] sm:$0xff]  ;;  %v368_v28 = vld [vmem:[#allocation2 + $0xe0] sm:$0xff] }
  0xe4   :  { %3258 = vmatprep.subr.bf16.mxu0 %v3257_v13  ;;  %v3265_v26 = vpack.c.bf16 %v369_v24, %v365_v23  ;;  %v373_v30 = vld [vmem:[#allocation2 + $0x108] sm:$0xff]  ;;  %v3267_v32 = vpack.c.bf16 %v368_v28, %v364_v27  ;;  %v372_v33 = vld [vmem:[#allocation2 + $0x100] sm:$0xff] }
  0xe5   :  { %v377_v31 = vld [vmem:[#allocation2 + $0x128] sm:$0xff]  ;;  %v376_v37 = vld [vmem:[#allocation2 + $0x120] sm:$0xff] }
  0xe6   :  { %3184 = vmatmul.mubr.msk.f32.gmra.mrb[2].mxu0 %vm230_vm0, %v213_v4  ;;  %v669_v34 = vld [vmem:[#allocation4 + $0x8] sm:$0xff]  ;;  %v3269_v36 = vpack.c.bf16 %v377_v31, %v373_v30  ;;  %v668_v39 = vld [vmem:[#allocation4] sm:$0xff]  ;;  %v3271_v46 = vpack.c.bf16 %v376_v37, %v372_v33 }
  0xe7   :  { %319 = vmatprep.mubr.f32.mxu0 %v5646_v0  ;;  %3260 = vmatpush1.bf16.msra.mxu0 %v3259_v18  ;;  %v673_v35 = vld [vmem:[#allocation4 + $0x28] sm:$0xff]  ;;  %v672_v40 = vld [vmem:[#allocation4 + $0x20] sm:$0xff] }
  0xe8   :  { %3262 = vmatprep.subr.bf16.mxu0 %v3261_v19  ;;  %v4956_v38 = vpack.c.bf16 %v673_v35, %v669_v34  ;;  %v381_v41 = vld [vmem:[#allocation2 + $0x148] sm:$0xff]  ;;  %v4958_v43 = vpack.c.bf16 %v672_v40, %v668_v39  ;;  %v380_v47 = vld [vmem:[#allocation2 + $0x140] sm:$0xff] }
  0xe9   :  { %v385_v42 = vld [vmem:[#allocation2 + $0x168] sm:$0xff]  ;;  %v676_v49 = vld [vmem:[#allocation4 + $0x40] sm:$0xff] }
  0xea   :  { %3185 = vmatmul.mubr.msk.f32.gmra.mrb[4].mxu0 %vm230_vm0, %v214_v22  ;;  %v677_v44 = vld [vmem:[#allocation4 + $0x48] sm:$0xff]  ;;  %3382 = vmatprep.subr.bf16.mxu1 %v4956_v38  ;;  %v680_v50 = vld [vmem:[#allocation4 + $0x60] sm:$0xff]  ;;  %v3273_v51 = vpack.c.bf16 %v385_v42, %v381_v41 }
  0xeb   :  { %325 = vmatprep.mubr.f32.mxu0 %v5646_v0  ;;  %3264 = vmatpush1.bf16.msra.mxu0 %v3263_v25  ;;  %v681_v45 = vld [vmem:[#allocation4 + $0x68] sm:$0xff]  ;;  %v384_v52 = vld [vmem:[#allocation2 + $0x160] sm:$0xff]  ;;  %v4964_v53 = vpack.c.bf16 %v680_v50, %v676_v49 }
  0xec   :  { %3266 = vmatprep.subr.bf16.mxu0 %v3265_v26  ;;  %3384 = vmatpush1.bf16.msra.mxu1 %v4958_v43  ;;  %v4962_v48 = vpack.c.bf16 %v681_v45, %v677_v44  ;;  %v685_v54 = vld [vmem:[#allocation4 + $0x88] sm:$0xff]  ;;  %v684_v59 = vld [vmem:[#allocation4 + $0x80] sm:$0xff]  ;;  %v3275_v61 = vpack.c.bf16 %v384_v52, %v380_v47 }
  0xed   :  { %v689_v55 = vld [vmem:[#allocation4 + $0xa8] sm:$0xff]  ;;  %v688_v60 = vld [vmem:[#allocation4 + $0xa0] sm:$0xff] }
  0xee   :  { %3186 = vmatmul.mubr.msk.f32.gmra.mrb[6].mxu0 %vm230_vm0, %v215_v29  ;;  %v389_v56 = vld [vmem:[#allocation2 + $0x188] sm:$0xff]  ;;  %3386 = vmatprep.subr.bf16.mxu1 %v4962_v48  ;;  %v4967_v58 = vpack.c.bf16 %v689_v55, %v685_v54  ;;  %v388_v62 = vld [vmem:[#allocation2 + $0x180] sm:$0xff]  ;;  %v4970_v63 = vpack.c.bf16 %v688_v60, %v684_v59 }
  0xef   :  { %3268 = vmatpush1.bf16.msra.mxu0 %v3267_v32  ;;  %v393_v57 = vld [vmem:[#allocation2 + $0x1a8] sm:$0xff]  ;;  %v392_v4 = vld [vmem:[#allocation2 + $0x1a0] sm:$0xff] }
  0xf0   :  { %3270 = vmatprep.subr.bf16.mxu0 %v3269_v36  ;;  %3388 = vmatpush1.bf16.msra.mxu1 %v4964_v53  ;;  %v693_v1 = vld [vmem:[#allocation4 + $0xc8] sm:$0xff]  ;;  %v3277_v3 = vpack.c.bf16 %v393_v57, %v389_v56  ;;  %v692_v6 = vld [vmem:[#allocation4 + $0xc0] sm:$0xff]  ;;  %v3279_v12 = vpack.c.bf16 %v392_v4, %v388_v62 }
  0xf1   :  { %v697_v2 = vld [vmem:[#allocation4 + $0xe8] sm:$0xff]  ;;  %3390 = vmatprep.subr.bf16.mxu1 %v4967_v58  ;;  %v696_v7 = vld [vmem:[#allocation4 + $0xe0] sm:$0xff] }
  0xf2   :  { %v4973_v5 = vpack.c.bf16 %v697_v2, %v693_v1  ;;  %v397_v8 = vld [vmem:[#allocation2 + $0x1c8] sm:$0xff]  ;;  %v396_v13 = vld [vmem:[#allocation2 + $0x1c0] sm:$0xff]  ;;  %v4976_v15 = vpack.c.bf16 %v696_v7, %v692_v6 }
  0xf3   :  { %3272 = vmatpush1.bf16.msra.mxu0 %v3271_v46  ;;  %v401_v9 = vld [vmem:[#allocation2 + $0x1e8] sm:$0xff]  ;;  %v400_v14 = vld [vmem:[#allocation2 + $0x1e0] sm:$0xff] }
  0xf4   :  { %3274 = vmatprep.subr.bf16.mxu0 %v3273_v51  ;;  %v701_v10 = vld [vmem:[#allocation4 + $0x108] sm:$0xff]  ;;  %3392 = vmatpush1.bf16.msra.mxu1 %v4970_v63  ;;  %v3281_v16 = vpack.c.bf16 %v401_v9, %v397_v8  ;;  %v700_v19 = vld [vmem:[#allocation4 + $0x100] sm:$0xff]  ;;  %v3283_v24 = vpack.c.bf16 %v400_v14, %v396_v13 }
  0xf5   :  { %v705_v11 = vld [vmem:[#allocation4 + $0x128] sm:$0xff]  ;;  %3394 = vmatprep.subr.bf16.mxu1 %v4973_v5  ;;  %v704_v20 = vld [vmem:[#allocation4 + $0x120] sm:$0xff] }
  0xf6   :  { %v405_v17 = vld [vmem:[#allocation2 + $0x208] sm:$0xff]  ;;  %v4979_v18 = vpack.c.bf16 %v705_v11, %v701_v10  ;;  %v404_v25 = vld [vmem:[#allocation2 + $0x200] sm:$0xff]  ;;  %v4982_v26 = vpack.c.bf16 %v704_v20, %v700_v19 }
  0xf7   :  { %3276 = vmatpush1.bf16.msra.mxu0 %v3275_v61  ;;  %v409_v21 = vld [vmem:[#allocation2 + $0x228] sm:$0xff]  ;;  %v408_v28 = vld [vmem:[#allocation2 + $0x220] sm:$0xff] }
  0xf8   :  { %3278 = vmatprep.subr.bf16.mxu0 %v3277_v3  ;;  %v709_v22 = vld [vmem:[#allocation4 + $0x148] sm:$0xff]  ;;  %3396 = vmatpush1.bf16.msra.mxu1 %v4976_v15  ;;  %v3285_v27 = vpack.c.bf16 %v409_v21, %v405_v17  ;;  %v708_v30 = vld [vmem:[#allocation4 + $0x140] sm:$0xff]  ;;  %v3287_v34 = vpack.c.bf16 %v408_v28, %v404_v25 }
  0xf9   :  { %v713_v23 = vld [vmem:[#allocation4 + $0x168] sm:$0xff]  ;;  %3398 = vmatprep.subr.bf16.mxu1 %v4979_v18  ;;  %v712_v31 = vld [vmem:[#allocation4 + $0x160] sm:$0xff] }
  0xfa   :  { %v4985_v29 = vpack.c.bf16 %v713_v23, %v709_v22  ;;  %v413_v32 = vld [vmem:[#allocation2 + $0x248] sm:$0xff]  ;;  %v4988_v35 = vpack.c.bf16 %v712_v31, %v708_v30  ;;  %v412_v37 = vld [vmem:[#allocation2 + $0x240] sm:$0xff] }
  0xfb   :  { %3280 = vmatpush1.bf16.msra.mxu0 %v3279_v12  ;;  %v417_v33 = vld [vmem:[#allocation2 + $0x268] sm:$0xff]  ;;  %v416_v39 = vld [vmem:[#allocation2 + $0x260] sm:$0xff] }
  0xfc   :  { %3282 = vmatprep.subr.bf16.mxu0 %v3281_v16  ;;  %3400 = vmatpush1.bf16.msra.mxu1 %v4982_v26  ;;  %v3289_v36 = vpack.c.bf16 %v417_v33, %v413_v32  ;;  %v421_v40 = vld [vmem:[#allocation2 + $0x288] sm:$0xff]  ;;  %v3291_v42 = vpack.c.bf16 %v416_v39, %v412_v37  ;;  %v420_v45 = vld [vmem:[#allocation2 + $0x280] sm:$0xff]  ;;  %v343_v33 = vld [vmem:[#allocation2 + $0x18] sm:$0xff] }
  0xfd   :  { %3402 = vmatprep.subr.bf16.mxu1 %v4985_v29  ;;  %v425_v41 = vld [vmem:[#allocation2 + $0x2a8] sm:$0xff]  ;;  %v424_v46 = vld [vmem:[#allocation2 + $0x2a0] sm:$0xff] }
  0xfe   :  { %v3293_v44 = vpack.c.bf16 %v425_v41, %v421_v40  ;;  %v429_v47 = vld [vmem:[#allocation2 + $0x2c8] sm:$0xff]  ;;  %v3295_v50 = vpack.c.bf16 %v424_v46, %v420_v45  ;;  %v428_v52 = vld [vmem:[#allocation2 + $0x2c0] sm:$0xff]  ;;  %v220_v41 = vlaneseq }
  0xff   :  { %3284 = vmatpush1.bf16.msra.mxu0 %v3283_v24  ;;  %v433_v49 = vld [vmem:[#allocation2 + $0x2e8] sm:$0xff]  ;;  %v432_v54 = vld [vmem:[#allocation2 + $0x2e0] sm:$0xff] }
 0x100   :  { %3286 = vmatprep.subr.bf16.mxu0 %v3285_v27  ;;  %3404 = vmatpush1.bf16.msra.mxu1 %v4988_v35  ;;  %v3297_v51 = vpack.c.bf16 %v433_v49, %v429_v47  ;;  %v437_v55 = vld [vmem:[#allocation2 + $0x308] sm:$0xff]  ;;  %v3299_v57 = vpack.c.bf16 %v432_v54, %v428_v52  ;;  %v436_v60 = vld [vmem:[#allocation2 + $0x300] sm:$0xff]  ;;  %v342_v54 = vld [vmem:[#allocation2 + $0x10] sm:$0xff] }
 0x101   :  { %v441_v56 = vld [vmem:[#allocation2 + $0x328] sm:$0xff]  ;;  %v440_v61 = vld [vmem:[#allocation2 + $0x320] sm:$0xff] }
 0x102   :  { %v3301_v59 = vpack.c.bf16 %v441_v56, %v437_v55  ;;  %v445_v62 = vld [vmem:[#allocation2 + $0x348] sm:$0xff]  ;;  %v3303_v2 = vpack.c.bf16 %v440_v61, %v436_v60  ;;  %v444_v4 = vld [vmem:[#allocation2 + $0x340] sm:$0xff]  ;;  %v346_v55 = vld [vmem:[#allocation2 + $0x30] sm:$0xff] }
 0x103   :  { %3288 = vmatpush1.bf16.msra.mxu0 %v3287_v34  ;;  %v449_v1 = vld [vmem:[#allocation2 + $0x368] sm:$0xff]  ;;  %v448_v6 = vld [vmem:[#allocation2 + $0x360] sm:$0xff]  ;;  %v347_v34 = vld [vmem:[#allocation2 + $0x38] sm:$0xff] }
 0x104   :  { %3290 = vmatprep.subr.bf16.mxu0 %v3289_v36  ;;  %v3305_v3 = vpack.c.bf16 %v449_v1, %v445_v62  ;;  %v453_v7 = vld [vmem:[#allocation2 + $0x388] sm:$0xff]  ;;  %v3307_v9 = vpack.c.bf16 %v448_v6, %v444_v4  ;;  %v452_v11 = vld [vmem:[#allocation2 + $0x380] sm:$0xff]  ;;  %v3317_v37 = vpack.c.bf16 %v347_v34, %v343_v33  ;;  %v3319_v62 = vpack.c.bf16 %v346_v55, %v342_v54  ;;  %v350_v6 = vld [vmem:[#allocation2 + $0x50] sm:$0xff] }
 0x105   :  { %v457_v8 = vld [vmem:[#allocation2 + $0x3a8] sm:$0xff]  ;;  %v456_v12 = vld [vmem:[#allocation2 + $0x3a0] sm:$0xff] }
 0x106   :  { %v3309_v10 = vpack.c.bf16 %v457_v8, %v453_v7  ;;  %v3311_v13 = vpack.c.bf16 %v456_v12, %v452_v11  ;;  %v717_v14 = vld [vmem:[#allocation4 + $0x188] sm:$0xff]  ;;  %v716_v21 = vld [vmem:[#allocation4 + $0x180] sm:$0xff]  ;;  %v354_v7 = vld [vmem:[#allocation2 + $0x70] sm:$0xff] }
 0x107   :  { %3292 = vmatpush1.bf16.msra.mxu0 %v3291_v42  ;;  %v721_v16 = vld [vmem:[#allocation4 + $0x1a8] sm:$0xff]  ;;  %v720_v23 = vld [vmem:[#allocation4 + $0x1a0] sm:$0xff]  ;;  %v5023_v42 = vshrl.u32 %v220_v41, 7  ;;  %v370_v41 = vld [vmem:[#allocation2 + $0xf0] sm:$0xff] }
 0x108   :  { %3294 = vmatprep.subr.bf16.mxu0 %v3293_v44  ;;  %v4992_v17 = vpack.c.bf16 %v721_v16, %v717_v14  ;;  %v461_v19 = vld [vmem:[#allocation2 + $0x3c8] sm:$0xff]  ;;  %v460_v24 = vld [vmem:[#allocation2 + $0x3c0] sm:$0xff]  ;;  %v4995_v27 = vpack.c.bf16 %v720_v23, %v716_v21  ;;  %v3323_v14 = vpack.c.bf16 %v354_v7, %v350_v6  ;;  %v358_v21 = vld [vmem:[#allocation2 + $0x90] sm:$0xff] }
 0x109   :  { %v465_v20 = vld [vmem:[#allocation2 + $0x3e8] sm:$0xff]  ;;  %v464_v25 = vld [vmem:[#allocation2 + $0x3e0] sm:$0xff]  ;;  %v5026_v44 = vsub.s32 0, %v5023_v42  ;;  %v5032_v46 = vsub.s32 1, %v5023_v42  ;;  %v386_v6 = vld [vmem:[#allocation2 + $0x170] sm:$0xff] }
 0x10a   :  { %v3313_v22 = vpack.c.bf16 %v465_v20, %v461_v19  ;;  %3406 = vmatprep.subr.bf16.mxu1 %v4992_v17  ;;  %v3315_v28 = vpack.c.bf16 %v464_v25, %v460_v24  ;;  %v725_v30 = vld [vmem:[#allocation4 + $0x1c8] sm:$0xff]  ;;  %v724_v36 = vld [vmem:[#allocation4 + $0x1c0] sm:$0xff]  ;;  %v367_v24 = vld [vmem:[#allocation2 + $0xd8] sm:$0xff] }
 0x10b   :  { %3296 = vmatpush1.bf16.msra.mxu0 %v3295_v50  ;;  %v729_v31 = vld [vmem:[#allocation4 + $0x1e8] sm:$0xff]  ;;  %3408 = vmatpush1.bf16.msra.mxu1 %v4995_v27  ;;  %v728_v39 = vld [vmem:[#allocation4 + $0x1e0] sm:$0xff]  ;;  %5669 = vst [vmem:[#allocation25_spill] sm:$0xff] %v5026_v44  ;;  %5671 = vst [vmem:[#allocation26_spill] sm:$0xff] %v5032_v46 }
 0x10c   :  { %3298 = vmatprep.subr.bf16.mxu0 %v3297_v51  ;;  %v4998_v32 = vpack.c.bf16 %v729_v31, %v725_v30  ;;  %v5001_v40 = vpack.c.bf16 %v728_v39, %v724_v36  ;;  %v218_v45 = vld [vmem:[%s5670_s26] sm:$0x3]  ;;  %v371_v25 = vld [vmem:[#allocation2 + $0xf8] sm:$0xff]  ;;  %v366_v39 = vld [vmem:[#allocation2 + $0xd0] sm:$0xff] }
 0x10d   :  { %v223_v47 = vrot.slane %v218_v45, %v5026_v44  ;;  %v227_v49 = vrot.slane %v218_v45, %v5032_v46  ;;  %v3331_v55 = vpack.c.bf16 %v370_v41, %v366_v39  ;;  %v391_v7 = vld [vmem:[#allocation2 + $0x198] sm:$0xff]  ;;  %v406_v39 = vld [vmem:[#allocation2 + $0x210] sm:$0xff] }
 0x10e   :  { %3410 = vmatprep.subr.bf16.mxu1 %v4998_v32  ;;  %v410_v41 = vld [vmem:[#allocation2 + $0x230] sm:$0xff] }
 0x10f   :  { %3300 = vmatpush1.bf16.msra.mxu0 %v3299_v57  ;;  %3412 = vmatpush1.bf16.msra.mxu1 %v5001_v40  ;;  %v351_v57 = vld [vmem:[#allocation2 + $0x58] sm:$0xff] }
 0x110   :  { %3302 = vmatprep.subr.bf16.mxu0 %v3301_v59  ;;  %3446 = vmatprep.subr.bf16.mxu1 %v4956_v38  ;;  %v355_v59 = vld [vmem:[#allocation2 + $0x78] sm:$0xff] }
 0x111   :  { %v3321_v4 = vpack.c.bf16 %v355_v59, %v351_v57  ;;  %v374_v57 = vld [vmem:[#allocation2 + $0x110] sm:$0xff] }
 0x112   :  { %797 = vmatmul.mubr.f32.vlgmr.msra.gmra.mrb[0].mxu1 %v5646_v0  ;;  %v378_v59 = vld [vmem:[#allocation2 + $0x130] sm:$0xff] }
 0x113   :  { %3304 = vmatpush1.bf16.msra.mxu0 %v3303_v2  ;;  %3448 = vmatpush1.bf16.msra.mxu1 %v4958_v43 }
 0x114   :  { %3306 = vmatprep.subr.bf16.mxu0 %v3305_v3  ;;  %966 = vmatprep.mubr.f32.mxu1 %v5646_v0 }
 0x115   :  { %3450 = vmatprep.subr.bf16.mxu1 %v4962_v48 }
 0x117   :  { %3308 = vmatpush1.bf16.msra.mxu0 %v3307_v9  ;;  %3452 = vmatpush1.bf16.msra.mxu1 %v4964_v53  ;;  %v359_v9 = vld [vmem:[#allocation2 + $0x98] sm:$0xff] }
 0x118   :  { %3310 = vmatprep.subr.bf16.mxu0 %v3309_v10  ;;  %3454 = vmatprep.subr.bf16.mxu1 %v4967_v58  ;;  %v363_v10 = vld [vmem:[#allocation2 + $0xb8] sm:$0xff] }
 0x119   :  { %v3325_v20 = vpack.c.bf16 %v363_v10, %v359_v9  ;;  %v395_v9 = vld [vmem:[#allocation2 + $0x1b8] sm:$0xff] }
 0x11b   :  { %3312 = vmatpush1.bf16.msra.mxu0 %v3311_v13  ;;  %3456 = vmatpush1.bf16.msra.mxu1 %v4970_v63 }
 0x11c   :  { %3314 = vmatprep.subr.bf16.mxu0 %v3313_v22  ;;  %3458 = vmatprep.subr.bf16.mxu1 %v4973_v5  ;;  %v362_v22 = vld [vmem:[#allocation2 + $0xb0] sm:$0xff] }
 0x11d   :  { %v3327_v33 = vpack.c.bf16 %v362_v22, %v358_v21  ;;  %v403_v21 = vld [vmem:[#allocation2 + $0x1f8] sm:$0xff] }
 0x11f   :  { %3316 = vmatpush1.bf16.msra.mxu0 %v3315_v28  ;;  %3460 = vmatpush1.bf16.msra.mxu1 %v4976_v15 }
 0x120   :  { %3318 = vmatprep.subr.bf16.mxu0 %v3317_v37  ;;  %3462 = vmatprep.subr.bf16.mxu1 %v4979_v18  ;;  %v3329_v37 = vpack.c.bf16 %v371_v25, %v367_v24  ;;  %v402_v25 = vld [vmem:[#allocation2 + $0x1f0] sm:$0xff] }
 0x123   :  { %3464 = vmatpush1.bf16.msra.mxu1 %v4982_v26 }
 0x124   :  { %3466 = vmatprep.subr.bf16.mxu1 %v4985_v29 }
 0x127   :  { %3468 = vmatpush1.bf16.msra.mxu1 %v4988_v35 }
 0x128   :  { %3470 = vmatprep.subr.bf16.mxu1 %v4992_v17 }
 0x12b   :  { %3472 = vmatpush1.bf16.msra.mxu1 %v4995_v27 }
 0x12c   :  { %3474 = vmatprep.subr.bf16.mxu1 %v4998_v32 }
 0x12f   :  { %3476 = vmatpush1.bf16.msra.mxu1 %v5001_v40 }
 0x130   :  { %3510 = vmatprep.subr.bf16.mxu1 %v4956_v38 }
 0x1b5   :  { %v309_v50 = vpop.f32.mrb[0].mxu0 }
 0x1b6   :  { %v5036_v51 = vadd.f32 %v309_v50, %v223_v47  ;;  %v311_v52 = vpop.f32.mrb[1].mxu0  ;;  %v375_v50 = vld [vmem:[#allocation2 + $0x118] sm:$0xff] }
 0x1b7   :  { %v312_v56 = vadd.f32 %v311_v52, %v227_v49  ;;  %v379_v52 = vld [vmem:[#allocation2 + $0x138] sm:$0xff] }
 0x1b8   :  { %v332_v1 = vmax.f32 %v5036_v51, 0.0 }
 0x1b9   :  { %v333_v60 = vmax.f32 %v312_v56, 0.0  ;;  %v315_v61 = vpop.f32.mrb[2].mxu0  ;;  %v3333_v56 = vpack.c.bf16 %v379_v52, %v375_v50  ;;  %v415_v50 = vld [vmem:[#allocation2 + $0x258] sm:$0xff] }
 0x1ba   :  { %v5039_v2 = vadd.f32 %v315_v61, %v223_v47  ;;  %v317_v3 = vpop.f32.mrb[3].mxu0  ;;  %v387_v61 = vld [vmem:[#allocation2 + $0x178] sm:$0xff] }
 0x1bb   :  { %v5041_v8 = vadd.f32 %v317_v3, %v227_v49  ;;  %554 = vmatprep.mubr.f32.mxu0 %v333_v60  ;;  %v419_v52 = vld [vmem:[#allocation2 + $0x278] sm:$0xff] }
 0x1bc   :  { %v334_v11 = vmax.f32 %v5039_v2, 0.0  ;;  %555 = vmatmul.mubr.f32.vlgmr.msra.gmra.mrb[8].mxu0 %v332_v1 }
 0x1bd   :  { %v335_v12 = vmax.f32 %v5041_v8, 0.0  ;;  %3320 = vmatpush1.bf16.msra.mxu0 %v3319_v62  ;;  %v321_v13 = vpop.f32.mrb[4].mxu0  ;;  %v3335_v62 = vpack.c.bf16 %v378_v59, %v374_v57  ;;  %v414_v57 = vld [vmem:[#allocation2 + $0x250] sm:$0xff] }
 0x1be   :  { %v5047_v16 = vadd.f32 %v321_v13, %v223_v47  ;;  %v323_v19 = vpop.f32.mrb[5].mxu0  ;;  %3322 = vmatprep.subr.bf16.mxu0 %v3321_v4  ;;  %v382_v4 = vld [vmem:[#allocation2 + $0x150] sm:$0xff]  ;;  %v3341_v13 = vpack.c.bf16 %v395_v9, %v391_v7  ;;  %v431_v7 = vld [vmem:[#allocation2 + $0x2d8] sm:$0xff] }
 0x1bf   :  { %v5049_v23 = vadd.f32 %v323_v19, %v227_v49  ;;  %560 = vmatprep.mubr.f32.mxu0 %v335_v12  ;;  %v3339_v10 = vpack.c.bf16 %v386_v6, %v382_v4  ;;  %v394_v19 = vld [vmem:[#allocation2 + $0x1b0] sm:$0xff]  ;;  %v435_v9 = vld [vmem:[#allocation2 + $0x2f8] sm:$0xff] }
 0x1c0   :  { %v336_v28 = vmax.f32 %v5047_v16, 0.0  ;;  %561 = vmatmul.mubr.f32.gmra.mrb[10].mxu0 %v334_v11  ;;  %v418_v59 = vld [vmem:[#allocation2 + $0x270] sm:$0xff] }
 0x1c1   :  { %v337_v30 = vmax.f32 %v5049_v23, 0.0  ;;  %3324 = vmatpush1.bf16.msra.mxu0 %v3323_v14  ;;  %v327_v31 = vpop.f32.mrb[6].mxu0  ;;  %v390_v14 = vld [vmem:[#allocation2 + $0x190] sm:$0xff] }
 0x1c2   :  { %v5057_v34 = vadd.f32 %v327_v31, %v223_v47  ;;  %v329_v36 = vpop.f32.mrb[7].mxu0  ;;  %3326 = vmatprep.subr.bf16.mxu0 %v3325_v20  ;;  %v399_v20 = vld [vmem:[#allocation2 + $0x1d8] sm:$0xff]  ;;  %v3343_v22 = vpack.c.bf16 %v394_v19, %v390_v14  ;;  %v422_v4 = vld [vmem:[#allocation2 + $0x290] sm:$0xff] }
 0x1c3   :  { %v5059_v45 = vadd.f32 %v329_v36, %v227_v49  ;;  %566 = vmatprep.mubr.f32.mxu0 %v337_v30  ;;  %v383_v49 = vld [vmem:[#allocation2 + $0x158] sm:$0xff]  ;;  %v3345_v24 = vpack.c.bf16 %v403_v21, %v399_v20  ;;  %v426_v6 = vld [vmem:[#allocation2 + $0x2b0] sm:$0xff] }
 0x1c4   :  { %v338_v54 = vmax.f32 %v5057_v34, 0.0  ;;  %567 = vmatmul.mubr.f32.gmra.mrb[12].mxu0 %v336_v28  ;;  %v3337_v3 = vpack.c.bf16 %v387_v61, %v383_v49  ;;  %v407_v31 = vld [vmem:[#allocation2 + $0x218] sm:$0xff]  ;;  %v430_v14 = vld [vmem:[#allocation2 + $0x2d0] sm:$0xff] }
 0x1c5   :  { %v339_v47 = vmax.f32 %v5059_v45, 0.0  ;;  %3328 = vmatpush1.bf16.msra.mxu0 %v3327_v33  ;;  %v411_v33 = vld [vmem:[#allocation2 + $0x238] sm:$0xff]  ;;  %v434_v19 = vld [vmem:[#allocation2 + $0x2f0] sm:$0xff] }
 0x1c6   :  { %3330 = vmatprep.subr.bf16.mxu0 %v3329_v37  ;;  %v3349_v37 = vpack.c.bf16 %v411_v33, %v407_v31  ;;  %v423_v49 = vld [vmem:[#allocation2 + $0x298] sm:$0xff]  ;;  %v694_v8 = vld [vmem:[#allocation4 + $0xd0] sm:$0xff] }
 0x1c7   :  { %572 = vmatprep.mubr.f32.mxu0 %v339_v47  ;;  %v427_v61 = vld [vmem:[#allocation2 + $0x2b8] sm:$0xff]  ;;  %v702_v23 = vld [vmem:[#allocation4 + $0x110] sm:$0xff] }
 0x1c8   :  { %573 = vmatmul.mubr.f32.gmra.mrb[14].mxu0 %v338_v54  ;;  %v439_v20 = vld [vmem:[#allocation2 + $0x318] sm:$0xff]  ;;  %v710_v45 = vld [vmem:[#allocation4 + $0x150] sm:$0xff] }
 0x1c9   :  { %3332 = vmatpush1.bf16.msra.mxu0 %v3331_v55  ;;  %643 = vmatprep.mubr.f32.mxu0 %v333_v60  ;;  %v398_v60 = vld [vmem:[#allocation2 + $0x1d0] sm:$0xff]  ;;  %v3351_v55 = vpack.c.bf16 %v410_v41, %v406_v39  ;;  %v443_v21 = vld [vmem:[#allocation2 + $0x338] sm:$0xff] }
 0x1ca   :  { %3334 = vmatprep.subr.bf16.mxu0 %v3333_v56  ;;  %v3347_v36 = vpack.c.bf16 %v402_v25, %v398_v60  ;;  %v3353_v56 = vpack.c.bf16 %v419_v52, %v415_v50  ;;  %v438_v60 = vld [vmem:[#allocation2 + $0x310] sm:$0xff]  ;;  %v447_v31 = vld [vmem:[#allocation2 + $0x358] sm:$0xff] }
 0x1cb   :  { %v442_v25 = vld [vmem:[#allocation2 + $0x330] sm:$0xff]  ;;  %v451_v33 = vld [vmem:[#allocation2 + $0x378] sm:$0xff] }
 0x1cc   :  { %v446_v39 = vld [vmem:[#allocation2 + $0x350] sm:$0xff]  ;;  %v455_v50 = vld [vmem:[#allocation2 + $0x398] sm:$0xff] }
 0x1cd   :  { %3336 = vmatpush1.bf16.msra.mxu0 %v3335_v62  ;;  %v3355_v62 = vpack.c.bf16 %v418_v59, %v414_v57  ;;  %v450_v41 = vld [vmem:[#allocation2 + $0x370] sm:$0xff]  ;;  %v459_v52 = vld [vmem:[#allocation2 + $0x3b8] sm:$0xff] }
 0x1ce   :  { %3338 = vmatprep.subr.bf16.mxu0 %v3337_v3  ;;  %v3357_v3 = vpack.c.bf16 %v427_v61, %v423_v49  ;;  %v454_v57 = vld [vmem:[#allocation2 + $0x390] sm:$0xff]  ;;  %v463_v49 = vld [vmem:[#allocation2 + $0x3d8] sm:$0xff] }
 0x1cf   :  { %v458_v59 = vld [vmem:[#allocation2 + $0x3b0] sm:$0xff]  ;;  %v467_v61 = vld [vmem:[#allocation2 + $0x3f8] sm:$0xff] }
 0x1d1   :  { %3340 = vmatpush1.bf16.msra.mxu0 %v3339_v10  ;;  %v3359_v10 = vpack.c.bf16 %v426_v6, %v422_v4  ;;  %v462_v4 = vld [vmem:[#allocation2 + $0x3d0] sm:$0xff] }
 0x1d2   :  { %3342 = vmatprep.subr.bf16.mxu0 %v3341_v13  ;;  %v3361_v13 = vpack.c.bf16 %v435_v9, %v431_v7  ;;  %v466_v6 = vld [vmem:[#allocation2 + $0x3f0] sm:$0xff]  ;;  %v671_v7 = vld [vmem:[#allocation4 + $0x18] sm:$0xff] }
 0x1d3   :  { %v675_v9 = vld [vmem:[#allocation4 + $0x38] sm:$0xff] }
 0x1d5   :  { %3344 = vmatpush1.bf16.msra.mxu0 %v3343_v22  ;;  %v3363_v22 = vpack.c.bf16 %v434_v19, %v430_v14  ;;  %v670_v14 = vld [vmem:[#allocation4 + $0x10] sm:$0xff] }
 0x1d6   :  { %3346 = vmatprep.subr.bf16.mxu0 %v3345_v24  ;;  %v3365_v24 = vpack.c.bf16 %v443_v21, %v439_v20  ;;  %v674_v19 = vld [vmem:[#allocation4 + $0x30] sm:$0xff]  ;;  %v679_v20 = vld [vmem:[#allocation4 + $0x58] sm:$0xff] }
 0x1d7   :  { %v683_v21 = vld [vmem:[#allocation4 + $0x78] sm:$0xff] }
 0x1d9   :  { %3348 = vmatpush1.bf16.msra.mxu0 %v3347_v36  ;;  %v3367_v36 = vpack.c.bf16 %v442_v25, %v438_v60  ;;  %v678_v60 = vld [vmem:[#allocation4 + $0x50] sm:$0xff] }
 0x1da   :  { %3350 = vmatprep.subr.bf16.mxu0 %v3349_v37  ;;  %v3369_v37 = vpack.c.bf16 %v451_v33, %v447_v31  ;;  %v682_v25 = vld [vmem:[#allocation4 + $0x70] sm:$0xff]  ;;  %v687_v31 = vld [vmem:[#allocation4 + $0x98] sm:$0xff] }
 0x1db   :  { %v691_v33 = vld [vmem:[#allocation4 + $0xb8] sm:$0xff] }
 0x1dd   :  { %3352 = vmatpush1.bf16.msra.mxu0 %v3351_v55  ;;  %v3371_v55 = vpack.c.bf16 %v450_v41, %v446_v39  ;;  %v686_v39 = vld [vmem:[#allocation4 + $0x90] sm:$0xff] }
 0x1de   :  { %3354 = vmatprep.subr.bf16.mxu0 %v3353_v56  ;;  %v3373_v56 = vpack.c.bf16 %v459_v52, %v455_v50  ;;  %v690_v41 = vld [vmem:[#allocation4 + $0xb0] sm:$0xff]  ;;  %v695_v50 = vld [vmem:[#allocation4 + $0xd8] sm:$0xff] }
 0x1df   :  { %v699_v52 = vld [vmem:[#allocation4 + $0xf8] sm:$0xff]  ;;  %v5093_v51 = vpack.c.bf16 %v690_v41, %v686_v39 }
 0x1e1   :  { %3356 = vmatpush1.bf16.msra.mxu0 %v3355_v62  ;;  %v3375_v62 = vpack.c.bf16 %v458_v59, %v454_v57  ;;  %v711_v57 = vld [vmem:[#allocation4 + $0x158] sm:$0xff] }
 0x1e2   :  { %3358 = vmatprep.subr.bf16.mxu0 %v3357_v3  ;;  %v3377_v3 = vpack.c.bf16 %v467_v61, %v463_v49  ;;  %v715_v59 = vld [vmem:[#allocation4 + $0x178] sm:$0xff] }
 0x1e3   :  { %v719_v49 = vld [vmem:[#allocation4 + $0x198] sm:$0xff] }
 0x1e4   :  { %v723_v61 = vld [vmem:[#allocation4 + $0x1b8] sm:$0xff] }
 0x1e5   :  { %3360 = vmatpush1.bf16.msra.mxu0 %v3359_v10  ;;  %v3379_v10 = vpack.c.bf16 %v466_v6, %v462_v4  ;;  %v5121_v34 = vpack.c.bf16 %v723_v61, %v719_v49  ;;  %v727_v4 = vld [vmem:[#allocation4 + $0x1d8] sm:$0xff]  ;;  %v484_v61 = vsub.s32 3, %v5023_v42 }
 0x1e6   :  { %3362 = vmatprep.subr.bf16.mxu0 %v3361_v13  ;;  %v5071_v13 = vpack.c.bf16 %v675_v9, %v671_v7  ;;  %v731_v6 = vld [vmem:[#allocation4 + $0x1f8] sm:$0xff] }
 0x1e7   :  { %v5127_v9 = vpack.c.bf16 %v731_v6, %v727_v4 }
 0x1e9   :  { %3364 = vmatpush1.bf16.msra.mxu0 %v3363_v22  ;;  %v5073_v22 = vpack.c.bf16 %v674_v19, %v670_v14  ;;  %v730_v14 = vld [vmem:[#allocation4 + $0x1f0] sm:$0xff]  ;;  %v798_v19 = vpop.f32.mrb[0].mxu1 }
 0x1ea   :  { %3366 = vmatprep.subr.bf16.mxu0 %v3365_v24  ;;  %v5076_v24 = vpack.c.bf16 %v683_v21, %v679_v20  ;;  %v800_v20 = vpop.f32.mrb[1].mxu1 }
 0x1ed   :  { %3368 = vmatpush1.bf16.msra.mxu0 %v3367_v36  ;;  %v5083_v36 = vpack.c.bf16 %v682_v25, %v678_v60  ;;  %v468_v60 = vld [vmem:[%s5624_s7] sm:$0xf] }
 0x1ee   :  { %3370 = vmatprep.subr.bf16.mxu0 %v3369_v37  ;;  %v5086_v37 = vpack.c.bf16 %v691_v33, %v687_v31  ;;  %v473_v33 = vrot.slane %v468_v60, %v5026_v44  ;;  %v477_v39 = vrot.slane %v468_v60, %v5032_v46  ;;  %v485_v6 = vrot.slane %v468_v60, %v484_v61 }
 0x1f1   :  { %3372 = vmatpush1.bf16.msra.mxu0 %v3371_v55  ;;  %v703_v55 = vld [vmem:[#allocation4 + $0x118] sm:$0xff] }
 0x1f2   :  { %3374 = vmatprep.subr.bf16.mxu0 %v3373_v56  ;;  %v707_v56 = vld [vmem:[#allocation4 + $0x138] sm:$0xff] }
 0x1f5   :  { %3376 = vmatpush1.bf16.msra.mxu0 %v3375_v62 }
 0x1f6   :  { %3378 = vmatprep.subr.bf16.mxu0 %v3377_v3  ;;  %v722_v3 = vld [vmem:[#allocation4 + $0x1b0] sm:$0xff] }
 0x1f9   :  { %3380 = vmatpush1.bf16.msra.mxu0 %v3379_v10  ;;  %v726_v10 = vld [vmem:[#allocation4 + $0x1d0] sm:$0xff] }
 0x1fa   :  { %3414 = vmatprep.subr.bf16.mxu0 %v5071_v13  ;;  %v5130_v21 = vpack.c.bf16 %v730_v14, %v726_v10 }
 0x1fc   :  { %644 = vmatmul.mubr.f32.vlgmr.msra.gmra.mrb[16].mxu0 %v332_v1  ;;  %v5096_v1 = vpack.c.bf16 %v699_v52, %v695_v50 }
 0x1fd   :  { %649 = vmatprep.mubr.f32.mxu0 %v335_v12  ;;  %3416 = vmatpush1.bf16.msra.mxu0 %v5073_v22  ;;  %v698_v12 = vld [vmem:[#allocation4 + $0xf0] sm:$0xff] }
 0x1fe   :  { %3418 = vmatprep.subr.bf16.mxu0 %v5076_v24  ;;  %v5103_v2 = vpack.c.bf16 %v698_v12, %v694_v8 }
 0x200   :  { %650 = vmatmul.mubr.f32.gmra.mrb[18].mxu0 %v334_v11  ;;  %v5106_v11 = vpack.c.bf16 %v707_v56, %v703_v55 }
 0x201   :  { %655 = vmatprep.mubr.f32.mxu0 %v337_v30  ;;  %3420 = vmatpush1.bf16.msra.mxu0 %v5083_v36  ;;  %v706_v30 = vld [vmem:[#allocation4 + $0x130] sm:$0xff] }
 0x202   :  { %3422 = vmatprep.subr.bf16.mxu0 %v5086_v37  ;;  %v5111_v16 = vpack.c.bf16 %v706_v30, %v702_v23 }
 0x204   :  { %656 = vmatmul.mubr.f32.gmra.mrb[20].mxu0 %v336_v28  ;;  %v5115_v28 = vpack.c.bf16 %v715_v59, %v711_v57 }
 0x205   :  { %661 = vmatprep.mubr.f32.mxu0 %v339_v47  ;;  %3424 = vmatpush1.bf16.msra.mxu0 %v5093_v51  ;;  %v714_v47 = vld [vmem:[#allocation4 + $0x170] sm:$0xff] }
 0x206   :  { %3426 = vmatprep.subr.bf16.mxu0 %v5096_v1  ;;  %v5118_v62 = vpack.c.bf16 %v714_v47, %v710_v45  ;;  %v480_v47 = vsub.s32 2, %v5023_v42 }
 0x208   :  { %662 = vmatmul.mubr.f32.gmra.mrb[22].mxu0 %v338_v54  ;;  %v718_v54 = vld [vmem:[#allocation4 + $0x190] sm:$0xff] }
 0x209   :  { %3428 = vmatpush1.bf16.msra.mxu0 %v5103_v2  ;;  %867 = vmatprep.mubr.f32.mxu0 %v5646_v0  ;;  %v5124_v7 = vpack.c.bf16 %v722_v3, %v718_v54  ;;  %v481_v3 = vrot.slane %v468_v60, %v480_v47 }
 0x20a   :  { %3430 = vmatprep.subr.bf16.mxu0 %v5106_v11 }
 0x20d   :  { %3432 = vmatpush1.bf16.msra.mxu0 %v5111_v16 }
 0x20e   :  { %3434 = vmatprep.subr.bf16.mxu0 %v5115_v28 }
 0x211   :  { %3436 = vmatpush1.bf16.msra.mxu0 %v5118_v62 }
 0x212   :  { %3438 = vmatprep.subr.bf16.mxu0 %v5121_v34 }
 0x215   :  { %3440 = vmatpush1.bf16.msra.mxu0 %v5124_v7 }
 0x216   :  { %3442 = vmatprep.subr.bf16.mxu0 %v5127_v9 }
 0x219   :  { %3444 = vmatpush1.bf16.msra.mxu0 %v5130_v21 }
 0x21a   :  { %3478 = vmatprep.subr.bf16.mxu0 %v5071_v13 }
 0x21c   :  { %868 = vmatmul.mubr.f32.vlgmr.msra.gmra.mrb[24].mxu0 %v5646_v0 }
 0x21d   :  { %3480 = vmatpush1.bf16.msra.mxu0 %v5073_v22  ;;  %1037 = vmatprep.mubr.f32.mxu0 %v5646_v0 }
 0x21e   :  { %3482 = vmatprep.subr.bf16.mxu0 %v5076_v24 }
 0x221   :  { %3484 = vmatpush1.bf16.msra.mxu0 %v5083_v36 }
 0x222   :  { %3486 = vmatprep.subr.bf16.mxu0 %v5086_v37 }
 0x225   :  { %3488 = vmatpush1.bf16.msra.mxu0 %v5093_v51 }
 0x226   :  { %3490 = vmatprep.subr.bf16.mxu0 %v5096_v1 }
 0x229   :  { %3492 = vmatpush1.bf16.msra.mxu0 %v5103_v2 }
 0x22a   :  { %3494 = vmatprep.subr.bf16.mxu0 %v5106_v11 }
 0x22d   :  { %3496 = vmatpush1.bf16.msra.mxu0 %v5111_v16 }
 0x22e   :  { %3498 = vmatprep.subr.bf16.mxu0 %v5115_v28 }
 0x231   :  { %3500 = vmatpush1.bf16.msra.mxu0 %v5118_v62 }
 0x232   :  { %3502 = vmatprep.subr.bf16.mxu0 %v5121_v34 }
 0x235   :  { %3504 = vmatpush1.bf16.msra.mxu0 %v5124_v7 }
 0x236   :  { %3506 = vmatprep.subr.bf16.mxu0 %v5127_v9 }
 0x239   :  { %3508 = vmatpush1.bf16.msra.mxu0 %v5130_v21 }
 0x23a   :  { %3542 = vmatprep.subr.bf16.mxu0 %v5071_v13 }
 0x28f   :  { %v556_v25 = vpop.f32.mrb[8].mxu0 }
 0x290   :  { %v558_v31 = vpop.f32.mrb[9].mxu0  ;;  %v5174_v14 = vadd.f32 %v556_v25, %v473_v33 }
 0x291   :  { %v5172_v4 = vadd.f32 %v558_v31, %v477_v39 }
 0x293   :  { %v562_v41 = vpop.f32.mrb[10].mxu0 }
 0x294   :  { %v5158_v50 = vadd.f32 %v562_v41, %v473_v33  ;;  %v564_v52 = vpop.f32.mrb[11].mxu0 }
 0x295   :  { %v5160_v8 = vadd.f32 %v564_v52, %v477_v39 }
 0x297   :  { %v568_v12 = vpop.f32.mrb[12].mxu0 }
 0x298   :  { %v5162_v55 = vadd.f32 %v568_v12, %v473_v33  ;;  %v570_v56 = vpop.f32.mrb[13].mxu0 }
 0x299   :  { %v5164_v23 = vadd.f32 %v570_v56, %v477_v39  ;;  %v875_v56 = vadd.f32 %v800_v20, %v5172_v4 }
 0x29b   :  { %v574_v30 = vpop.f32.mrb[14].mxu0  ;;  %v3188_v31 = vmul.f32 -1.442695, %v875_v56 }
 0x29c   :  { %v5166_v57 = vadd.f32 %v574_v30, %v473_v33  ;;  %v576_v59 = vpop.f32.mrb[15].mxu0 }
 0x29d   :  { %v5168_v45 = vadd.f32 %v576_v59, %v477_v39  ;;  %v874_v59 = vadd.f32 %v798_v19, %v5174_v14  ;;  %4242 = vpow2.f32 %v3188_v31 }
 0x29f   :  { %5672 = vst [vmem:[#allocation27_spill] sm:$0xff] %v5168_v45  ;;  %v3187_v39 = vmul.f32 -1.442695, %v874_v59 }
 0x2a1   :  { %4244 = vpow2.f32 %v3187_v39 }
 0x2cf   :  { %v645_v49 = vpop.f32.mrb[16].mxu0 }
 0x2d0   :  { %v647_v54 = vpop.f32.mrb[17].mxu0  ;;  %v5190_v19 = vadd.f32 %v645_v49, %v481_v3 }
 0x2d3   :  { %v651_v10 = vpop.f32.mrb[18].mxu0 }
 0x2d4   :  { %v5176_v41 = vadd.f32 %v651_v10, %v481_v3  ;;  %v653_v52 = vpop.f32.mrb[19].mxu0  ;;  %v4243_v10 = vpop.eup %4242 }
 0x2d5   :  { %v5178_v12 = vadd.f32 %v653_v52, %v485_v6  ;;  %v4245_v20 = vpop.eup %4244  ;;  %v887_v52 = vadd.f32 1.0, %v4243_v10 }
 0x2d6   :  { %v881_v46 = vadd.f32 1.0, %v4245_v20 }
 0x2d7   :  { %v657_v30 = vpop.f32.mrb[20].mxu0  ;;  %4246 = vrcp.f32 %v887_v52 }
 0x2d8   :  { %v5182_v0 = vadd.f32 %v657_v30, %v481_v3  ;;  %v659_v42 = vpop.f32.mrb[21].mxu0  ;;  %v5192_v30 = vadd.f32 %v647_v54, %v485_v6  ;;  %4248 = vrcp.f32 %v881_v46 }
 0x2d9   :  { %v5184_v47 = vadd.f32 %v659_v42, %v485_v6 }
 0x2db   :  { %v663_v60 = vpop.f32.mrb[22].mxu0 }
 0x2dc   :  { %v5186_v25 = vadd.f32 %v663_v60, %v481_v3  ;;  %v665_v33 = vpop.f32.mrb[23].mxu0 }
 0x2dd   :  { %v5188_v61 = vadd.f32 %v665_v33, %v485_v6 }
 0x2de   :  { %5673 = vst [vmem:[#allocation28_spill] sm:$0xff] %v5186_v25 }
 0x2df   :  { %5674 = vst [vmem:[#allocation29_spill] sm:$0xff] %v5188_v61 }
 0x2e1   :  { %v4247_v31 = vpop.eup %4246 }
 0x2e2   :  { %v4249_v39 = vpop.eup %4248  ;;  %v897_v10 = vmul.f32 0.0, %v4247_v31 }
 0x2ef   :  { %v869_v42 = vpop.f32.mrb[24].mxu0 }
 0x2f0   :  { %v876_v56 = vadd.f32 %v869_v42, %v5190_v19  ;;  %v871_v59 = vpop.f32.mrb[25].mxu0 }
 0x2f1   :  { %v877_v60 = vadd.f32 %v871_v59, %v5192_v30 }
 0x2f2   :  { %4250 = vtanh.f32 %v876_v56 }
 0x2f3   :  { %v3189_v33 = vmul.f32 -1.442695, %v877_v60 }
 0x2f5   :  { %4252 = vpow2.f32 %v3189_v33 }
 0x2fc   :  { %v4251_v44 = vpop.eup %4250 }
 0x2fd   :  { %v898_v20 = vmul.f32 %v4251_v44, %v4249_v39  ;;  %v5675_v44 = vmov 0.0  }
 0x2ff   :  { %v4253_v49 = vpop.eup %4252  ;;  %v5196_v3 = vadd.f32 %v898_v20, %v897_v10 }
 0x300   :  { %v894_v54 = vadd.f32 1.0, %v4253_v49 }
 0x301   :  { %4254 = vtanh.f32 %v5196_v3 }
 0x302   :  { %4256 = vrcp.f32 %v894_v54 }
 0x30b   :  { %v4255_v6 = vpop.eup %4254 }
 0x30c   :  { %v4257_v52 = vpop.eup %4256 }
 0x30d   :  { %v901_v46 = vmul.f32 %v4257_v52, %v4255_v6 }
 0x30f   :  { %967 = vmatmul.mubr.f32.vlgmr.msra.gmra.mrb[2].mxu1 %v901_v46  ;;  %1038 = vmatmul.mubr.f32.vlgmr.msra.gmra.mrb[26].mxu0 %v901_v46 }
 0x310   :  { %3512 = vmatpush1.bf16.msra.mxu1 %v4958_v43  ;;  %3544 = vmatpush1.bf16.msra.mxu0 %v5073_v22 }
 0x311   :  { %3514 = vmatprep.subr.bf16.mxu1 %v4962_v48  ;;  %3546 = vmatprep.subr.bf16.mxu0 %v5076_v24 }
 0x312   :  { %1154 = vmatprep.mubr.f32.mxu1 %v5675_v44  ;;  %1225 = vmatprep.mubr.f32.mxu0 %v5675_v44 }
 0x314   :  { %3516 = vmatpush1.bf16.msra.mxu1 %v4964_v53  ;;  %3548 = vmatpush1.bf16.msra.mxu0 %v5083_v36 }
 0x315   :  { %3518 = vmatprep.subr.bf16.mxu1 %v4967_v58  ;;  %3550 = vmatprep.subr.bf16.mxu0 %v5086_v37 }
 0x318   :  { %3520 = vmatpush1.bf16.msra.mxu1 %v4970_v63  ;;  %3552 = vmatpush1.bf16.msra.mxu0 %v5093_v51 }
 0x319   :  { %3522 = vmatprep.subr.bf16.mxu1 %v4973_v5  ;;  %3554 = vmatprep.subr.bf16.mxu0 %v5096_v1 }
 0x31c   :  { %3524 = vmatpush1.bf16.msra.mxu1 %v4976_v15  ;;  %3556 = vmatpush1.bf16.msra.mxu0 %v5103_v2 }
 0x31d   :  { %3526 = vmatprep.subr.bf16.mxu1 %v4979_v18  ;;  %3558 = vmatprep.subr.bf16.mxu0 %v5106_v11 }
 0x320   :  { %3528 = vmatpush1.bf16.msra.mxu1 %v4982_v26  ;;  %3560 = vmatpush1.bf16.msra.mxu0 %v5111_v16 }
 0x321   :  { %3530 = vmatprep.subr.bf16.mxu1 %v4985_v29  ;;  %3562 = vmatprep.subr.bf16.mxu0 %v5115_v28 }
 0x324   :  { %3532 = vmatpush1.bf16.msra.mxu1 %v4988_v35  ;;  %3564 = vmatpush1.bf16.msra.mxu0 %v5118_v62 }
 0x325   :  { %3534 = vmatprep.subr.bf16.mxu1 %v4992_v17  ;;  %3566 = vmatprep.subr.bf16.mxu0 %v5121_v34 }
 0x328   :  { %3536 = vmatpush1.bf16.msra.mxu1 %v4995_v27  ;;  %3568 = vmatpush1.bf16.msra.mxu0 %v5124_v7 }
 0x329   :  { %3538 = vmatprep.subr.bf16.mxu1 %v4998_v32  ;;  %3570 = vmatprep.subr.bf16.mxu0 %v5127_v9 }
 0x32c   :  { %3540 = vmatpush1.bf16.msra.mxu1 %v5001_v40  ;;  %3572 = vmatpush1.bf16.msra.mxu0 %v5130_v21 }
 0x32d   :  { %3574 = vmatprep.subr.bf16.mxu1 %v4956_v38  ;;  %3606 = vmatprep.subr.bf16.mxu0 %v5071_v13 }
 0x3e2   :  { %v968_v42 = vpop.f32.mrb[2].mxu1  ;;  %v1039_v56 = vpop.f32.mrb[26].mxu0 }
 0x3e3   :  { %v1048_v59 = vrot.slane %v968_v42, 4  ;;  %v970_v60 = vpop.f32.mrb[3].mxu1  ;;  %v1041_v33 = vpop.f32.mrb[27].mxu0  ;;  %v1050_v52 = vrot.slane %v1039_v56, 4 }
 0x3e4   :  { %v1049_v31 = vrot.slane %v970_v60, 4  ;;  %v1051_v54 = vrot.slane %v1041_v33, 4  ;;  %v1080_v33 = vrot.slane %v5196_v3, 4 }
 0x3e5   :  { %v1056_v39 = vadd.f32 %v1048_v59, %v5174_v14  ;;  %v1058_v25 = vadd.f32 %v1050_v52, %v5190_v19 }
 0x3e6   :  { %v1057_v10 = vadd.f32 %v1049_v31, %v5172_v4  ;;  %v1059_v6 = vadd.f32 %v1051_v54, %v5192_v30 }
 0x3e7   :  { %v3190_v20 = vmul.f32 -1.442695, %v1056_v39 }
 0x3e8   :  { %v3191_v49 = vmul.f32 -1.442695, %v1057_v10  ;;  %v3192_v46 = vmul.f32 -1.442695, %v1059_v6 }
 0x3e9   :  { %4258 = vpow2.f32 %v3190_v20 }
 0x3ea   :  { %4260 = vpow2.f32 %v3191_v49 }
 0x3eb   :  { %4262 = vpow2.f32 %v3192_v46 }
 0x3ec   :  { %4264 = vtanh.f32 %v1058_v25 }
 0x3f3   :  { %v4259_v61 = vpop.eup %4258 }
 0x3f4   :  { %v4261_v42 = vpop.eup %4260  ;;  %v1063_v45 = vadd.f32 1.0, %v4259_v61 }
 0x3f5   :  { %v1069_v60 = vadd.f32 1.0, %v4261_v42  ;;  %v4263_v4 = vpop.eup %4262 }
 0x3f6   :  { %4266 = vrcp.f32 %v1063_v45  ;;  %v4265_v14 = vpop.eup %4264  ;;  %v1076_v30 = vadd.f32 1.0, %v4263_v4 }
 0x3f7   :  { %4268 = vrcp.f32 %v1069_v60 }
 0x3f8   :  { %4270 = vrcp.f32 %v1076_v30 }
 0x400   :  { %v4267_v59 = vpop.eup %4266 }
 0x401   :  { %v4269_v31 = vpop.eup %4268  ;;  %v1083_v39 = vmul.f32 %v4267_v59, %v4265_v14 }
 0x402   :  { %v1082_v56 = vmul.f32 %v4269_v31, %v1080_v33  ;;  %v4271_v61 = vpop.eup %4270 }
 0x404   :  { %v5238_v10 = vadd.f32 %v1083_v39, %v1082_v56 }
 0x406   :  { %4272 = vtanh.f32 %v5238_v10 }
 0x410   :  { %v4273_v19 = vpop.eup %4272 }
 0x411   :  { %v1086_v25 = vmul.f32 %v4273_v19, %v4271_v61  ;;  %v1256_v19 = vrot.slane %v5238_v10, 4 }
 0x413   :  { %v1088_v20 = vrot.slane %v1086_v25, 4 }
 0x415   :  { %1155 = vmatmul.mubr.f32.vlgmr.msra.gmra.mrb[4].mxu1 %v1088_v20  ;;  %1226 = vmatmul.mubr.f32.vlgmr.msra.gmra.mrb[28].mxu0 %v1088_v20 }
 0x416   :  { %3576 = vmatpush1.bf16.msra.mxu1 %v4958_v43  ;;  %3608 = vmatpush1.bf16.msra.mxu0 %v5073_v22 }
 0x417   :  { %3578 = vmatprep.subr.bf16.mxu1 %v4962_v48  ;;  %3610 = vmatprep.subr.bf16.mxu0 %v5076_v24 }
 0x418   :  { %1327 = vmatprep.mubr.f32.mxu1 %v5675_v44  ;;  %1398 = vmatprep.mubr.f32.mxu0 %v5675_v44 }
 0x41a   :  { %3580 = vmatpush1.bf16.msra.mxu1 %v4964_v53  ;;  %3612 = vmatpush1.bf16.msra.mxu0 %v5083_v36 }
 0x41b   :  { %3582 = vmatprep.subr.bf16.mxu1 %v4967_v58  ;;  %3614 = vmatprep.subr.bf16.mxu0 %v5086_v37 }
 0x41e   :  { %3584 = vmatpush1.bf16.msra.mxu1 %v4970_v63  ;;  %3616 = vmatpush1.bf16.msra.mxu0 %v5093_v51 }
 0x41f   :  { %3586 = vmatprep.subr.bf16.mxu1 %v4973_v5  ;;  %3618 = vmatprep.subr.bf16.mxu0 %v5096_v1 }
 0x422   :  { %3588 = vmatpush1.bf16.msra.mxu1 %v4976_v15  ;;  %3620 = vmatpush1.bf16.msra.mxu0 %v5103_v2 }
 0x423   :  { %3590 = vmatprep.subr.bf16.mxu1 %v4979_v18  ;;  %3622 = vmatprep.subr.bf16.mxu0 %v5106_v11 }
 0x426   :  { %3592 = vmatpush1.bf16.msra.mxu1 %v4982_v26  ;;  %3624 = vmatpush1.bf16.msra.mxu0 %v5111_v16 }
 0x427   :  { %3594 = vmatprep.subr.bf16.mxu1 %v4985_v29  ;;  %3626 = vmatprep.subr.bf16.mxu0 %v5115_v28 }
 0x42a   :  { %3596 = vmatpush1.bf16.msra.mxu1 %v4988_v35  ;;  %3628 = vmatpush1.bf16.msra.mxu0 %v5118_v62 }
 0x42b   :  { %3598 = vmatprep.subr.bf16.mxu1 %v4992_v17  ;;  %3630 = vmatprep.subr.bf16.mxu0 %v5121_v34 }
 0x42e   :  { %3600 = vmatpush1.bf16.msra.mxu1 %v4995_v27  ;;  %3632 = vmatpush1.bf16.msra.mxu0 %v5124_v7 }
 0x42f   :  { %3602 = vmatprep.subr.bf16.mxu1 %v4998_v32  ;;  %3634 = vmatprep.subr.bf16.mxu0 %v5127_v9 }
 0x432   :  { %3604 = vmatpush1.bf16.msra.mxu1 %v5001_v40  ;;  %3636 = vmatpush1.bf16.msra.mxu0 %v5130_v21 }
 0x433   :  { %3638 = vmatprep.subr.bf16.mxu1 %v4956_v38  ;;  %3670 = vmatprep.subr.bf16.mxu0 %v5071_v13 }
 0x4e8   :  { %v1156_v45 = vpop.f32.mrb[4].mxu1  ;;  %v1227_v3 = vpop.f32.mrb[28].mxu0 }
 0x4e9   :  { %v1232_v49 = vadd.f32 %v1156_v45, %v5158_v50  ;;  %v1158_v54 = vpop.f32.mrb[5].mxu1  ;;  %v1229_v6 = vpop.f32.mrb[29].mxu0  ;;  %v1234_v14 = vadd.f32 %v1227_v3, %v5176_v41 }
 0x4ea   :  { %v1233_v52 = vadd.f32 %v1158_v54, %v5160_v8  ;;  %v1235_v60 = vadd.f32 %v1229_v6, %v5178_v12 }
 0x4eb   :  { %v3193_v46 = vmul.f32 -1.442695, %v1232_v49 }
 0x4ec   :  { %v3194_v42 = vmul.f32 -1.442695, %v1233_v52  ;;  %v3195_v4 = vmul.f32 -1.442695, %v1235_v60 }
 0x4ed   :  { %4274 = vpow2.f32 %v3193_v46 }
 0x4ee   :  { %4276 = vpow2.f32 %v3194_v42 }
 0x4ef   :  { %4278 = vpow2.f32 %v3195_v4 }
 0x4f0   :  { %4280 = vtanh.f32 %v1234_v14 }
 0x4f7   :  { %v4275_v59 = vpop.eup %4274 }
 0x4f8   :  { %v4277_v33 = vpop.eup %4276  ;;  %v1239_v31 = vadd.f32 1.0, %v4275_v59 }
 0x4f9   :  { %v1245_v39 = vadd.f32 1.0, %v4277_v33  ;;  %v4279_v30 = vpop.eup %4278 }
 0x4fa   :  { %4282 = vrcp.f32 %v1239_v31  ;;  %v4281_v56 = vpop.eup %4280  ;;  %v1252_v45 = vadd.f32 1.0, %v4279_v30 }
 0x4fb   :  { %4284 = vrcp.f32 %v1245_v39 }
 0x4fc   :  { %4286 = vrcp.f32 %v1252_v45 }
 0x504   :  { %v4283_v61 = vpop.eup %4282 }
 0x505   :  { %v4285_v25 = vpop.eup %4284  ;;  %v1259_v20 = vmul.f32 %v4283_v61, %v4281_v56 }
 0x506   :  { %v1258_v49 = vmul.f32 %v4285_v25, %v1256_v19  ;;  %v4287_v3 = vpop.eup %4286 }
 0x508   :  { %v5280_v54 = vadd.f32 %v1259_v20, %v1258_v49 }
 0x50a   :  { %4288 = vtanh.f32 %v5280_v54 }
 0x514   :  { %v4289_v6 = vpop.eup %4288 }
 0x515   :  { %v1262_v52 = vmul.f32 %v4289_v6, %v4287_v3 }
 0x517   :  { %1328 = vmatmul.mubr.f32.vlgmr.msra.gmra.mrb[6].mxu1 %v1262_v52  ;;  %1399 = vmatmul.mubr.f32.vlgmr.msra.gmra.mrb[30].mxu0 %v1262_v52  ;;  %v1441_v52 = vrot.slane %v5280_v54, 4 }
 0x518   :  { %3640 = vmatpush1.bf16.msra.mxu1 %v4958_v43  ;;  %3672 = vmatpush1.bf16.msra.mxu0 %v5073_v22 }
 0x519   :  { %3642 = vmatprep.subr.bf16.mxu1 %v4962_v48  ;;  %3674 = vmatprep.subr.bf16.mxu0 %v5076_v24 }
 0x51a   :  { %1515 = vmatprep.mubr.f32.mxu1 %v5675_v44  ;;  %1586 = vmatprep.mubr.f32.mxu0 %v5675_v44 }
 0x51c   :  { %3644 = vmatpush1.bf16.msra.mxu1 %v4964_v53  ;;  %3676 = vmatpush1.bf16.msra.mxu0 %v5083_v36 }
 0x51d   :  { %3646 = vmatprep.subr.bf16.mxu1 %v4967_v58  ;;  %3678 = vmatprep.subr.bf16.mxu0 %v5086_v37 }
 0x520   :  { %3648 = vmatpush1.bf16.msra.mxu1 %v4970_v63  ;;  %3680 = vmatpush1.bf16.msra.mxu0 %v5093_v51 }
 0x521   :  { %3650 = vmatprep.subr.bf16.mxu1 %v4973_v5  ;;  %3682 = vmatprep.subr.bf16.mxu0 %v5096_v1 }
 0x524   :  { %3652 = vmatpush1.bf16.msra.mxu1 %v4976_v15  ;;  %3684 = vmatpush1.bf16.msra.mxu0 %v5103_v2 }
 0x525   :  { %3654 = vmatprep.subr.bf16.mxu1 %v4979_v18  ;;  %3686 = vmatprep.subr.bf16.mxu0 %v5106_v11 }
 0x528   :  { %3656 = vmatpush1.bf16.msra.mxu1 %v4982_v26  ;;  %3688 = vmatpush1.bf16.msra.mxu0 %v5111_v16 }
 0x529   :  { %3658 = vmatprep.subr.bf16.mxu1 %v4985_v29  ;;  %3690 = vmatprep.subr.bf16.mxu0 %v5115_v28 }
 0x52c   :  { %3660 = vmatpush1.bf16.msra.mxu1 %v4988_v35  ;;  %3692 = vmatpush1.bf16.msra.mxu0 %v5118_v62 }
 0x52d   :  { %3662 = vmatprep.subr.bf16.mxu1 %v4992_v17  ;;  %3694 = vmatprep.subr.bf16.mxu0 %v5121_v34 }
 0x530   :  { %3664 = vmatpush1.bf16.msra.mxu1 %v4995_v27  ;;  %3696 = vmatpush1.bf16.msra.mxu0 %v5124_v7 }
 0x531   :  { %3666 = vmatprep.subr.bf16.mxu1 %v4998_v32  ;;  %3698 = vmatprep.subr.bf16.mxu0 %v5127_v9 }
 0x534   :  { %3668 = vmatpush1.bf16.msra.mxu1 %v5001_v40  ;;  %3700 = vmatpush1.bf16.msra.mxu0 %v5130_v21 }
 0x535   :  { %3702 = vmatprep.subr.bf16.mxu1 %v4956_v38  ;;  %3734 = vmatprep.subr.bf16.mxu0 %v5071_v13 }
 0x5ea   :  { %v1329_v10 = vpop.f32.mrb[6].mxu1  ;;  %v1400_v46 = vpop.f32.mrb[30].mxu0 }
 0x5eb   :  { %v1409_v42 = vrot.slane %v1329_v10, 4  ;;  %v1331_v60 = vpop.f32.mrb[7].mxu1  ;;  %v1402_v4 = vpop.f32.mrb[31].mxu0  ;;  %v1411_v61 = vrot.slane %v1400_v46, 4 }
 0x5ec   :  { %v1410_v14 = vrot.slane %v1331_v60, 4  ;;  %v1412_v30 = vrot.slane %v1402_v4, 4 }
 0x5ed   :  { %v1417_v59 = vadd.f32 %v1409_v42, %v5158_v50  ;;  %v1419_v25 = vadd.f32 %v1411_v61, %v5176_v41 }
 0x5ee   :  { %v1418_v33 = vadd.f32 %v1410_v14, %v5160_v8  ;;  %v1420_v56 = vadd.f32 %v1412_v30, %v5178_v12 }
 0x5ef   :  { %v3196_v31 = vmul.f32 -1.442695, %v1417_v59 }
 0x5f0   :  { %v3197_v39 = vmul.f32 -1.442695, %v1418_v33  ;;  %v3198_v19 = vmul.f32 -1.442695, %v1420_v56 }
 0x5f1   :  { %4290 = vpow2.f32 %v3196_v31 }
 0x5f2   :  { %4292 = vpow2.f32 %v3197_v39 }
 0x5f3   :  { %4294 = vpow2.f32 %v3198_v19 }
 0x5f4   :  { %4296 = vtanh.f32 %v1419_v25 }
 0x5fb   :  { %v4291_v20 = vpop.eup %4290 }
 0x5fc   :  { %v4293_v45 = vpop.eup %4292  ;;  %v1424_v49 = vadd.f32 1.0, %v4291_v20 }
 0x5fd   :  { %v1430_v3 = vadd.f32 1.0, %v4293_v45  ;;  %v4295_v50 = vpop.eup %4294 }
 0x5fe   :  { %4298 = vrcp.f32 %v1424_v49  ;;  %v4297_v8 = vpop.eup %4296  ;;  %v1437_v12 = vadd.f32 1.0, %v4295_v50 }
 0x5ff   :  { %4300 = vrcp.f32 %v1430_v3 }
 0x600   :  { %4302 = vrcp.f32 %v1437_v12 }
 0x608   :  { %v4299_v6 = vpop.eup %4298 }
 0x609   :  { %v4301_v10 = vpop.eup %4300  ;;  %v1444_v42 = vmul.f32 %v4299_v6, %v4297_v8 }
 0x60a   :  { %v1443_v46 = vmul.f32 %v4301_v10, %v1441_v52  ;;  %v4303_v41 = vpop.eup %4302 }
 0x60c   :  { %v5322_v60 = vadd.f32 %v1444_v42, %v1443_v46 }
 0x60e   :  { %4304 = vtanh.f32 %v5322_v60  ;;  %v1617_v42 = vrot.slane %v5322_v60, 4 }
 0x618   :  { %v4305_v4 = vpop.eup %4304 }
 0x619   :  { %v1447_v14 = vmul.f32 %v4305_v4, %v4303_v41 }
 0x61b   :  { %v1449_v59 = vrot.slane %v1447_v14, 4 }
 0x61d   :  { %1516 = vmatmul.mubr.f32.vlgmr.msra.gmra.mrb[8].mxu1 %v1449_v59  ;;  %1587 = vmatmul.mubr.f32.vlgmr.msra.gmra.mrb[32].mxu0 %v1449_v59 }
 0x61e   :  { %3704 = vmatpush1.bf16.msra.mxu1 %v4958_v43  ;;  %3736 = vmatpush1.bf16.msra.mxu0 %v5073_v22 }
 0x61f   :  { %3706 = vmatprep.subr.bf16.mxu1 %v4962_v48  ;;  %3738 = vmatprep.subr.bf16.mxu0 %v5076_v24 }
 0x620   :  { %1688 = vmatprep.mubr.f32.mxu1 %v5675_v44  ;;  %1759 = vmatprep.mubr.f32.mxu0 %v5675_v44 }
 0x622   :  { %3708 = vmatpush1.bf16.msra.mxu1 %v4964_v53  ;;  %3740 = vmatpush1.bf16.msra.mxu0 %v5083_v36 }
 0x623   :  { %3710 = vmatprep.subr.bf16.mxu1 %v4967_v58  ;;  %3742 = vmatprep.subr.bf16.mxu0 %v5086_v37 }
 0x626   :  { %3712 = vmatpush1.bf16.msra.mxu1 %v4970_v63  ;;  %3744 = vmatpush1.bf16.msra.mxu0 %v5093_v51 }
 0x627   :  { %3714 = vmatprep.subr.bf16.mxu1 %v4973_v5  ;;  %3746 = vmatprep.subr.bf16.mxu0 %v5096_v1 }
 0x62a   :  { %3716 = vmatpush1.bf16.msra.mxu1 %v4976_v15  ;;  %3748 = vmatpush1.bf16.msra.mxu0 %v5103_v2 }
 0x62b   :  { %3718 = vmatprep.subr.bf16.mxu1 %v4979_v18  ;;  %3750 = vmatprep.subr.bf16.mxu0 %v5106_v11 }
 0x62e   :  { %3720 = vmatpush1.bf16.msra.mxu1 %v4982_v26  ;;  %3752 = vmatpush1.bf16.msra.mxu0 %v5111_v16 }
 0x62f   :  { %3722 = vmatprep.subr.bf16.mxu1 %v4985_v29  ;;  %3754 = vmatprep.subr.bf16.mxu0 %v5115_v28 }
 0x632   :  { %3724 = vmatpush1.bf16.msra.mxu1 %v4988_v35  ;;  %3756 = vmatpush1.bf16.msra.mxu0 %v5118_v62 }
 0x633   :  { %3726 = vmatprep.subr.bf16.mxu1 %v4992_v17  ;;  %3758 = vmatprep.subr.bf16.mxu0 %v5121_v34 }
 0x636   :  { %3728 = vmatpush1.bf16.msra.mxu1 %v4995_v27  ;;  %3760 = vmatpush1.bf16.msra.mxu0 %v5124_v7 }
 0x637   :  { %3730 = vmatprep.subr.bf16.mxu1 %v4998_v32  ;;  %3762 = vmatprep.subr.bf16.mxu0 %v5127_v9 }
 0x63a   :  { %3732 = vmatpush1.bf16.msra.mxu1 %v5001_v40  ;;  %3764 = vmatpush1.bf16.msra.mxu0 %v5130_v21 }
 0x63b   :  { %3766 = vmatprep.subr.bf16.mxu1 %v4956_v38  ;;  %3798 = vmatprep.subr.bf16.mxu0 %v5071_v13 }
 0x6f0   :  { %v1517_v54 = vpop.f32.mrb[8].mxu1  ;;  %v1588_v33 = vpop.f32.mrb[32].mxu0 }
 0x6f1   :  { %v1593_v31 = vadd.f32 %v1517_v54, %v5162_v55  ;;  %v1519_v39 = vpop.f32.mrb[9].mxu1  ;;  %v1590_v30 = vpop.f32.mrb[33].mxu0  ;;  %v1595_v45 = vadd.f32 %v1588_v33, %v5182_v0 }
 0x6f2   :  { %v1594_v56 = vadd.f32 %v1519_v39, %v5164_v23  ;;  %v1596_v25 = vadd.f32 %v1590_v30, %v5184_v47 }
 0x6f3   :  { %v3199_v61 = vmul.f32 -1.442695, %v1593_v31 }
 0x6f4   :  { %v3200_v19 = vmul.f32 -1.442695, %v1594_v56  ;;  %v3201_v20 = vmul.f32 -1.442695, %v1596_v25 }
 0x6f5   :  { %4306 = vpow2.f32 %v3199_v61 }
 0x6f6   :  { %4308 = vpow2.f32 %v3200_v19 }
 0x6f7   :  { %4310 = vpow2.f32 %v3201_v20 }
 0x6f8   :  { %4312 = vtanh.f32 %v1595_v45 }
 0x6ff   :  { %v4307_v49 = vpop.eup %4306 }
 0x700   :  { %v4309_v3 = vpop.eup %4308  ;;  %v1600_v50 = vadd.f32 1.0, %v4307_v49 }
 0x701   :  { %v1606_v8 = vadd.f32 1.0, %v4309_v3  ;;  %v4311_v6 = vpop.eup %4310 }
 0x702   :  { %4314 = vrcp.f32 %v1600_v50  ;;  %v4313_v52 = vpop.eup %4312  ;;  %v1613_v41 = vadd.f32 1.0, %v4311_v6 }
 0x703   :  { %4316 = vrcp.f32 %v1606_v8 }
 0x704   :  { %4318 = vrcp.f32 %v1613_v41 }
 0x70c   :  { %v4315_v10 = vpop.eup %4314 }
 0x70d   :  { %v4317_v12 = vpop.eup %4316  ;;  %v1620_v46 = vmul.f32 %v4315_v10, %v4313_v52 }
 0x70e   :  { %v1619_v4 = vmul.f32 %v4317_v12, %v1617_v42  ;;  %v4319_v59 = vpop.eup %4318 }
 0x710   :  { %v5364_v14 = vadd.f32 %v1620_v46, %v1619_v4 }
 0x712   :  { %4320 = vtanh.f32 %v5364_v14  ;;  %v1802_v12 = vrot.slane %v5364_v14, 4 }
 0x71c   :  { %v4321_v54 = vpop.eup %4320 }
 0x71d   :  { %v1623_v33 = vmul.f32 %v4321_v54, %v4319_v59 }
 0x71f   :  { %1689 = vmatmul.mubr.f32.vlgmr.msra.gmra.mrb[10].mxu1 %v1623_v33  ;;  %1760 = vmatmul.mubr.f32.vlgmr.msra.gmra.mrb[34].mxu0 %v1623_v33 }
 0x720   :  { %3768 = vmatpush1.bf16.msra.mxu1 %v4958_v43  ;;  %3800 = vmatpush1.bf16.msra.mxu0 %v5073_v22 }
 0x721   :  { %3770 = vmatprep.subr.bf16.mxu1 %v4962_v48  ;;  %3802 = vmatprep.subr.bf16.mxu0 %v5076_v24 }
 0x722   :  { %1876 = vmatprep.mubr.f32.mxu1 %v5675_v44  ;;  %1947 = vmatprep.mubr.f32.mxu0 %v5675_v44 }
 0x724   :  { %3772 = vmatpush1.bf16.msra.mxu1 %v4964_v53  ;;  %3804 = vmatpush1.bf16.msra.mxu0 %v5083_v36 }
 0x725   :  { %3774 = vmatprep.subr.bf16.mxu1 %v4967_v58  ;;  %3806 = vmatprep.subr.bf16.mxu0 %v5086_v37 }
 0x728   :  { %3776 = vmatpush1.bf16.msra.mxu1 %v4970_v63  ;;  %3808 = vmatpush1.bf16.msra.mxu0 %v5093_v51 }
 0x729   :  { %3778 = vmatprep.subr.bf16.mxu1 %v4973_v5  ;;  %3810 = vmatprep.subr.bf16.mxu0 %v5096_v1 }
 0x72c   :  { %3780 = vmatpush1.bf16.msra.mxu1 %v4976_v15  ;;  %3812 = vmatpush1.bf16.msra.mxu0 %v5103_v2 }
 0x72d   :  { %3782 = vmatprep.subr.bf16.mxu1 %v4979_v18  ;;  %3814 = vmatprep.subr.bf16.mxu0 %v5106_v11 }
 0x730   :  { %3784 = vmatpush1.bf16.msra.mxu1 %v4982_v26  ;;  %3816 = vmatpush1.bf16.msra.mxu0 %v5111_v16 }
 0x731   :  { %3786 = vmatprep.subr.bf16.mxu1 %v4985_v29  ;;  %3818 = vmatprep.subr.bf16.mxu0 %v5115_v28 }
 0x734   :  { %3788 = vmatpush1.bf16.msra.mxu1 %v4988_v35  ;;  %3820 = vmatpush1.bf16.msra.mxu0 %v5118_v62 }
 0x735   :  { %3790 = vmatprep.subr.bf16.mxu1 %v4992_v17  ;;  %3822 = vmatprep.subr.bf16.mxu0 %v5121_v34 }
 0x738   :  { %3792 = vmatpush1.bf16.msra.mxu1 %v4995_v27  ;;  %3824 = vmatpush1.bf16.msra.mxu0 %v5124_v7 }
 0x739   :  { %3794 = vmatprep.subr.bf16.mxu1 %v4998_v32  ;;  %3826 = vmatprep.subr.bf16.mxu0 %v5127_v9 }
 0x73c   :  { %3796 = vmatpush1.bf16.msra.mxu1 %v5001_v40  ;;  %3828 = vmatpush1.bf16.msra.mxu0 %v5130_v21 }
 0x73d   :  { %3830 = vmatprep.subr.bf16.mxu1 %v4956_v38  ;;  %3862 = vmatprep.subr.bf16.mxu0 %v5071_v13 }
 0x7f2   :  { %v1690_v60 = vpop.f32.mrb[10].mxu1  ;;  %v1761_v31 = vpop.f32.mrb[34].mxu0 }
 0x7f3   :  { %v1770_v39 = vrot.slane %v1690_v60, 4  ;;  %v1692_v30 = vpop.f32.mrb[11].mxu1  ;;  %v1763_v56 = vpop.f32.mrb[35].mxu0  ;;  %v1772_v38 = vrot.slane %v1761_v31, 4 }
 0x7f4   :  { %v1771_v61 = vrot.slane %v1692_v30, 4  ;;  %v1773_v49 = vrot.slane %v1763_v56, 4  ;;  %v2171_v56 = vld [vmem:[%s5625_s8] sm:$0xff] }
 0x7f5   :  { %v1778_v19 = vadd.f32 %v1770_v39, %v5162_v55  ;;  %v1780_v13 = vadd.f32 %v1772_v38, %v5182_v0 }
 0x7f6   :  { %v1779_v25 = vadd.f32 %v1771_v61, %v5164_v23  ;;  %v1781_v3 = vadd.f32 %v1773_v49, %v5184_v47  ;;  %v2173_v61 = vld [vmem:[%s5625_s8 + $0x10] sm:$0x3]  ;;  %v2278_v49 = vld [vmem:[#allocation7 + $0x38] sm:$0xff] }
 0x7f7   :  { %v3202_v20 = vmul.f32 -1.442695, %v1778_v19  ;;  %v2271_v19 = vld [vmem:[#allocation7] sm:$0xff]  ;;  %v3896_v38 = vpack.c.bf16 %v2173_v61, %v2171_v56  ;;  %v2310_v56 = vld [vmem:[#allocation7 + $0x138] sm:$0xff] }
 0x7f8   :  { %v3203_v45 = vmul.f32 -1.442695, %v1779_v25  ;;  %v3204_v50 = vmul.f32 -1.442695, %v1781_v3  ;;  %v2273_v25 = vld [vmem:[#allocation7 + $0x10] sm:$0xff] }
 0x7f9   :  { %4322 = vpow2.f32 %v3202_v20 }
 0x7fa   :  { %4324 = vpow2.f32 %v3203_v45  ;;  %v2276_v45 = vld [vmem:[#allocation7 + $0x28] sm:$0xff] }
 0x7fb   :  { %4326 = vpow2.f32 %v3204_v50 }
 0x7fc   :  { %4328 = vtanh.f32 %v1780_v13  ;;  %v3901_v13 = vpack.c.bf16 %v2273_v25, %v2271_v19  ;;  %v2307_v25 = vld [vmem:[#allocation7 + $0x120] sm:$0xff] }
 0x803   :  { %v4323_v8 = vpop.eup %4322 }
 0x804   :  { %v4325_v6 = vpop.eup %4324  ;;  %v1785_v52 = vadd.f32 1.0, %v4323_v8  ;;  %v3903_v8 = vpack.c.bf16 %v2278_v49, %v2276_v45  ;;  %v2312_v45 = vld [vmem:[#allocation7 + $0x148] sm:$0xff]  ;;  %v2314_v49 = vld [vmem:[#allocation7 + $0x158] sm:$0xff] }
 0x805   :  { %v1791_v10 = vadd.f32 1.0, %v4325_v6  ;;  %v4327_v55 = vpop.eup %4326  ;;  %v2275_v6 = vld [vmem:[#allocation7 + $0x20] sm:$0xff] }
 0x806   :  { %4330 = vrcp.f32 %v1785_v52  ;;  %v4329_v23 = vpop.eup %4328  ;;  %v1798_v47 = vadd.f32 1.0, %v4327_v55  ;;  %v2277_v52 = vld [vmem:[#allocation7 + $0x30] sm:$0xff]  ;;  %v2282_v55 = vld [vmem:[#allocation7 + $0x58] sm:$0xff] }
 0x807   :  { %4332 = vrcp.f32 %v1791_v10  ;;  %v2280_v10 = vld [vmem:[#allocation7 + $0x48] sm:$0xff] }
 0x808   :  { %4334 = vrcp.f32 %v1798_v47  ;;  %v2284_v47 = vld [vmem:[#allocation7 + $0x68] sm:$0xff] }
 0x810   :  { %v4331_v42 = vpop.eup %4330 }
 0x811   :  { %v4333_v46 = vpop.eup %4332  ;;  %v1805_v41 = vmul.f32 %v4331_v42, %v4329_v23  ;;  %v2170_v23 = vld [vmem:[%s5681_s20] sm:$0xf]  ;;  %v3905_v42 = vpack.c.bf16 %v2277_v52, %v2275_v6 }
 0x812   :  { %v1804_v4 = vmul.f32 %v4333_v46, %v1802_v12  ;;  %v4335_v0 = vpop.eup %4334  ;;  %v3907_v12 = vpack.c.bf16 %v2282_v55, %v2280_v10  ;;  %v2279_v46 = vld [vmem:[#allocation7 + $0x40] sm:$0xff]  ;;  %v2318_v6 = vld [vmem:[#allocation7 + $0x178] sm:$0xff] }
 0x813   :  { %v2315_v55 = vld [vmem:[#allocation7 + $0x160] sm:$0xff] }
 0x814   :  { %v5406_v59 = vadd.f32 %v1805_v41, %v1804_v4  ;;  %v2281_v41 = vld [vmem:[#allocation7 + $0x50] sm:$0xff]  ;;  %v2286_v4 = vld [vmem:[#allocation7 + $0x78] sm:$0xff] }
 0x816   :  { %4336 = vtanh.f32 %v5406_v59 }
 0x820   :  { %v4337_v54 = vpop.eup %4336 }
 0x821   :  { %v1808_v33 = vmul.f32 %v4337_v54, %v4335_v0  ;;  %v3911_v0 = vpack.c.bf16 %v2286_v4, %v2284_v47  ;;  %v2283_v54 = vld [vmem:[#allocation7 + $0x60] sm:$0xff]  ;;  %v2321_v4 = vld [vmem:[#allocation7 + $0x190] sm:$0xff] }
 0x822   :  { %v2319_v47 = vld [vmem:[#allocation7 + $0x180] sm:$0xff] }
 0x823   :  { %v1810_v60 = vrot.slane %v1808_v33, 4  ;;  %v2285_v33 = vld [vmem:[#allocation7 + $0x70] sm:$0xff] }
 0x825   :  { %1877 = vmatmul.mubr.f32.vlgmr.msra.gmra.mrb[12].mxu1 %v1810_v60  ;;  %1948 = vmatmul.mubr.f32.vlgmr.msra.gmra.mrb[36].mxu0 %v1810_v60  ;;  %v2288_v60 = vld [vmem:[#allocation7 + $0x88] sm:$0xff] }
 0x826   :  { %3832 = vmatpush1.bf16.msra.mxu1 %v4958_v43  ;;  %3864 = vmatpush1.bf16.msra.mxu0 %v5073_v22  ;;  %v2172_v43 = vld [vmem:[%s5625_s8 + $0x8] sm:$0xff] }
 0x827   :  { %3834 = vmatprep.subr.bf16.mxu1 %v4962_v48  ;;  %3866 = vmatprep.subr.bf16.mxu0 %v5076_v24  ;;  %v2174_v48 = vld [vmem:[%s5625_s8 + $0x18] sm:$0x3]  ;;  %v5679_v24 = vld [vmem:[#allocation29_spill] sm:$0xff] }
 0x828   :  { %2049 = vmatprep.mubr.f32.mxu1 %v5675_v44  ;;  %2120 = vmatprep.mubr.f32.mxu0 %v5675_v44 }
 0x82a   :  { %3836 = vmatpush1.bf16.msra.mxu1 %v4964_v53  ;;  %3868 = vmatpush1.bf16.msra.mxu0 %v5083_v36  ;;  %v3893_v53 = vpack.c.bf16 %v2174_v48, %v2172_v43  ;;  %v2290_v43 = vld [vmem:[#allocation7 + $0x98] sm:$0xff]  ;;  %v3913_v48 = vpack.c.bf16 %v2285_v33, %v2283_v54  ;;  %v3949_v54 = vpack.c.bf16 %v2321_v4, %v2319_v47 }
 0x82b   :  { %3838 = vmatprep.subr.bf16.mxu1 %v4967_v58  ;;  %3870 = vmatprep.subr.bf16.mxu0 %v5086_v37  ;;  %v2287_v58 = vld [vmem:[#allocation7 + $0x80] sm:$0xff] }
 0x82e   :  { %3840 = vmatpush1.bf16.msra.mxu1 %v4970_v63  ;;  %3872 = vmatpush1.bf16.msra.mxu0 %v5093_v51  ;;  %v2272_v63 = vld [vmem:[#allocation7 + $0x8] sm:$0xff]  ;;  %v5680_v51 = vld [vmem:[#allocation28_spill] sm:$0xff] }
 0x82f   :  { %3842 = vmatprep.subr.bf16.mxu1 %v4973_v5  ;;  %3874 = vmatprep.subr.bf16.mxu0 %v5096_v1  ;;  %v2274_v5 = vld [vmem:[#allocation7 + $0x18] sm:$0xff] }
 0x832   :  { %3844 = vmatpush1.bf16.msra.mxu1 %v4976_v15  ;;  %3876 = vmatpush1.bf16.msra.mxu0 %v5103_v2  ;;  %v3899_v15 = vpack.c.bf16 %v2274_v5, %v2272_v63  ;;  %v2289_v63 = vld [vmem:[#allocation7 + $0x90] sm:$0xff]  ;;  %v2292_v5 = vld [vmem:[#allocation7 + $0xa8] sm:$0xff] }
 0x833   :  { %3846 = vmatprep.subr.bf16.mxu1 %v4979_v18  ;;  %3878 = vmatprep.subr.bf16.mxu0 %v5106_v11 }
 0x836   :  { %3848 = vmatpush1.bf16.msra.mxu1 %v4982_v26  ;;  %3880 = vmatpush1.bf16.msra.mxu0 %v5111_v16 }
 0x837   :  { %3850 = vmatprep.subr.bf16.mxu1 %v4985_v29  ;;  %3882 = vmatprep.subr.bf16.mxu0 %v5115_v28 }
 0x83a   :  { %3852 = vmatpush1.bf16.msra.mxu1 %v4988_v35  ;;  %3884 = vmatpush1.bf16.msra.mxu0 %v5118_v62 }
 0x83b   :  { %3854 = vmatprep.subr.bf16.mxu1 %v4992_v17  ;;  %3886 = vmatprep.subr.bf16.mxu0 %v5121_v34 }
 0x83e   :  { %3856 = vmatpush1.bf16.msra.mxu1 %v4995_v27  ;;  %3888 = vmatpush1.bf16.msra.mxu0 %v5124_v7  ;;  %v5678_v27 = vld [vmem:[#allocation27_spill] sm:$0xff] }
 0x83f   :  { %3858 = vmatprep.subr.bf16.mxu1 %v4998_v32  ;;  %3890 = vmatprep.subr.bf16.mxu0 %v5127_v9  ;;  %v1978_v9 = vrot.slane %v5406_v59, 4  ;;  %v3909_v59 = vpack.c.bf16 %v2281_v41, %v2279_v46 }
 0x842   :  { %3860 = vmatpush1.bf16.msra.mxu1 %v5001_v40  ;;  %3892 = vmatpush1.bf16.msra.mxu0 %v5130_v21 }
 0x843   :  { %3895 = vmatprep.subr.msk.bf16.mxu1 %vm5447_vm3, %v3893_v53  ;;  %3900 = vmatprep.subr.bf16.mxu0 %v3899_v15  ;;  %v3915_v53 = vpack.c.bf16 %v2290_v43, %v2288_v60  ;;  %v2294_v15 = vld [vmem:[#allocation7 + $0xb8] sm:$0xff]  ;;  %v2323_v60 = vld [vmem:[#allocation7 + $0x1a0] sm:$0xff]  ;;  %v2325_v43 = vld [vmem:[#allocation7 + $0x1b0] sm:$0xff] }
 0x8f8   :  { %v1878_v18 = vpop.f32.mrb[12].mxu1  ;;  %v1949_v26 = vpop.f32.mrb[36].mxu0 }
 0x8f9   :  { %v1954_v29 = vadd.f32 %v1878_v18, %v5166_v57  ;;  %v1880_v35 = vpop.f32.mrb[13].mxu1  ;;  %v1951_v17 = vpop.f32.mrb[37].mxu0  ;;  %v1956_v1 = vadd.f32 %v1949_v26, %v5680_v51  ;;  %v3917_v18 = vpack.c.bf16 %v2289_v63, %v2287_v58  ;;  %v3919_v26 = vpack.c.bf16 %v2294_v15, %v2292_v5  ;;  %v2330_v58 = vld [vmem:[#allocation7 + $0x1d8] sm:$0xff]  ;;  %v2327_v5 = vld [vmem:[#allocation7 + $0x1c0] sm:$0xff]  ;;  %v2329_v15 = vld [vmem:[#allocation7 + $0x1d0] sm:$0xff] }
 0x8fa   :  { %v1955_v32 = vadd.f32 %v1880_v35, %v5678_v27  ;;  %v1957_v36 = vadd.f32 %v1951_v17, %v5679_v24  ;;  %v2293_v35 = vld [vmem:[#allocation7 + $0xb0] sm:$0xff]  ;;  %v2296_v17 = vld [vmem:[#allocation7 + $0xc8] sm:$0xff] }
 0x8fb   :  { %v3205_v40 = vmul.f32 -1.442695, %v1954_v29  ;;  %v2291_v29 = vld [vmem:[#allocation7 + $0xa0] sm:$0xff] }
 0x8fc   :  { %v3206_v22 = vmul.f32 -1.442695, %v1955_v32  ;;  %v3207_v37 = vmul.f32 -1.442695, %v1957_v36  ;;  %v2298_v32 = vld [vmem:[#allocation7 + $0xd8] sm:$0xff]  ;;  %v2295_v36 = vld [vmem:[#allocation7 + $0xc0] sm:$0xff] }
 0x8fd   :  { %4338 = vpow2.f32 %v3205_v40  ;;  %v3921_v40 = vpack.c.bf16 %v2293_v35, %v2291_v29  ;;  %v2334_v29 = vld [vmem:[#allocation7 + $0x1f8] sm:$0xff] }
 0x8fe   :  { %4340 = vpow2.f32 %v3206_v22  ;;  %v3923_v22 = vpack.c.bf16 %v2298_v32, %v2296_v17  ;;  %v2331_v17 = vld [vmem:[#allocation7 + $0x1e0] sm:$0xff]  ;;  %v2333_v32 = vld [vmem:[#allocation7 + $0x1f0] sm:$0xff] }
 0x8ff   :  { %4342 = vpow2.f32 %v3207_v37  ;;  %v2297_v37 = vld [vmem:[#allocation7 + $0xd0] sm:$0xff] }
 0x900   :  { %4344 = vtanh.f32 %v1956_v1  ;;  %v2300_v1 = vld [vmem:[#allocation7 + $0xe8] sm:$0xff] }
 0x907   :  { %v4339_v2 = vpop.eup %4338 }
 0x908   :  { %v4341_v11 = vpop.eup %4340  ;;  %v1961_v16 = vadd.f32 1.0, %v4339_v2  ;;  %v2302_v2 = vld [vmem:[#allocation7 + $0xf8] sm:$0xff] }
 0x909   :  { %v1967_v28 = vadd.f32 1.0, %v4341_v11  ;;  %v4343_v62 = vpop.eup %4342  ;;  %v3925_v11 = vpack.c.bf16 %v2297_v37, %v2295_v36  ;;  %v2423_v36 = vld [vmem:[#allocation10 + $0x18] sm:$0xff]  ;;  %v2420_v37 = vld [vmem:[#allocation10] sm:$0xff] }
 0x90a   :  { %4346 = vrcp.f32 %v1961_v16  ;;  %v4345_v34 = vpop.eup %4344  ;;  %v1974_v31 = vadd.f32 1.0, %v4343_v62  ;;  %v3927_v16 = vpack.c.bf16 %v2302_v2, %v2300_v1  ;;  %v2301_v62 = vld [vmem:[#allocation7 + $0xf0] sm:$0xff] }
 0x90b   :  { %4348 = vrcp.f32 %v1967_v28  ;;  %v2299_v28 = vld [vmem:[#allocation7 + $0xe0] sm:$0xff]  ;;  %v2422_v2 = vld [vmem:[#allocation10 + $0x10] sm:$0xff] }
 0x90c   :  { %4350 = vrcp.f32 %v1974_v31  ;;  %v2305_v31 = vld [vmem:[#allocation7 + $0x110] sm:$0xff] }
 0x914   :  { %v4347_v7 = vpop.eup %4346 }
 0x915   :  { %v4349_v21 = vpop.eup %4348  ;;  %v1981_v14 = vmul.f32 %v4347_v7, %v4345_v34  ;;  %v2304_v34 = vld [vmem:[#allocation7 + $0x108] sm:$0xff]  ;;  %v2306_v7 = vld [vmem:[#allocation7 + $0x118] sm:$0xff] }
 0x916   :  { %v1980_v39 = vmul.f32 %v4349_v21, %v1978_v9  ;;  %v4351_v20 = vpop.eup %4350  ;;  %v3929_v9 = vpack.c.bf16 %v2301_v62, %v2299_v28  ;;  %v3931_v21 = vpack.c.bf16 %v2306_v7, %v2304_v34  ;;  %v3965_v28 = vpack.c.bf16 %v2422_v2, %v2420_v37  ;;  %v2424_v34 = vld [vmem:[#allocation10 + $0x20] sm:$0xff]  ;;  %v2426_v7 = vld [vmem:[#allocation10 + $0x30] sm:$0xff]  ;;  %v2463_v37 = vld [vmem:[#allocation10 + $0x158] sm:$0xff] }
 0x918   :  { %v5458_v30 = vadd.f32 %v1981_v14, %v1980_v39  ;;  %v2303_v14 = vld [vmem:[#allocation7 + $0x100] sm:$0xff]  ;;  %v2308_v39 = vld [vmem:[#allocation7 + $0x128] sm:$0xff] }
 0x919   :  { %v3933_v61 = vpack.c.bf16 %v2305_v31, %v2303_v14  ;;  %v3935_v19 = vpack.c.bf16 %v2310_v56, %v2308_v39  ;;  %v3969_v14 = vpack.c.bf16 %v2426_v7, %v2424_v34  ;;  %v2428_v39 = vld [vmem:[#allocation10 + $0x40] sm:$0xff]  ;;  %v2430_v56 = vld [vmem:[#allocation10 + $0x50] sm:$0xff] }
 0x91a   :  { %4352 = vtanh.f32 %v5458_v30 }
 0x924   :  { %v4353_v3 = vpop.eup %4352 }
 0x925   :  { %v1984_v50 = vmul.f32 %v4353_v3, %v4351_v20  ;;  %v2309_v20 = vld [vmem:[#allocation7 + $0x130] sm:$0xff] }
 0x926   :  { %v3937_v3 = vpack.c.bf16 %v2309_v20, %v2307_v25  ;;  %v3973_v25 = vpack.c.bf16 %v2430_v56, %v2428_v39 }
 0x927   :  { %2050 = vmatmul.mubr.f32.vlgmr.msra.gmra.mrb[14].mxu1 %v1984_v50  ;;  %2121 = vmatmul.mubr.f32.vlgmr.msra.gmra.mrb[38].mxu0 %v1984_v50  ;;  %v2311_v50 = vld [vmem:[#allocation7 + $0x140] sm:$0xff] }
 0x928   :  { %3898 = vmatpush1.bf16.msk.msra.mxu1 %vm5447_vm3, %v3896_v38  ;;  %2262 = vmatprep.mubr.f32.mxu1 %v5675_v44  ;;  %v3939_v38 = vpack.c.bf16 %v2314_v49, %v2312_v45  ;;  %v2432_v45 = vld [vmem:[#allocation10 + $0x60] sm:$0xff]  ;;  %v2434_v49 = vld [vmem:[#allocation10 + $0x70] sm:$0xff] }
 0x929   :  { %3902 = vmatpush1.bf16.msra.mxu0 %v3901_v13  ;;  %v2313_v13 = vld [vmem:[#allocation7 + $0x150] sm:$0xff] }
 0x92a   :  { %3904 = vmatprep.subr.bf16.mxu0 %v3903_v8  ;;  %v2316_v8 = vld [vmem:[#allocation7 + $0x168] sm:$0xff]  ;;  %v3941_v52 = vpack.c.bf16 %v2313_v13, %v2311_v50  ;;  %v3977_v50 = vpack.c.bf16 %v2434_v49, %v2432_v45 }
 0x92b   :  { %3213 = vmatmul.mubr.msk.f32.vlgmr.msra.gmra.mrb[16].mxu1 %vm2187_vm4, %v2170_v23  ;;  %v3943_v10 = vpack.c.bf16 %v2318_v6, %v2316_v8  ;;  %v2317_v23 = vld [vmem:[#allocation7 + $0x170] sm:$0xff]  ;;  %v2436_v8 = vld [vmem:[#allocation10 + $0x80] sm:$0xff] }
 0x92c   :  { %v3945_v46 = vpack.c.bf16 %v2317_v23, %v2315_v55  ;;  %v2438_v6 = vld [vmem:[#allocation10 + $0x90] sm:$0xff] }
 0x92d   :  { %3906 = vmatpush1.bf16.msra.mxu0 %v3905_v42  ;;  %v2320_v42 = vld [vmem:[#allocation7 + $0x188] sm:$0xff]  ;;  %v3981_v55 = vpack.c.bf16 %v2438_v6, %v2436_v8 }
 0x92e   :  { %3908 = vmatprep.subr.bf16.mxu0 %v3907_v12  ;;  %v2322_v12 = vld [vmem:[#allocation7 + $0x198] sm:$0xff] }
 0x92f   :  { %v3947_v41 = vpack.c.bf16 %v2322_v12, %v2320_v42  ;;  %v2440_v42 = vld [vmem:[#allocation10 + $0xa0] sm:$0xff]  ;;  %v2442_v12 = vld [vmem:[#allocation10 + $0xb0] sm:$0xff] }
 0x930   :  { %v3985_v47 = vpack.c.bf16 %v2442_v12, %v2440_v42 }
 0x931   :  { %3910 = vmatpush1.bf16.msra.mxu0 %v3909_v59  ;;  %v2324_v59 = vld [vmem:[#allocation7 + $0x1a8] sm:$0xff] }
 0x932   :  { %3912 = vmatprep.subr.bf16.mxu0 %v3911_v0  ;;  %v2326_v0 = vld [vmem:[#allocation7 + $0x1b8] sm:$0xff] }
 0x933   :  { %v3951_v33 = vpack.c.bf16 %v2326_v0, %v2324_v59  ;;  %v2444_v59 = vld [vmem:[#allocation10 + $0xc0] sm:$0xff]  ;;  %v2446_v0 = vld [vmem:[#allocation10 + $0xd0] sm:$0xff] }
 0x935   :  { %3914 = vmatpush1.bf16.msra.mxu0 %v3913_v48  ;;  %v3953_v48 = vpack.c.bf16 %v2325_v43, %v2323_v60  ;;  %v3989_v60 = vpack.c.bf16 %v2446_v0, %v2444_v59 }
 0x936   :  { %3916 = vmatprep.subr.bf16.mxu0 %v3915_v53  ;;  %v2328_v53 = vld [vmem:[#allocation7 + $0x1c8] sm:$0xff] }
 0x937   :  { %v3955_v63 = vpack.c.bf16 %v2330_v58, %v2328_v53  ;;  %v2450_v53 = vld [vmem:[#allocation10 + $0xf0] sm:$0xff]  ;;  %v2453_v58 = vld [vmem:[#allocation10 + $0x108] sm:$0xff] }
 0x939   :  { %3918 = vmatpush1.bf16.msra.mxu0 %v3917_v18  ;;  %v3957_v18 = vpack.c.bf16 %v2329_v15, %v2327_v5 }
 0x93a   :  { %3920 = vmatprep.subr.bf16.mxu0 %v3919_v26  ;;  %v2332_v26 = vld [vmem:[#allocation7 + $0x1e8] sm:$0xff] }
 0x93b   :  { %v3959_v35 = vpack.c.bf16 %v2334_v29, %v2332_v26  ;;  %v2454_v26 = vld [vmem:[#allocation10 + $0x110] sm:$0xff]  ;;  %v2457_v29 = vld [vmem:[#allocation10 + $0x128] sm:$0xff] }
 0x93d   :  { %3922 = vmatpush1.bf16.msra.mxu0 %v3921_v40  ;;  %v3961_v40 = vpack.c.bf16 %v2333_v32, %v2331_v17 }
 0x93e   :  { %3924 = vmatprep.subr.bf16.mxu0 %v3923_v22  ;;  %v2421_v22 = vld [vmem:[#allocation10 + $0x8] sm:$0xff] }
 0x93f   :  { %v3963_v1 = vpack.c.bf16 %v2423_v36, %v2421_v22  ;;  %v2458_v22 = vld [vmem:[#allocation10 + $0x130] sm:$0xff]  ;;  %v2461_v36 = vld [vmem:[#allocation10 + $0x148] sm:$0xff] }
 0x940   :  { %v4003_v2 = vpack.c.bf16 %v2463_v37, %v2461_v36 }
 0x941   :  { %3926 = vmatpush1.bf16.msra.mxu0 %v3925_v11  ;;  %v2425_v11 = vld [vmem:[#allocation10 + $0x28] sm:$0xff]  ;;  %3964 = vmatprep.subr.bf16.mxu1 %v3963_v1 }
 0x942   :  { %3928 = vmatprep.subr.bf16.mxu0 %v3927_v16  ;;  %v2427_v16 = vld [vmem:[#allocation10 + $0x38] sm:$0xff]  ;;  %3966 = vmatpush1.bf16.msra.mxu1 %v3965_v28  ;;  %v2465_v28 = vld [vmem:[#allocation10 + $0x168] sm:$0xff] }
 0x943   :  { %v3967_v62 = vpack.c.bf16 %v2427_v16, %v2425_v11  ;;  %v2460_v11 = vld [vmem:[#allocation10 + $0x140] sm:$0xff]  ;;  %v2462_v16 = vld [vmem:[#allocation10 + $0x150] sm:$0xff] }
 0x944   :  { %v4005_v34 = vpack.c.bf16 %v2462_v16, %v2460_v11 }
 0x945   :  { %3930 = vmatpush1.bf16.msra.mxu0 %v3929_v9  ;;  %v2429_v9 = vld [vmem:[#allocation10 + $0x48] sm:$0xff]  ;;  %3968 = vmatprep.subr.bf16.mxu1 %v3967_v62  ;;  %v2467_v62 = vld [vmem:[#allocation10 + $0x178] sm:$0xff] }
 0x946   :  { %3932 = vmatprep.subr.bf16.mxu0 %v3931_v21  ;;  %v2431_v21 = vld [vmem:[#allocation10 + $0x58] sm:$0xff]  ;;  %3970 = vmatpush1.bf16.msra.mxu1 %v3969_v14  ;;  %v4007_v7 = vpack.c.bf16 %v2467_v62, %v2465_v28  ;;  %v2469_v14 = vld [vmem:[#allocation10 + $0x188] sm:$0xff] }
 0x947   :  { %v3971_v31 = vpack.c.bf16 %v2431_v21, %v2429_v9  ;;  %v2464_v9 = vld [vmem:[#allocation10 + $0x160] sm:$0xff]  ;;  %v2466_v21 = vld [vmem:[#allocation10 + $0x170] sm:$0xff] }
 0x948   :  { %v4009_v39 = vpack.c.bf16 %v2466_v21, %v2464_v9  ;;  %v2481_v21 = vld [vmem:[#allocation10 + $0x1e8] sm:$0xff] }
 0x949   :  { %3934 = vmatpush1.bf16.msra.mxu0 %v3933_v61  ;;  %v2433_v61 = vld [vmem:[#allocation10 + $0x68] sm:$0xff]  ;;  %3972 = vmatprep.subr.bf16.mxu1 %v3971_v31  ;;  %v2471_v31 = vld [vmem:[#allocation10 + $0x198] sm:$0xff] }
 0x94a   :  { %3936 = vmatprep.subr.bf16.mxu0 %v3935_v19  ;;  %v2435_v19 = vld [vmem:[#allocation10 + $0x78] sm:$0xff]  ;;  %3974 = vmatpush1.bf16.msra.mxu1 %v3973_v25  ;;  %v4011_v56 = vpack.c.bf16 %v2471_v31, %v2469_v14  ;;  %v2473_v25 = vld [vmem:[#allocation10 + $0x1a8] sm:$0xff] }
 0x94b   :  { %v3975_v20 = vpack.c.bf16 %v2435_v19, %v2433_v61  ;;  %v2468_v61 = vld [vmem:[#allocation10 + $0x180] sm:$0xff]  ;;  %v2470_v19 = vld [vmem:[#allocation10 + $0x190] sm:$0xff]  ;;  %v2483_v14 = vld [vmem:[#allocation10 + $0x1f8] sm:$0xff] }
 0x94c   :  { %v4013_v45 = vpack.c.bf16 %v2470_v19, %v2468_v61  ;;  %v4023_v31 = vpack.c.bf16 %v2483_v14, %v2481_v21  ;;  %v2571_v61 = vld [vmem:[%s5631_s14 + $0x8] sm:$0x3f]  ;;  %v2570_v19 = vld [vmem:[%s5631_s14] sm:$0x3f] }
 0x94d   :  { %3938 = vmatpush1.bf16.msra.mxu0 %v3937_v3  ;;  %v2437_v3 = vld [vmem:[#allocation10 + $0x88] sm:$0xff]  ;;  %3976 = vmatprep.subr.bf16.mxu1 %v3975_v20  ;;  %v2475_v20 = vld [vmem:[#allocation10 + $0x1b8] sm:$0xff] }
 0x94e   :  { %3940 = vmatprep.subr.bf16.mxu0 %v3939_v38  ;;  %v2439_v38 = vld [vmem:[#allocation10 + $0x98] sm:$0xff]  ;;  %3978 = vmatpush1.bf16.msra.mxu1 %v3977_v50  ;;  %v4015_v49 = vpack.c.bf16 %v2475_v20, %v2473_v25  ;;  %v2477_v50 = vld [vmem:[#allocation10 + $0x1c8] sm:$0xff] }
 0x94f   :  { %v3979_v13 = vpack.c.bf16 %v2439_v38, %v2437_v3  ;;  %v2472_v3 = vld [vmem:[#allocation10 + $0x1a0] sm:$0xff]  ;;  %v2474_v38 = vld [vmem:[#allocation10 + $0x1b0] sm:$0xff]  ;;  %v2569_v25 = vld [vmem:[%s5684_s13] sm:$0xf] }
 0x950   :  { %v4017_v8 = vpack.c.bf16 %v2474_v38, %v2472_v3  ;;  %v2701_v20 = vld [vmem:[#allocation15 + $0x8] sm:$0xff]  ;;  %v2335_v3 = vld [vmem:[#allocation9] sm:$0x3] }
 0x951   :  { %3942 = vmatpush1.bf16.msra.mxu0 %v3941_v52  ;;  %v2441_v52 = vld [vmem:[#allocation10 + $0xa8] sm:$0xff]  ;;  %3980 = vmatprep.subr.bf16.mxu1 %v3979_v13  ;;  %v2479_v13 = vld [vmem:[#allocation10 + $0x1d8] sm:$0xff] }
 0x952   :  { %3944 = vmatprep.subr.bf16.mxu0 %v3943_v10  ;;  %v2443_v10 = vld [vmem:[#allocation10 + $0xb8] sm:$0xff]  ;;  %3982 = vmatpush1.bf16.msra.mxu1 %v3981_v55  ;;  %v4019_v6 = vpack.c.bf16 %v2479_v13, %v2477_v50 }
 0x953   :  { %v3983_v23 = vpack.c.bf16 %v2443_v10, %v2441_v52  ;;  %v2175_v52 = vld [vmem:[#allocation6] sm:$0x3] }
 0x954   :  { %v2731_v21 = vld [vmem:[#allocation15 + $0xf8] sm:$0xff] }
 0x955   :  { %3946 = vmatpush1.bf16.msra.mxu0 %v3945_v46  ;;  %v2445_v46 = vld [vmem:[#allocation10 + $0xc8] sm:$0xff]  ;;  %3984 = vmatprep.subr.bf16.mxu1 %v3983_v23 }
 0x956   :  { %3948 = vmatprep.subr.bf16.mxu0 %v3947_v41  ;;  %v2447_v41 = vld [vmem:[#allocation10 + $0xd8] sm:$0xff]  ;;  %3986 = vmatpush1.bf16.msra.mxu1 %v3985_v47 }
 0x957   :  { %v3987_v4 = vpack.c.bf16 %v2447_v41, %v2445_v46  ;;  %v5682_v46 = vld [vmem:[#allocation25_spill] sm:$0xff] }
 0x958   :  { %v2180_v41 = vrot.slane %v2175_v52, %v5682_v46  ;;  %v2340_v38 = vrot.slane %v2335_v3, %v5682_v46 }
 0x959   :  { %3950 = vmatpush1.bf16.msra.mxu0 %v3949_v54  ;;  %v2449_v54 = vld [vmem:[#allocation10 + $0xe8] sm:$0xff]  ;;  %3988 = vmatprep.subr.bf16.mxu1 %v3987_v4 }
 0x95a   :  { %3952 = vmatprep.subr.bf16.mxu0 %v3951_v33  ;;  %v2451_v33 = vld [vmem:[#allocation10 + $0xf8] sm:$0xff]  ;;  %3990 = vmatpush1.bf16.msra.mxu1 %v3989_v60  ;;  %v5683_v4 = vld [vmem:[#allocation26_spill] sm:$0xff] }
 0x95b   :  { %v3991_v43 = vpack.c.bf16 %v2451_v33, %v2449_v54  ;;  %v2184_v59 = vrot.slane %v2175_v52, %v5683_v4  ;;  %v2344_v50 = vrot.slane %v2335_v3, %v5683_v4  ;;  %v2700_v52 = vld [vmem:[#allocation15] sm:$0xff]  ;;  %v2739_v3 = vld [vmem:[#allocation15 + $0x138] sm:$0xff] }
 0x95d   :  { %3954 = vmatpush1.bf16.msra.mxu0 %v3953_v48  ;;  %v2448_v48 = vld [vmem:[#allocation10 + $0xe0] sm:$0xff]  ;;  %3992 = vmatprep.subr.bf16.mxu1 %v3991_v43 }
 0x95e   :  { %3956 = vmatprep.subr.bf16.mxu0 %v3955_v63  ;;  %v2455_v63 = vld [vmem:[#allocation10 + $0x118] sm:$0xff]  ;;  %v3993_v5 = vpack.c.bf16 %v2450_v53, %v2448_v48 }
 0x95f   :  { %v3995_v15 = vpack.c.bf16 %v2455_v63, %v2453_v58 }
 0x960   :  { %3994 = vmatpush1.bf16.msra.mxu1 %v3993_v5 }
 0x961   :  { %3958 = vmatpush1.bf16.msra.mxu0 %v3957_v18  ;;  %v2452_v18 = vld [vmem:[#allocation10 + $0x100] sm:$0xff]  ;;  %3996 = vmatprep.subr.bf16.mxu1 %v3995_v15 }
 0x962   :  { %3960 = vmatprep.subr.bf16.mxu0 %v3959_v35  ;;  %v2459_v35 = vld [vmem:[#allocation10 + $0x138] sm:$0xff]  ;;  %v3997_v17 = vpack.c.bf16 %v2454_v26, %v2452_v18 }
 0x963   :  { %v3999_v32 = vpack.c.bf16 %v2459_v35, %v2457_v29 }
 0x964   :  { %3998 = vmatpush1.bf16.msra.mxu1 %v3997_v17 }
 0x965   :  { %3962 = vmatpush1.bf16.msra.mxu0 %v3961_v40  ;;  %v2456_v40 = vld [vmem:[#allocation10 + $0x120] sm:$0xff]  ;;  %4000 = vmatprep.subr.bf16.mxu1 %v3999_v32 }
 0x966   :  { %v4001_v1 = vpack.c.bf16 %v2458_v22, %v2456_v40  ;;  %3214 = vmatprep.subr.msk.mxu0 %vm2588_vm5, %v2571_v61  ;;  %v2735_v61 = vld [vmem:[#allocation15 + $0x118] sm:$0xff] }
 0x968   :  { %4002 = vmatpush1.bf16.msra.mxu1 %v4001_v1 }
 0x969   :  { %4004 = vmatprep.subr.bf16.mxu1 %v4003_v2 }
 0x96c   :  { %4006 = vmatpush1.bf16.msra.mxu1 %v4005_v34  ;;  %v2476_v34 = vld [vmem:[#allocation10 + $0x1c0] sm:$0xff] }
 0x96d   :  { %4008 = vmatprep.subr.bf16.mxu1 %v4007_v7  ;;  %v2478_v7 = vld [vmem:[#allocation10 + $0x1d0] sm:$0xff] }
 0x96e   :  { %v4021_v9 = vpack.c.bf16 %v2478_v7, %v2476_v34  ;;  %v2724_v34 = vld [vmem:[#allocation15 + $0xc0] sm:$0xff]  ;;  %v2726_v7 = vld [vmem:[#allocation15 + $0xd0] sm:$0xff] }
 0x96f   :  { %v4053_v14 = vpack.c.bf16 %v2726_v7, %v2724_v34 }
 0x970   :  { %4010 = vmatpush1.bf16.msra.mxu1 %v4009_v39  ;;  %v2480_v39 = vld [vmem:[#allocation10 + $0x1e0] sm:$0xff] }
 0x971   :  { %4012 = vmatprep.subr.bf16.mxu1 %v4011_v56 }
 0x974   :  { %4014 = vmatpush1.bf16.msra.mxu1 %v4013_v45  ;;  %v2703_v45 = vld [vmem:[#allocation15 + $0x18] sm:$0xff] }
 0x975   :  { %4016 = vmatprep.subr.bf16.mxu1 %v4015_v49  ;;  %v4027_v49 = vpack.c.bf16 %v2703_v45, %v2701_v20  ;;  %v2732_v20 = vld [vmem:[#allocation15 + $0x100] sm:$0xff]  ;;  %v2734_v45 = vld [vmem:[#allocation15 + $0x110] sm:$0xff] }
 0x978   :  { %4018 = vmatpush1.bf16.msra.mxu1 %v4017_v8 }
 0x979   :  { %4020 = vmatprep.subr.bf16.mxu1 %v4019_v6 }
 0x97c   :  { %4022 = vmatpush1.bf16.msra.mxu1 %v4021_v9  ;;  %v2729_v9 = vld [vmem:[#allocation15 + $0xe8] sm:$0xff] }
 0x97d   :  { %4024 = vmatprep.subr.bf16.mxu1 %v4023_v31  ;;  %v4055_v31 = vpack.c.bf16 %v2731_v21, %v2729_v9  ;;  %v3078_v9 = vld [vmem:[#allocation18 + $0x80] sm:$0xff]  ;;  %v3079_v21 = vld [vmem:[#allocation18 + $0x88] sm:$0xff] }
 0x9fa   :  { %v2051_v10 = vpop.f32.mrb[14].mxu1  ;;  %v2122_v55 = vpop.f32.mrb[38].mxu0 }
 0x9fb   :  { %v2131_v23 = vrot.slane %v2051_v10, 4  ;;  %v2053_v42 = vpop.f32.mrb[15].mxu1  ;;  %v2124_v12 = vpop.f32.mrb[39].mxu0  ;;  %v2133_v26 = vrot.slane %v2122_v55, 4  ;;  %v2702_v10 = vld [vmem:[#allocation15 + $0x10] sm:$0xff] }
 0x9fc   :  { %v2132_v47 = vrot.slane %v2053_v42, 4  ;;  %v2134_v58 = vrot.slane %v2124_v12, 4  ;;  %v2707_v42 = vld [vmem:[#allocation15 + $0x38] sm:$0xff] }
 0x9fd   :  { %v2139_v0 = vadd.f32 %v2131_v23, %v5166_v57  ;;  %v2705_v23 = vld [vmem:[#allocation15 + $0x28] sm:$0xff] }
 0x9fe   :  { %v2140_v54 = vadd.f32 %v2132_v47, %v5678_v27  ;;  %v2264_v33 = vpop.f32.mrb[16].mxu1  ;;  %v2142_v18 = vadd.f32 %v2134_v58, %v5679_v24  ;;  %v2141_v27 = vadd.f32 %v2133_v26, %v5680_v51  ;;  %v2163_v24 = vrot.slane %v5458_v30, 4  ;;  %v2482_v30 = vld [vmem:[#allocation10 + $0x1f0] sm:$0xff]  ;;  %v2712_v26 = vld [vmem:[#allocation15 + $0x60] sm:$0xff] }
 0x9ff   :  { %v3208_v60 = vmul.f32 -1.442695, %v2139_v0  ;;  %v2265_v43 = vadd.f32 %v2264_v33, %v2180_v41  ;;  %v2266_v48 = vpop.f32.mrb[17].mxu1  ;;  %v4025_v56 = vpack.c.bf16 %v2482_v30, %v2480_v39  ;;  %v4029_v41 = vpack.c.bf16 %v2702_v10, %v2700_v52  ;;  %v2704_v0 = vld [vmem:[#allocation15 + $0x20] sm:$0xff]  ;;  %v2709_v33 = vld [vmem:[#allocation15 + $0x48] sm:$0xff]  ;;  %v2710_v58 = vld [vmem:[#allocation15 + $0x50] sm:$0xff] }
 0xa00   :  { %v3209_v53 = vmul.f32 -1.442695, %v2140_v54  ;;  %v2267_v63 = vadd.f32 %v2266_v48, %v2184_v59  ;;  %v3210_v57 = vmul.f32 -1.442695, %v2142_v18  ;;  %v4031_v59 = vpack.c.bf16 %v2707_v42, %v2705_v23  ;;  %v2706_v54 = vld [vmem:[#allocation15 + $0x30] sm:$0xff]  ;;  %v2728_v39 = vld [vmem:[#allocation15 + $0xe0] sm:$0xff] }
 0xa01   :  { %4354 = vpow2.f32 %v3208_v60  ;;  %v2269_v15 = vmax.f32 %v2265_v43, 0.0  ;;  %4026 = vmatpush1.bf16.msra.mxu1 %v4025_v56  ;;  %v2711_v60 = vld [vmem:[#allocation15 + $0x58] sm:$0xff]  ;;  %v4033_v43 = vpack.c.bf16 %v2706_v54, %v2704_v0  ;;  %v2730_v30 = vld [vmem:[#allocation15 + $0xf0] sm:$0xff]  ;;  %v2733_v56 = vld [vmem:[#allocation15 + $0x108] sm:$0xff] }
 0xa02   :  { %4356 = vpow2.f32 %v3209_v53  ;;  %v2270_v5 = vmax.f32 %v2267_v63, 0.0  ;;  %4028 = vmatprep.subr.bf16.mxu1 %v4027_v49  ;;  %v4035_v48 = vpack.c.bf16 %v2711_v60, %v2709_v33  ;;  %v2708_v53 = vld [vmem:[#allocation15 + $0x40] sm:$0xff]  ;;  %v2713_v63 = vld [vmem:[#allocation15 + $0x68] sm:$0xff]  ;;  %v2743_v52 = vld [vmem:[#allocation15 + $0x158] sm:$0xff] }
 0xa03   :  { %4358 = vpow2.f32 %v3210_v57  ;;  %v2714_v57 = vld [vmem:[#allocation15 + $0x70] sm:$0xff]  ;;  %v2737_v49 = vld [vmem:[#allocation15 + $0x128] sm:$0xff]  ;;  %v2740_v23 = vld [vmem:[#allocation15 + $0x140] sm:$0xff] }
 0xa04   :  { %2411 = vmatprep.mubr.f32.mxu0 %v2270_v5  ;;  %4360 = vtanh.f32 %v2141_v27  ;;  %v2715_v5 = vld [vmem:[#allocation15 + $0x78] sm:$0xff]  ;;  %v2717_v27 = vld [vmem:[#allocation15 + $0x88] sm:$0xff]  ;;  %v2742_v42 = vld [vmem:[#allocation15 + $0x150] sm:$0xff] }
 0xa05   :  { %2412 = vmatmul.mubr.f32.vlgmr.msra.gmra.mrb[40].mxu0 %v2269_v15  ;;  %v4037_v15 = vpack.c.bf16 %v2710_v58, %v2708_v53  ;;  %v4039_v18 = vpack.c.bf16 %v2715_v5, %v2713_v63  ;;  %v2744_v0 = vld [vmem:[#allocation15 + $0x160] sm:$0xff]  ;;  %v2746_v54 = vld [vmem:[#allocation15 + $0x170] sm:$0xff]  ;;  %v2749_v33 = vld [vmem:[#allocation15 + $0x188] sm:$0xff] }
 0xa06   :  { %2659 = vmatprep.mubr.f32.mxu0 %v5675_v44  ;;  %3215 = vmatpush1.msk.msra.mxu0 %vm2588_vm5, %v2570_v19  ;;  %v4057_v19 = vpack.c.bf16 %v2730_v30, %v2728_v39  ;;  %v2751_v60 = vld [vmem:[#allocation15 + $0x198] sm:$0xff]  ;;  %v2748_v53 = vld [vmem:[#allocation15 + $0x180] sm:$0xff]  ;;  %v2750_v58 = vld [vmem:[#allocation15 + $0x190] sm:$0xff] }
 0xa07   :  { %v2753_v63 = vld [vmem:[#allocation15 + $0x1a8] sm:$0xff]  ;;  %v2755_v5 = vld [vmem:[#allocation15 + $0x1b8] sm:$0xff]  ;;  %v3080_v30 = vld [vmem:[#allocation18 + $0x90] sm:$0xff] }
 0xa08   :  { %v3063_v39 = vld [vmem:[#allocation18 + $0x8] sm:$0xff] }
 0xa09   :  { %3216 = vmatmul.mubr.msk.f32.vlgmr.msra.gmra.mrb[42].mxu0 %vm2584_vm6, %v2569_v25  ;;  %v4059_v25 = vpack.c.bf16 %v2735_v61, %v2733_v56  ;;  %v3081_v56 = vld [vmem:[#allocation18 + $0x98] sm:$0xff] }
 0xa0b   :  { %v4355_v29 = vpop.eup %4354 }
 0xa0c   :  { %v4357_v35 = vpop.eup %4356  ;;  %v2146_v17 = vadd.f32 1.0, %v4355_v29  ;;  %v2719_v29 = vld [vmem:[#allocation15 + $0x98] sm:$0xff] }
 0xa0d   :  { %v2152_v32 = vadd.f32 1.0, %v4357_v35  ;;  %v4359_v40 = vpop.eup %4358  ;;  %v4041_v35 = vpack.c.bf16 %v2714_v57, %v2712_v26  ;;  %v2752_v26 = vld [vmem:[#allocation15 + $0x1a0] sm:$0xff]  ;;  %v2754_v57 = vld [vmem:[#allocation15 + $0x1b0] sm:$0xff] }
 0xa0e   :  { %4362 = vrcp.f32 %v2146_v17  ;;  %v4361_v22 = vpop.eup %4360  ;;  %v2159_v2 = vadd.f32 1.0, %v4359_v40  ;;  %v4043_v17 = vpack.c.bf16 %v2719_v29, %v2717_v27  ;;  %v2718_v40 = vld [vmem:[#allocation15 + $0x90] sm:$0xff]  ;;  %v2757_v27 = vld [vmem:[#allocation15 + $0x1c8] sm:$0xff]  ;;  %v2759_v29 = vld [vmem:[#allocation15 + $0x1d8] sm:$0xff] }
 0xa0f   :  { %4364 = vrcp.f32 %v2152_v32  ;;  %v2716_v32 = vld [vmem:[#allocation15 + $0x80] sm:$0xff] }
 0xa10   :  { %4366 = vrcp.f32 %v2159_v2  ;;  %v2722_v2 = vld [vmem:[#allocation15 + $0xb0] sm:$0xff] }
 0xa18   :  { %v4363_v36 = vpop.eup %4362 }
 0xa19   :  { %v4365_v37 = vpop.eup %4364  ;;  %v2166_v1 = vmul.f32 %v4363_v36, %v4361_v22  ;;  %v2721_v22 = vld [vmem:[#allocation15 + $0xa8] sm:$0xff]  ;;  %v2723_v36 = vld [vmem:[#allocation15 + $0xb8] sm:$0xff] }
 0xa1a   :  { %v2165_v11 = vmul.f32 %v4365_v37, %v2163_v24  ;;  %v4367_v51 = vpop.eup %4366  ;;  %v4045_v24 = vpack.c.bf16 %v2718_v40, %v2716_v32  ;;  %v4047_v37 = vpack.c.bf16 %v2723_v36, %v2721_v22  ;;  %v2756_v32 = vld [vmem:[#allocation15 + $0x1c0] sm:$0xff]  ;;  %v2758_v40 = vld [vmem:[#allocation15 + $0x1d0] sm:$0xff]  ;;  %v2761_v36 = vld [vmem:[#allocation15 + $0x1e8] sm:$0xff] }
 0xa1b   :  { %v4085_v22 = vpack.c.bf16 %v2758_v40, %v2756_v32  ;;  %v2670_v32 = vld [vmem:[%s5633_s16 + $0x10] sm:$0xff] }
 0xa1c   :  { %v2167_v16 = vadd.f32 %v2166_v1, %v2165_v11  ;;  %v2720_v1 = vld [vmem:[#allocation15 + $0xa0] sm:$0xff]  ;;  %v2725_v11 = vld [vmem:[#allocation15 + $0xc8] sm:$0xff] }
 0xa1e   :  { %4368 = vtanh.f32 %v2167_v16  ;;  %v2727_v16 = vld [vmem:[#allocation15 + $0xd8] sm:$0xff] }
 0xa28   :  { %v4369_v28 = vpop.eup %4368 }
 0xa29   :  { %v5481_v62 = vmul.f32 %v4369_v28, %v4367_v51  ;;  %v4049_v51 = vpack.c.bf16 %v2722_v2, %v2720_v1  ;;  %v4051_v28 = vpack.c.bf16 %v2727_v16, %v2725_v11  ;;  %v2760_v1 = vld [vmem:[#allocation15 + $0x1e0] sm:$0xff]  ;;  %v2762_v2 = vld [vmem:[#allocation15 + $0x1f0] sm:$0xff] }
 0xa2a   :  { %v4089_v11 = vpack.c.bf16 %v2762_v2, %v2760_v1  ;;  %v2669_v16 = vld [vmem:[%s5633_s16 + $0x8] sm:$0xff] }
 0xad8   :  { %v2413_v13 = vpop.f32.mrb[40].mxu0 }
 0xad9   :  { %v2414_v8 = vadd.f32 %v2413_v13, %v2340_v38  ;;  %v2415_v6 = vpop.f32.mrb[41].mxu0  ;;  %v4061_v38 = vpack.c.bf16 %v2734_v45, %v2732_v20  ;;  %v2736_v13 = vld [vmem:[#allocation15 + $0x120] sm:$0xff]  ;;  %v3065_v20 = vld [vmem:[#allocation18 + $0x18] sm:$0xff] }
 0xada   :  { %v2416_v55 = vadd.f32 %v2415_v6, %v2344_v50  ;;  %v4063_v50 = vpack.c.bf16 %v2739_v3, %v2737_v49  ;;  %v2741_v6 = vld [vmem:[#allocation15 + $0x148] sm:$0xff]  ;;  %v3082_v45 = vld [vmem:[#allocation18 + $0xa0] sm:$0xff] }
 0xadb   :  { %v2418_v47 = vmax.f32 %v2414_v8, 0.0  ;;  %v2738_v8 = vld [vmem:[#allocation15 + $0x130] sm:$0xff]  ;;  %v3083_v49 = vld [vmem:[#allocation18 + $0xa8] sm:$0xff] }
 0xadc   :  { %v2419_v12 = vmax.f32 %v2416_v55, 0.0  ;;  %v4065_v10 = vpack.c.bf16 %v2738_v8, %v2736_v13  ;;  %v4067_v55 = vpack.c.bf16 %v2743_v52, %v2741_v6  ;;  %v5500_v34 = vpop.f32.mrb[42].mxu0  ;;  %v3067_v13 = vld [vmem:[#allocation18 + $0x28] sm:$0xff]  ;;  %v3084_v8 = vld [vmem:[#allocation18 + $0xb0] sm:$0xff]  ;;  %v3085_v6 = vld [vmem:[#allocation18 + $0xb8] sm:$0xff] }
 0xadd   :  { %v5502_v7 = vpop.f32.mrb[43].mxu0 }
 0xade   :  { %2560 = vmatprep.mubr.f32.mxu1 %v2419_v12  ;;  %v2745_v12 = vld [vmem:[#allocation15 + $0x168] sm:$0xff] }
 0xadf   :  { %2561 = vmatmul.mubr.f32.vlgmr.msra.gmra.mrb[18].mxu1 %v2418_v47  ;;  %v4069_v47 = vpack.c.bf16 %v2742_v42, %v2740_v23  ;;  %v3069_v23 = vld [vmem:[#allocation18 + $0x38] sm:$0xff]  ;;  %v3086_v42 = vld [vmem:[#allocation18 + $0xc0] sm:$0xff] }
 0xae0   :  { %4030 = vmatpush1.bf16.msra.mxu1 %v4029_v41  ;;  %v2747_v41 = vld [vmem:[#allocation15 + $0x178] sm:$0xff] }
 0xae1   :  { %4032 = vmatprep.subr.bf16.mxu1 %v4031_v59  ;;  %v4071_v59 = vpack.c.bf16 %v2747_v41, %v2745_v12  ;;  %v3087_v12 = vld [vmem:[#allocation18 + $0xc8] sm:$0xff] }
 0xae4   :  { %4034 = vmatpush1.bf16.msra.mxu1 %v4033_v43  ;;  %v4073_v43 = vpack.c.bf16 %v2746_v54, %v2744_v0  ;;  %v3071_v0 = vld [vmem:[#allocation18 + $0x48] sm:$0xff]  ;;  %v3088_v54 = vld [vmem:[#allocation18 + $0xd0] sm:$0xff] }
 0xae5   :  { %4036 = vmatprep.subr.bf16.mxu1 %v4035_v48  ;;  %v4075_v48 = vpack.c.bf16 %v2751_v60, %v2749_v33  ;;  %v3089_v33 = vld [vmem:[#allocation18 + $0xd8] sm:$0xff] }
 0xae8   :  { %4038 = vmatpush1.bf16.msra.mxu1 %v4037_v15  ;;  %v4077_v15 = vpack.c.bf16 %v2750_v58, %v2748_v53  ;;  %v3073_v53 = vld [vmem:[#allocation18 + $0x58] sm:$0xff]  ;;  %v3090_v58 = vld [vmem:[#allocation18 + $0xe0] sm:$0xff] }
 0xae9   :  { %4040 = vmatprep.subr.bf16.mxu1 %v4039_v18  ;;  %v4079_v18 = vpack.c.bf16 %v2755_v5, %v2753_v63  ;;  %v3091_v63 = vld [vmem:[#allocation18 + $0xe8] sm:$0xff]  ;;  %v2484_v5 = vld [vmem:[#allocation12] sm:$0x3] }
 0xaec   :  { %4042 = vmatpush1.bf16.msra.mxu1 %v4041_v35  ;;  %v4081_v35 = vpack.c.bf16 %v2754_v57, %v2752_v26  ;;  %v2489_v26 = vrot.slane %v2484_v5, %v5682_v46  ;;  %v2493_v57 = vrot.slane %v2484_v5, %v5683_v4 }
 0xaed   :  { %4044 = vmatprep.subr.bf16.mxu1 %v4043_v17  ;;  %v4083_v17 = vpack.c.bf16 %v2759_v29, %v2757_v27 }
 0xaf0   :  { %4046 = vmatpush1.bf16.msra.mxu1 %v4045_v24  ;;  %v2763_v24 = vld [vmem:[#allocation15 + $0x1f8] sm:$0xff] }
 0xaf1   :  { %4048 = vmatprep.subr.bf16.mxu1 %v4047_v37  ;;  %v4087_v37 = vpack.c.bf16 %v2763_v24, %v2761_v36  ;;  %v2675_v36 = vld [vmem:[%s5633_s16 + $0x38] sm:$0xff] }
 0xaf4   :  { %4050 = vmatpush1.bf16.msra.mxu1 %v4049_v51  ;;  %v2671_v51 = vld [vmem:[%s5633_s16 + $0x18] sm:$0xff] }
 0xaf5   :  { %4052 = vmatprep.subr.bf16.mxu1 %v4051_v28  ;;  %v4091_v28 = vpack.c.bf16 %v2671_v51, %v2669_v16  ;;  %v2674_v16 = vld [vmem:[%s5633_s16 + $0x30] sm:$0xff]  ;;  %v2677_v51 = vld [vmem:[%s5633_s16 + $0x48] sm:$0xff] }
 0xaf8   :  { %4054 = vmatpush1.bf16.msra.mxu1 %v4053_v14  ;;  %v3062_v14 = vld [vmem:[#allocation18] sm:$0xff] }
 0xaf9   :  { %4056 = vmatprep.subr.bf16.mxu1 %v4055_v31  ;;  %v4187_v31 = vpack.c.bf16 %v3079_v21, %v3078_v9  ;;  %v4189_v61 = vpack.c.bf16 %v3063_v39, %v3062_v14  ;;  %v2676_v14 = vld [vmem:[%s5633_s16 + $0x40] sm:$0xff]  ;;  %v2681_v39 = vld [vmem:[%s5633_s16 + $0x68] sm:$0xff] }
 0xafb   :  { %4188 = vmatprep.subr.bf16.mxu0 %v4187_v31  ;;  %v2678_v31 = vld [vmem:[%s5633_s16 + $0x50] sm:$0xff] }
 0xafc   :  { %4058 = vmatpush1.bf16.msra.mxu1 %v4057_v19  ;;  %v4191_v19 = vpack.c.bf16 %v3081_v56, %v3080_v30  ;;  %4190 = vmatpush3.bf16.msra.mxu0 %v4189_v61  ;;  %v2683_v30 = vld [vmem:[%s5633_s16 + $0x78] sm:$0xff]  ;;  %v2680_v61 = vld [vmem:[%s5633_s16 + $0x60] sm:$0xff] }
 0xafd   :  { %4060 = vmatprep.subr.bf16.mxu1 %v4059_v25  ;;  %v3064_v25 = vld [vmem:[#allocation18 + $0x10] sm:$0xff]  ;;  %v4103_v56 = vpack.c.bf16 %v2683_v30, %v2681_v39 }
 0xafe   :  { %v4193_v3 = vpack.c.bf16 %v3065_v20, %v3064_v25  ;;  %4192 = vmatprep.subr.bf16.mxu0 %v4191_v19  ;;  %v2682_v19 = vld [vmem:[%s5633_s16 + $0x70] sm:$0xff]  ;;  %v2685_v25 = vld [vmem:[%s5633_s16 + $0x88] sm:$0xff]  ;;  %v2687_v20 = vld [vmem:[%s5633_s16 + $0x98] sm:$0xff] }
 0xb00   :  { %4062 = vmatpush1.bf16.msra.mxu1 %v4061_v38  ;;  %v4195_v38 = vpack.c.bf16 %v3083_v49, %v3082_v45  ;;  %4194 = vmatpush3.bf16.msra.mxu0 %v4193_v3  ;;  %v4105_v45 = vpack.c.bf16 %v2682_v19, %v2680_v61  ;;  %v4107_v49 = vpack.c.bf16 %v2687_v20, %v2685_v25  ;;  %v2684_v3 = vld [vmem:[%s5633_s16 + $0x80] sm:$0xff]  ;;  %v2930_v61 = vld [vmem:[#allocation16 + $0xa8] sm:$0xff] }
 0xb01   :  { %4064 = vmatprep.subr.bf16.mxu1 %v4063_v50  ;;  %v3066_v50 = vld [vmem:[#allocation18 + $0x20] sm:$0xff]  ;;  %v2932_v19 = vld [vmem:[#allocation16 + $0xb8] sm:$0xff] }
 0xb02   :  { %v4197_v52 = vpack.c.bf16 %v3067_v13, %v3066_v50  ;;  %4196 = vmatprep.subr.bf16.mxu0 %v4195_v38  ;;  %v2686_v38 = vld [vmem:[%s5633_s16 + $0x90] sm:$0xff]  ;;  %v2689_v50 = vld [vmem:[%s5633_s16 + $0xa8] sm:$0xff]  ;;  %v2691_v13 = vld [vmem:[%s5633_s16 + $0xb8] sm:$0xff]  ;;  %v4143_v20 = vpack.c.bf16 %v2932_v19, %v2930_v61 }
 0xb03   :  { %v2970_v61 = vld [vmem:[#allocation16 + $0x1e8] sm:$0xff]  ;;  %v2972_v19 = vld [vmem:[#allocation16 + $0x1f8] sm:$0xff] }
 0xb04   :  { %4066 = vmatpush1.bf16.msra.mxu1 %v4065_v10  ;;  %v4199_v10 = vpack.c.bf16 %v3085_v6, %v3084_v8  ;;  %4198 = vmatpush3.bf16.msra.mxu0 %v4197_v52  ;;  %v4109_v8 = vpack.c.bf16 %v2686_v38, %v2684_v3  ;;  %v4111_v6 = vpack.c.bf16 %v2691_v13, %v2689_v50  ;;  %v2688_v52 = vld [vmem:[%s5633_s16 + $0xa0] sm:$0xff]  ;;  %v2934_v3 = vld [vmem:[#allocation16 + $0xc8] sm:$0xff] }
 0xb05   :  { %4068 = vmatprep.subr.bf16.mxu1 %v4067_v55  ;;  %v3068_v55 = vld [vmem:[#allocation18 + $0x30] sm:$0xff]  ;;  %v2936_v38 = vld [vmem:[#allocation16 + $0xd8] sm:$0xff] }
 0xb06   :  { %v4201_v41 = vpack.c.bf16 %v3069_v23, %v3068_v55  ;;  %4200 = vmatprep.subr.bf16.mxu0 %v4199_v10  ;;  %v2690_v10 = vld [vmem:[%s5633_s16 + $0xb0] sm:$0xff]  ;;  %v2693_v55 = vld [vmem:[%s5633_s16 + $0xc8] sm:$0xff]  ;;  %v2695_v23 = vld [vmem:[%s5633_s16 + $0xd8] sm:$0xff]  ;;  %v4147_v13 = vpack.c.bf16 %v2936_v38, %v2934_v3 }
 0xb07   :  { %v2971_v3 = vld [vmem:[#allocation16 + $0x1f0] sm:$0xff] }
 0xb08   :  { %4070 = vmatpush1.bf16.msra.mxu1 %v4069_v47  ;;  %v4203_v47 = vpack.c.bf16 %v3087_v12, %v3086_v42  ;;  %4202 = vmatpush3.bf16.msra.mxu0 %v4201_v41  ;;  %v4113_v42 = vpack.c.bf16 %v2690_v10, %v2688_v52  ;;  %v4115_v12 = vpack.c.bf16 %v2695_v23, %v2693_v55  ;;  %v2692_v41 = vld [vmem:[%s5633_s16 + $0xc0] sm:$0xff]  ;;  %v2938_v52 = vld [vmem:[#allocation16 + $0xe8] sm:$0xff] }
 0xb09   :  { %4072 = vmatprep.subr.bf16.mxu1 %v4071_v59  ;;  %v3070_v59 = vld [vmem:[#allocation18 + $0x40] sm:$0xff]  ;;  %v2940_v10 = vld [vmem:[#allocation16 + $0xf8] sm:$0xff] }
 0xb0a   :  { %v4205_v60 = vpack.c.bf16 %v3071_v0, %v3070_v59  ;;  %4204 = vmatprep.subr.bf16.mxu0 %v4203_v47  ;;  %v2694_v47 = vld [vmem:[%s5633_s16 + $0xd0] sm:$0xff]  ;;  %v5585_v59 = vld [vmem:[#allocation13] sm:$0x3]  ;;  %v2697_v0 = vld [vmem:[%s5633_s16 + $0xe8] sm:$0xff]  ;;  %v4151_v23 = vpack.c.bf16 %v2940_v10, %v2938_v52 }
 0xb0b   :  { %v3092_v10 = vld [vmem:[#allocation18 + $0xf0] sm:$0xff] }
 0xb0c   :  { %4074 = vmatpush1.bf16.msra.mxu1 %v4073_v43  ;;  %v4207_v43 = vpack.c.bf16 %v3089_v33, %v3088_v54  ;;  %4206 = vmatpush3.bf16.msra.mxu0 %v4205_v60  ;;  %v2699_v54 = vld [vmem:[%s5633_s16 + $0xf8] sm:$0xff]  ;;  %v4117_v33 = vpack.c.bf16 %v2694_v47, %v2692_v41  ;;  %v2581_v60 = vrot.slane %v5585_v59, %v5683_v4  ;;  %v2942_v41 = vld [vmem:[#allocation16 + $0x108] sm:$0xff]  ;;  %v2944_v47 = vld [vmem:[#allocation16 + $0x118] sm:$0xff] }
 0xb0d   :  { %4076 = vmatprep.subr.bf16.mxu1 %v4075_v48  ;;  %v3072_v48 = vld [vmem:[#allocation18 + $0x50] sm:$0xff] }
 0xb0e   :  { %4208 = vmatprep.subr.bf16.mxu0 %v4207_v43  ;;  %v4119_v43 = vpack.c.bf16 %v2699_v54, %v2697_v0  ;;  %v4155_v54 = vpack.c.bf16 %v2944_v47, %v2942_v41 }
 0xb10   :  { %4078 = vmatpush1.bf16.msra.mxu1 %v4077_v15  ;;  %v4209_v15 = vpack.c.bf16 %v3073_v53, %v3072_v48  ;;  %v2696_v48 = vld [vmem:[%s5633_s16 + $0xe0] sm:$0xff]  ;;  %v2698_v53 = vld [vmem:[%s5633_s16 + $0xf0] sm:$0xff] }
 0xb11   :  { %4080 = vmatprep.subr.bf16.mxu1 %v4079_v18  ;;  %v4211_v18 = vpack.c.bf16 %v3091_v63, %v3090_v58  ;;  %v2910_v58 = vld [vmem:[#allocation16 + $0x8] sm:$0xff]  ;;  %v2912_v63 = vld [vmem:[#allocation16 + $0x18] sm:$0xff]  ;;  %v4121_v5 = vpack.c.bf16 %v2698_v53, %v2696_v48 }
 0xb12   :  { %4210 = vmatpush3.bf16.msra.mxu0 %v4209_v15  ;;  %v2664_v15 = vadd.f32 %v5502_v7, %v2581_v60  ;;  %v2943_v60 = vld [vmem:[#allocation16 + $0x110] sm:$0xff]  ;;  %v2948_v48 = vld [vmem:[#allocation16 + $0x138] sm:$0xff] }
 0xb13   :  { %4212 = vmatprep.subr.bf16.mxu0 %v4211_v18  ;;  %v4123_v18 = vpack.c.bf16 %v2912_v63, %v2910_v58  ;;  %v2945_v63 = vld [vmem:[#allocation16 + $0x120] sm:$0xff] }
 0xb14   :  { %4082 = vmatpush1.bf16.msra.mxu1 %v4081_v35 }
 0xb15   :  { %4084 = vmatprep.subr.bf16.mxu1 %v4083_v17  ;;  %v2668_v17 = vld [vmem:[%s5633_s16] sm:$0xff] }
 0xb18   :  { %4086 = vmatpush1.bf16.msra.mxu1 %v4085_v22  ;;  %v2673_v22 = vld [vmem:[%s5633_s16 + $0x28] sm:$0xff] }
 0xb19   :  { %4088 = vmatprep.subr.bf16.mxu1 %v4087_v37  ;;  %v4093_v37 = vpack.c.bf16 %v2670_v32, %v2668_v17  ;;  %v4095_v2 = vpack.c.bf16 %v2675_v36, %v2673_v22  ;;  %v2667_v17 = vmax.f32 %v2664_v15, 0.0  ;;  %v2836_v32 = vrot.slane %v5481_v62, 4  ;;  %v2913_v22 = vld [vmem:[#allocation16 + $0x20] sm:$0xff]  ;;  %v2915_v36 = vld [vmem:[#allocation16 + $0x30] sm:$0xff]  ;;  %v2950_v15 = vld [vmem:[#allocation16 + $0x148] sm:$0xff] }
 0xb1a   :  { %v4129_v7 = vpack.c.bf16 %v2915_v36, %v2913_v22  ;;  %v2953_v22 = vld [vmem:[#allocation16 + $0x160] sm:$0xff]  ;;  %v2955_v36 = vld [vmem:[#allocation16 + $0x170] sm:$0xff] }
 0xb1c   :  { %4090 = vmatpush1.bf16.msra.mxu1 %v4089_v11  ;;  %v2672_v11 = vld [vmem:[%s5633_s16 + $0x20] sm:$0xff] }
 0xb1d   :  { %4092 = vmatprep.subr.bf16.mxu1 %v4091_v28  ;;  %v2679_v28 = vld [vmem:[%s5633_s16 + $0x58] sm:$0xff]  ;;  %v4097_v9 = vpack.c.bf16 %v2674_v16, %v2672_v11  ;;  %v2922_v16 = vld [vmem:[#allocation16 + $0x68] sm:$0xff] }
 0xb1e   :  { %v4099_v21 = vpack.c.bf16 %v2679_v28, %v2677_v51  ;;  %v2919_v11 = vld [vmem:[#allocation16 + $0x50] sm:$0xff]  ;;  %v2924_v51 = vld [vmem:[#allocation16 + $0x78] sm:$0xff] }
 0xb1f   :  { %v4135_v62 = vpack.c.bf16 %v2924_v51, %v2922_v16  ;;  %v2962_v16 = vld [vmem:[#allocation16 + $0x1a8] sm:$0xff]  ;;  %v2964_v51 = vld [vmem:[#allocation16 + $0x1b8] sm:$0xff] }
 0xbb2   :  { %v2562_v27 = vpop.f32.mrb[18].mxu1 }
 0xbb3   :  { %v2563_v29 = vadd.f32 %v2562_v27, %v2489_v26  ;;  %v2564_v35 = vpop.f32.mrb[19].mxu1  ;;  %v2909_v26 = vld [vmem:[#allocation16] sm:$0xff]  ;;  %v2914_v27 = vld [vmem:[#allocation16 + $0x28] sm:$0xff] }
 0xbb4   :  { %v2565_v40 = vadd.f32 %v2564_v35, %v2493_v57  ;;  %v2911_v57 = vld [vmem:[#allocation16 + $0x10] sm:$0xff] }
 0xbb5   :  { %v2567_v1 = vmax.f32 %v2563_v29, 0.0  ;;  %v2916_v29 = vld [vmem:[#allocation16 + $0x38] sm:$0xff]  ;;  %v4125_v35 = vpack.c.bf16 %v2911_v57, %v2909_v26 }
 0xbb6   :  { %v2568_v24 = vmax.f32 %v2565_v40, 0.0  ;;  %v4127_v40 = vpack.c.bf16 %v2916_v29, %v2914_v27  ;;  %v2949_v27 = vld [vmem:[#allocation16 + $0x140] sm:$0xff]  ;;  %v2951_v29 = vld [vmem:[#allocation16 + $0x150] sm:$0xff] }
 0xbb8   :  { %2828 = vmatprep.mubr.f32.mxu1 %v2568_v24  ;;  %v2918_v24 = vld [vmem:[#allocation16 + $0x48] sm:$0xff] }
 0xbb9   :  { %2829 = vmatmul.mubr.f32.vlgmr.msra.gmra.mrb[20].mxu1 %v2567_v1 }
 0xbba   :  { %4094 = vmatpush1.bf16.msra.mxu1 %v4093_v37  ;;  %2902 = vmatprep.mubr.f32.mxu1 %v5675_v44  ;;  %v4101_v44 = vpack.c.bf16 %v2678_v31, %v2676_v14  ;;  %v2920_v37 = vld [vmem:[#allocation16 + $0x58] sm:$0xff]  ;;  %v2926_v14 = vld [vmem:[#allocation16 + $0x88] sm:$0xff] }
 0xbbb   :  { %4096 = vmatprep.subr.bf16.mxu1 %v4095_v2  ;;  %v4131_v1 = vpack.c.bf16 %v2920_v37, %v2918_v24  ;;  %v2917_v2 = vld [vmem:[#allocation16 + $0x40] sm:$0xff]  ;;  %v2928_v31 = vld [vmem:[#allocation16 + $0x98] sm:$0xff]  ;;  %v2958_v24 = vld [vmem:[#allocation16 + $0x188] sm:$0xff] }
 0xbbc   :  { %v4133_v28 = vpack.c.bf16 %v2919_v11, %v2917_v2  ;;  %v4139_v30 = vpack.c.bf16 %v2928_v31, %v2926_v14  ;;  %v2960_v37 = vld [vmem:[#allocation16 + $0x198] sm:$0xff]  ;;  %v2957_v2 = vld [vmem:[#allocation16 + $0x180] sm:$0xff]  ;;  %v2959_v11 = vld [vmem:[#allocation16 + $0x190] sm:$0xff] }
 0xbbd   :  { %v2966_v14 = vld [vmem:[#allocation16 + $0x1c8] sm:$0xff]  ;;  %v2968_v31 = vld [vmem:[#allocation16 + $0x1d8] sm:$0xff] }
 0xbbe   :  { %4098 = vmatpush1.bf16.msra.mxu1 %v4097_v9  ;;  %v2921_v9 = vld [vmem:[#allocation16 + $0x60] sm:$0xff] }
 0xbbf   :  { %4100 = vmatprep.subr.bf16.mxu1 %v4099_v21  ;;  %v2923_v21 = vld [vmem:[#allocation16 + $0x70] sm:$0xff] }
 0xbc0   :  { %v4137_v39 = vpack.c.bf16 %v2923_v21, %v2921_v9  ;;  %v2961_v9 = vld [vmem:[#allocation16 + $0x1a0] sm:$0xff]  ;;  %v2963_v21 = vld [vmem:[#allocation16 + $0x1b0] sm:$0xff] }
 0xbc2   :  { %4102 = vmatpush1.bf16.msra.mxu1 %v4101_v44  ;;  %v2925_v44 = vld [vmem:[#allocation16 + $0x80] sm:$0xff] }
 0xbc3   :  { %4104 = vmatprep.subr.bf16.mxu1 %v4103_v56  ;;  %v2927_v56 = vld [vmem:[#allocation16 + $0x90] sm:$0xff] }
 0xbc4   :  { %v4141_v25 = vpack.c.bf16 %v2927_v56, %v2925_v44  ;;  %v2965_v44 = vld [vmem:[#allocation16 + $0x1c0] sm:$0xff]  ;;  %v2967_v56 = vld [vmem:[#allocation16 + $0x1d0] sm:$0xff] }
 0xbc6   :  { %4106 = vmatpush1.bf16.msra.mxu1 %v4105_v45  ;;  %v2929_v45 = vld [vmem:[#allocation16 + $0xa0] sm:$0xff] }
 0xbc7   :  { %4108 = vmatprep.subr.bf16.mxu1 %v4107_v49  ;;  %v2931_v49 = vld [vmem:[#allocation16 + $0xb0] sm:$0xff] }
 0xbc8   :  { %v4145_v50 = vpack.c.bf16 %v2931_v49, %v2929_v45  ;;  %v4183_v45 = vpack.c.bf16 %v2972_v19, %v2970_v61  ;;  %v2969_v49 = vld [vmem:[#allocation16 + $0x1e0] sm:$0xff] }
 0xbc9   :  { %v4185_v38 = vpack.c.bf16 %v2971_v3, %v2969_v49 }
 0xbca   :  { %4110 = vmatpush1.bf16.msra.mxu1 %v4109_v8  ;;  %v2933_v8 = vld [vmem:[#allocation16 + $0xc0] sm:$0xff] }
 0xbcb   :  { %4112 = vmatprep.subr.bf16.mxu1 %v4111_v6  ;;  %v2935_v6 = vld [vmem:[#allocation16 + $0xd0] sm:$0xff] }
 0xbcc   :  { %v4149_v55 = vpack.c.bf16 %v2935_v6, %v2933_v8  ;;  %v3074_v8 = vld [vmem:[#allocation18 + $0x60] sm:$0xff]  ;;  %v3075_v6 = vld [vmem:[#allocation18 + $0x68] sm:$0xff] }
 0xbcd   :  { %v4213_v52 = vpack.c.bf16 %v3075_v6, %v3074_v8 }
 0xbce   :  { %4114 = vmatpush1.bf16.msra.mxu1 %v4113_v42  ;;  %v2937_v42 = vld [vmem:[#allocation16 + $0xe0] sm:$0xff] }
 0xbcf   :  { %4116 = vmatprep.subr.bf16.mxu1 %v4115_v12  ;;  %v2939_v12 = vld [vmem:[#allocation16 + $0xf0] sm:$0xff]  ;;  %4214 = vmatpush3.bf16.msra.mxu0 %v4213_v52 }
 0xbd0   :  { %v4153_v0 = vpack.c.bf16 %v2939_v12, %v2937_v42  ;;  %v3077_v42 = vld [vmem:[#allocation18 + $0x78] sm:$0xff] }
 0xbd2   :  { %4118 = vmatpush1.bf16.msra.mxu1 %v4117_v33  ;;  %v2941_v33 = vld [vmem:[#allocation16 + $0x100] sm:$0xff] }
 0xbd3   :  { %4120 = vmatprep.subr.bf16.mxu1 %v4119_v43  ;;  %v2946_v43 = vld [vmem:[#allocation16 + $0x128] sm:$0xff]  ;;  %v4157_v53 = vpack.c.bf16 %v2943_v60, %v2941_v33 }
 0xbd4   :  { %v4159_v58 = vpack.c.bf16 %v2948_v48, %v2946_v43 }
 0xbd6   :  { %4122 = vmatpush1.bf16.msra.mxu1 %v4121_v5  ;;  %v2947_v5 = vld [vmem:[#allocation16 + $0x130] sm:$0xff] }
 0xbd7   :  { %4124 = vmatprep.subr.bf16.mxu1 %v4123_v18  ;;  %v2952_v18 = vld [vmem:[#allocation16 + $0x158] sm:$0xff]  ;;  %v4161_v26 = vpack.c.bf16 %v2947_v5, %v2945_v63 }
 0xbd8   :  { %v4163_v57 = vpack.c.bf16 %v2952_v18, %v2950_v15 }
 0xbd9   :  { %2903 = vmatmul.mubr.f32.vlgmr.msra.gmra.mrb[20].mxu1 %v2836_v32  ;;  %v4165_v32 = vpack.c.bf16 %v2951_v29, %v2949_v27 }
 0xbda   :  { %4126 = vmatpush1.bf16.msra.mxu1 %v4125_v35  ;;  %3037 = vmatprep.mubr.f32.mxu1 %v2667_v17  ;;  %v2954_v35 = vld [vmem:[#allocation16 + $0x168] sm:$0xff]  ;;  %v2956_v17 = vld [vmem:[#allocation16 + $0x178] sm:$0xff] }
 0xbdb   :  { %4128 = vmatprep.subr.bf16.mxu1 %v4127_v40  ;;  %v4167_v40 = vpack.c.bf16 %v2956_v17, %v2954_v35 }
 0xbde   :  { %4130 = vmatpush1.bf16.msra.mxu1 %v4129_v7  ;;  %v4169_v7 = vpack.c.bf16 %v2955_v36, %v2953_v22 }
 0xbdf   :  { %4132 = vmatprep.subr.bf16.mxu1 %v4131_v1  ;;  %v4171_v1 = vpack.c.bf16 %v2960_v37, %v2958_v24 }
 0xbe2   :  { %4134 = vmatpush1.bf16.msra.mxu1 %v4133_v28  ;;  %v4173_v28 = vpack.c.bf16 %v2959_v11, %v2957_v2 }
 0xbe3   :  { %4136 = vmatprep.subr.bf16.mxu1 %v4135_v62  ;;  %v4175_v62 = vpack.c.bf16 %v2964_v51, %v2962_v16 }
 0xbe6   :  { %4138 = vmatpush1.bf16.msra.mxu1 %v4137_v39  ;;  %v4177_v39 = vpack.c.bf16 %v2963_v21, %v2961_v9 }
 0xbe7   :  { %4140 = vmatprep.subr.bf16.mxu1 %v4139_v30  ;;  %v4179_v30 = vpack.c.bf16 %v2968_v31, %v2966_v14 }
 0xbea   :  { %4142 = vmatpush1.bf16.msra.mxu1 %v4141_v25  ;;  %v4181_v25 = vpack.c.bf16 %v2967_v56, %v2965_v44 }
 0xbeb   :  { %4144 = vmatprep.subr.bf16.mxu1 %v4143_v20  ;;  %v2577_v20 = vrot.slane %v5585_v59, %v5682_v46  ;;  %v3076_v59 = vld [vmem:[#allocation18 + $0x70] sm:$0xff] }
 0xbec   :  { %v4217_v12 = vpack.c.bf16 %v3077_v42, %v3076_v59 }
 0xbee   :  { %4146 = vmatpush1.bf16.msra.mxu1 %v4145_v50  ;;  %v2662_v50 = vadd.f32 %v5500_v34, %v2577_v20  ;;  %v3046_v34 = vld [vmem:[%s5636_s19] sm:$0x3] }
 0xbef   :  { %4148 = vmatprep.subr.bf16.mxu1 %v4147_v13  ;;  %v3051_v41 = vrot.slane %v3046_v34, %v5682_v46  ;;  %v3055_v47 = vrot.slane %v3046_v34, %v5683_v4 }
 0xbf0   :  { %v2666_v13 = vmax.f32 %v2662_v50, 0.0 }
 0xbf2   :  { %4150 = vmatpush1.bf16.msra.mxu1 %v4149_v55  ;;  %v3093_v55 = vld [vmem:[#allocation18 + $0xf8] sm:$0xff] }
 0xbf3   :  { %4152 = vmatprep.subr.bf16.mxu1 %v4151_v23  ;;  %v4215_v23 = vpack.c.bf16 %v3093_v55, %v3092_v10 }
 0xbf5   :  { %4216 = vmatprep.subr.bf16.mxu0 %v4215_v23 }
 0xbf6   :  { %4154 = vmatpush1.bf16.msra.mxu1 %v4153_v0  ;;  %4218 = vmatpush3.bf16.msra.mxu0 %v4217_v12 }
 0xbf7   :  { %4156 = vmatprep.subr.bf16.mxu1 %v4155_v54 }
 0xbfa   :  { %4158 = vmatpush1.bf16.msra.mxu1 %v4157_v53 }
 0xbfb   :  { %4160 = vmatprep.subr.bf16.mxu1 %v4159_v58  ;;  %v3217_v58 = vld [vmem:[%s5638_s21] ss:$0 sm:$0xff] }
 0xbfe   :  { %4162 = vmatpush1.bf16.msra.mxu1 %v4161_v26 }
 0xbff   :  { %4164 = vmatprep.subr.bf16.mxu1 %v4163_v57 }
 0xc02   :  { %4166 = vmatpush1.bf16.msra.mxu1 %v4165_v32 }
 0xc03   :  { %4168 = vmatprep.subr.bf16.mxu1 %v4167_v40 }
 0xc06   :  { %4170 = vmatpush1.bf16.msra.mxu1 %v4169_v7 }
 0xc07   :  { %4172 = vmatprep.subr.bf16.mxu1 %v4171_v1 }
 0xc0a   :  { %4174 = vmatpush1.bf16.msra.mxu1 %v4173_v28 }
 0xc0b   :  { %4176 = vmatprep.subr.bf16.mxu1 %v4175_v62 }
 0xc0e   :  { %4178 = vmatpush1.bf16.msra.mxu1 %v4177_v39 }
 0xc0f   :  { %4180 = vmatprep.subr.bf16.mxu1 %v4179_v30 }
 0xc12   :  { %4182 = vmatpush1.bf16.msra.mxu1 %v4181_v25 }
 0xc13   :  { %4184 = vmatprep.subr.bf16.mxu1 %v4183_v45 }
 0xc16   :  { %4186 = vmatpush1.bf16.msra.mxu1 %v4185_v38 }
 0xc19   :  { %3038 = vmatmul.mubr.f32.vlgmr.msra.gmra.mrb[20].mxu1 %v2666_v13 }
 0xcec   :  { %v3039_v0 = vpop.f32.mrb[20].mxu1 }
 0xced   :  { %v3058_v54 = vadd.f32 %v3051_v41, %v3039_v0  ;;  %v3041_v33 = vpop.f32.mrb[21].mxu1 }
 0xcee   :  { %v3059_v60 = vadd.f32 %v3055_v47, %v3041_v33 }
 0xcef   :  { %v3060_v48 = vmax.f32 %v3058_v54, 0.0 }
 0xcf0   :  { %v3061_v43 = vmax.f32 %v3059_v60, 0.0 }
 0xcf2   :  { %3165 = vmatprep.mubr.f32.mxu0 %v3061_v43 }
 0xcf3   :  { %3166 = vmatmul.mubr.f32.vlgmr.msra.gmra.mrb[44].mxu0 %v3060_v48 }
 0xdc6   :  { %v3250_v53 = vpop.f32.mrb[44].mxu0 }
 0xdc7   :  { %v3251_v63 = vpop.f32.mrb[45].mxu0 }
 0xdc8   :  { %v3252_v5 = vadd.f32 %v3251_v63, %v3250_v53 }
 0xdca   :  { %v3168_v15 = vadd.f32 %v3252_v5, %v3217_v58 }
 0xdcc   :  { %v3171_v18 = vmax.f32 %v3168_v15, 0.0 }
 0xdce   :  { %3172 = vst [vmem:[%s5685_s4] sm:$0xf] %v3171_v18 }
 0xdcf   :  { %3177 = vsyncpa [#allocation3], 1 }
 0xdd0   :  { %3178 = vsyncpa [#allocation5], 1 }
 0xdd1   :  { %3179 = vsyncpa [#allocation8], 1 }
 0xdd2   :  { %3180 = vsyncpa [#allocation11], 1 }
 0xdd3   :  { %3181 = vsyncpa [#allocation14], 1 }
 0xdd4   :  { %3182 = vsyncpa [#allocation17], 1 }

</bundles_post_ra>
